<compile_context>
chip_gen: v7x
topology: tpu7x:2x2x1
jax: 0.10.0
libtpu: 0.0.40
codegen_flags: <defaults>
</compile_context>

<pallas_src>
import jax
import jax.numpy as jnp
from jax.experimental import pallas as pl
from jax.experimental.pallas import tpu as pltpu

# ----------------------------- small synthetic config -----------------------------
BATCH = 2
IN_CH = 3          # RGB, as in the real model
IMG = 32           # (real model: 384)
PATCH = 8          # (real model: 16)
N_PATCH = (IMG // PATCH) ** 2            # 16
SEQ = N_PATCH + 1                        # +cls token = 17
S_PAD = 24                               # SEQ padded to a multiple of 8 sublanes
EMBED = 32         # (real model: 768)
NUM_HEADS = 4      # (real model: 12)
HEAD_DIM = EMBED // NUM_HEADS            # 8
MLP_DIM = 4 * EMBED                      # 128 (real model: 3072)
DEPTH = 2          # (real model: 12)
NUM_CLASSES = 16   # (real model: 1000)
C_PAD = 128                              # lane-dense logits padding
KDIM = IN_CH * PATCH * PATCH             # 192 = im2col patch length, (c, i, j) order
BS = BATCH * S_PAD                       # 48 = batch-stacked token rows
LN_EPS = 1e-6      # mmpretrain ViT uses LN(eps=1e-6)
NEG_INF = -1e30


# ------------------------------- in-kernel helpers ---------------------------------

def _ln(x, g, b):
    mu = jnp.mean(x, axis=-1, keepdims=True)
    xc = x - mu
    var = jnp.mean(xc * xc, axis=-1, keepdims=True)
    return xc * jax.lax.rsqrt(var + LN_EPS) * g + b


def _erf(z):
    # TODO(synk): lax.erf is not in the guaranteed Mosaic elementwise lowering set; use
    # Abramowitz & Stegun 7.1.26 (|err| <= 1.5e-7 ~ f32 eps) built from exp/mul/add/select.
    a1, a2, a3, a4, a5 = 0.254829592, -0.284496736, 1.421413741, -1.453152027, 1.061405429
    pc = 0.3275911
    sgn = jnp.where(z < 0.0, -1.0, 1.0)
    az = jnp.abs(z)
    t = pl.reciprocal(1.0 + pc * az, approx=True)   # EUP slot instead of VPU divide
    poly = ((((a5 * t + a4) * t + a3) * t + a2) * t + a1) * t
    return sgn * (1.0 - poly * jnp.exp(-az * az))


def _gelu_exact(x):
    # PyTorch nn.GELU default (erf form)
    return 0.5 * x * (1.0 + _erf(x * 0.7071067811865476))


# ---------------------------------- fused kernel -----------------------------------

def _vit_kernel(patches_ref, pw_ref, base_ref,
                wqkv_ref, wo_ref, fc1w_ref, fc2w_ref, pvec_ref,
                lnf_ref, hw_ref, hb_ref,
                out_ref):
    """Single grid step.  Token activations are a [BS, EMBED] value carried through a
    static layer unroll; no intermediate activation touches HBM."""

    # ---- patch embed + cls token + pos embed (all batch rows at once) ----
    # base_ref already holds (cls + pos[0]) in row 0 of each batch block, pos[1:]+conv
    # bias in rows 1..SEQ-1 and zeros in padded rows; patch rows pick up x_patch @ W here
    # (cls / padded rows of `patches` are zero).
    x = base_ref[...] + jnp.dot(patches_ref[...], pw_ref[...],
                                preferred_element_type=jnp.float32)      # [BS, D]

    # Additive key mask (0 for real keys, -1e30 for padded keys), built once.
    key_mask = jnp.where(
        jax.lax.broadcasted_iota(jnp.int32, (1, S_PAD), 1) < SEQ, 0.0, NEG_INF)

    scale = HEAD_DIM ** -0.5

    for l in range(DEPTH):                                   # static unroll over layers
        pv = pvec_ref[l]                                     # [8, 128] packed params
        ln1_g = pv[0:1, 0:EMBED]
        ln1_b = pv[1:2, 0:EMBED]
        ln2_g = pv[2:3, 0:EMBED]
        ln2_b = pv[3:4, 0:EMBED]
        bqkv = pv[4:5, 0:3 * EMBED]
        bo = pv[5:6, 0:EMBED]
        fc1_b = pv[6:7, 0:MLP_DIM]
        fc2_b = pv[7:8, 0:EMBED]

        # ---- MHA: fused LN1 + single QKV matmul + per-(batch, head) attention ----
        y = _ln(x, ln1_g, ln1_b)
        qkv = jnp.dot(y, wqkv_ref[l],
                      preferred_element_type=jnp.float32) + bqkv          # [BS, 3D]

        ctx_blocks = []
        for b in range(BATCH):                               # static unroll (2)
            r0 = b * S_PAD
            heads = []
            for h in range(NUM_HEADS):                       # static unroll (4)
                c0 = h * HEAD_DIM
                q = qkv[r0:r0 + S_PAD, c0:c0 + HEAD_DIM]
                k = qkv[r0:r0 + S_PAD, EMBED + c0:EMBED + c0 + HEAD_DIM]
                v = qkv[r0:r0 + S_PAD, 2 * EMBED + c0:2 * EMBED + c0 + HEAD_DIM]
                s = jax.lax.dot_general(q, k, (((1,), (1,)), ((), ())),
                                        preferred_element_type=jnp.float32) * scale
                s = s + key_mask                             # mask padded key positions
                s = s - jnp.max(s, axis=-1, keepdims=True)
                p = jnp.exp(s)
                p = p * pl.reciprocal(jnp.sum(p, axis=-1, keepdims=True), approx=True)
                heads.append(jnp.dot(p, v, preferred_element_type=jnp.float32))
            ctx_blocks.append(jnp.concatenate(heads, axis=1))             # [S_PAD, D]
        ctx = jnp.concatenate(ctx_blocks, axis=0)                          # [BS, D]

        # single fused output projection + residual
        x = x + jnp.dot(ctx, wo_ref[l], preferred_element_type=jnp.float32) + bo

        # ---- FFN: LN2 + FC1 + exact GELU + FC2 + residual ----
        y2 = _ln(x, ln2_g, ln2_b)
        h1 = jnp.dot(y2, fc1w_ref[l], preferred_element_type=jnp.float32) + fc1_b
        h1 = _gelu_exact(h1)
        x = x + jnp.dot(h1, fc2w_ref[l], preferred_element_type=jnp.float32) + fc2_b

    # ---- final LN + cls-token extraction + classification head ----
    lnf = lnf_ref[...]
    cls = jnp.concatenate([x[b * S_PAD:b * S_PAD + 1, :] for b in range(BATCH)], axis=0)
    yf = _ln(cls, lnf[0:1, :], lnf[1:2, :])                                # [B, D]
    out_ref[...] = (jnp.dot(yf, hw_ref[...], preferred_element_type=jnp.float32)
                    + hb_ref[...])                                         # [B, C_PAD]


# ------------------------------ wrapper / param prep --------------------------------

def _prep_params(params):
    """Pure layout plumbing on the tiny weights (runs once in XLA glue): stack per-layer
    weights along a leading layer axis, pack all small per-layer vectors into one
    [L, 8, 128] tensor, and lane-pad the classification head to 128."""
    D = EMBED
    layers = params["layers"]

    def stack(name):
        return jnp.stack([lp[name] for lp in layers], axis=0)

    def row(name):                                   # -> [L, 1, 128] zero-padded row
        v = stack(name).reshape(DEPTH, 1, -1)
        return jnp.pad(v, ((0, 0), (0, 0), (0, 128 - v.shape[-1])))

    pvec = jnp.concatenate(
        [row("ln1_g"), row("ln1_b"), row("ln2_g"), row("ln2_b"),
         row("qkv_b"), row("proj_b"), row("fc1_b"), row("fc2_b")],
        axis=1)                                      # [L, 8, 128]

    # base token tile: row 0 = cls + pos[0]; rows 1..SEQ-1 = pos[1:] + conv bias;
    # rows SEQ..S_PAD-1 = 0 (padding).  Patch rows get x_patch @ W added in-kernel.
    pos = params["pos_embed"].reshape(SEQ, D)
    cls = params["cls_token"].reshape(1, D)
    pb = params["patch_b"].reshape(1, D)
    base = jnp.zeros((S_PAD, D), jnp.float32)
    base = base.at[0:1, :].set(cls + pos[0:1, :])
    base = base.at[1:SEQ, :].set(pos[1:SEQ, :] + pb)

    head_w = jnp.pad(params["head_w"], ((0, 0), (0, C_PAD - NUM_CLASSES)))
    head_b = jnp.pad(params["head_b"].reshape(1, NUM_CLASSES),
                     ((0, 0), (0, C_PAD - NUM_CLASSES)))

    return {
        "patch_w": params["patch_w"],                # [KDIM, D]
        "base": base,                                # [S_PAD, D]
        "wqkv": stack("qkv_w"),                      # [L, D, 3D]
        "wo": stack("proj_w"),                       # [L, D, D]
        "fc1_w": stack("fc1_w"),                     # [L, D, MLP]
        "fc2_w": stack("fc2_w"),                     # [L, MLP, D]
        "pvec": pvec,                                # [L, 8, 128]
        "lnf": jnp.stack([params["ln_f_g"], params["ln_f_b"]], axis=0),   # [2, D]
        "head_w": head_w,                            # [D, C_PAD]
        "head_b": head_b,                            # [1, C_PAD]
    }


def vit_forward(x, params):
    """Full ViT forward: NCHW image -> classification logits, one fused pallas_call."""
    B = x.shape[0]
    p = _prep_params(params)

    # im2col glue: per-patch rows flattened in (c, i, j) order (matches Conv2d weight
    # flattening); row 0 of each batch block is the (zero) cls slot and trailing rows are
    # zero padding, then the batch is stacked along the sublane axis -> [B*S_PAD, KDIM].
    C, H, W = x.shape[1:]
    Hp, Wp = H // PATCH, W // PATCH
    patches = (x.reshape(B, C, Hp, PATCH, Wp, PATCH)
                 .transpose(0, 2, 4, 1, 3, 5)
                 .reshape(B, Hp * Wp, KDIM))
    patches = jnp.pad(patches, ((0, 0), (1, S_PAD - SEQ), (0, 0)))
    patches = patches.reshape(B * S_PAD, KDIM)

    base = jnp.tile(p["base"], (B, 1))               # [B*S_PAD, D]

    def full(shape):                                 # whole-array block, single grid step
        zeros = (0,) * len(shape)
        return pl.BlockSpec(shape, lambda i, _z=zeros: _z)

    in_specs = [
        full((B * S_PAD, KDIM)),                     # patches (batch-stacked)
        full((KDIM, EMBED)),                         # patch_w
        full((B * S_PAD, EMBED)),                    # base (cls / pos / conv-bias)
        full((DEPTH, EMBED, 3 * EMBED)),             # wqkv
        full((DEPTH, EMBED, EMBED)),                 # wo (proj)
        full((DEPTH, EMBED, MLP_DIM)),               # fc1_w
        full((DEPTH, MLP_DIM, EMBED)),               # fc2_w
        full((DEPTH, 8, 128)),                       # packed small per-layer params
        full((2, EMBED)),                            # final LN gamma/beta
        full((EMBED, C_PAD)),                        # head_w (lane-padded)
        full((1, C_PAD)),                            # head_b (lane-padded)
    ]

    logits = pl.pallas_call(
        _vit_kernel,
        grid=(1,),
        in_specs=in_specs,
        out_specs=pl.BlockSpec((B, C_PAD), lambda i: (0, 0)),
        out_shape=jax.ShapeDtypeStruct((B, C_PAD), jnp.float32),
        compiler_params=pltpu.CompilerParams(
            dimension_semantics=("arbitrary",)),
    )(
        patches, p["patch_w"], base,
        p["wqkv"], p["wo"], p["fc1_w"], p["fc2_w"], p["pvec"],
        p["lnf"], p["head_w"], p["head_b"],
    )
    return logits[:, :NUM_CLASSES]


# -------------------------------- parameter init ----------------------------------

def init_params(key):
    keys = iter(jax.random.split(key, 8 + 8 * DEPTH))

    def nrm(shape, std=0.02):
        return (std * jax.random.normal(next(keys), shape)).astype(jnp.float32)

    def zeros(shape):
        return jnp.zeros(shape, jnp.float32)

    def ones(shape):
        return jnp.ones(shape, jnp.float32)

    params = {
        "patch_w": nrm((KDIM, EMBED)),      # Conv2d weight [D,C,P,P] flattened & transposed
        "patch_b": zeros((EMBED,)),
        "cls_token": nrm((1, 1, EMBED)),
        "pos_embed": nrm((1, SEQ, EMBED)),
        "ln_f_g": ones((EMBED,)),
        "ln_f_b": zeros((EMBED,)),
        "head_w": nrm((EMBED, NUM_CLASSES)),
        "head_b": zeros((NUM_CLASSES,)),
        "layers": [],
    }
    for _ in range(DEPTH):
        params["layers"].append({
            "ln1_g": ones((EMBED,)), "ln1_b": zeros((EMBED,)),
            "qkv_w": nrm((EMBED, 3 * EMBED)), "qkv_b": zeros((3 * EMBED,)),
            "proj_w": nrm((EMBED, EMBED)), "proj_b": zeros((EMBED,)),
            "ln2_g": ones((EMBED,)), "ln2_b": zeros((EMBED,)),
            "fc1_w": nrm((EMBED, MLP_DIM)), "fc1_b": zeros((MLP_DIM,)),
            "fc2_w": nrm((MLP_DIM, EMBED)), "fc2_b": zeros((EMBED,)),
        })
    return params


# ------------------------------------- main ----------------------------------------

if __name__ == "__main__":
    key = jax.random.PRNGKey(0)
    pkey, xkey = jax.random.split(key)
    params = init_params(pkey)
    x = jax.random.normal(xkey, (BATCH, IN_CH, IMG, IMG), dtype=jnp.float32)

    logits = jax.jit(vit_forward)(x, params)
    logits = jax.block_until_ready(logits)

    assert logits.shape == (BATCH, NUM_CLASSES), logits.shape
    assert logits.dtype == jnp.float32
    assert bool(jnp.all(jnp.isfinite(logits)))
    print("KERNEL_OK")
</pallas_src>

<mosaic_0001>
module attributes {stable_mosaic.version = 11 : i64} {
  func.func @_vit_kernel(%arg0: i32, %arg1: memref<48x192xf32, #tpu.memory_space<vmem>>, %arg2: memref<192x32xf32, #tpu.memory_space<vmem>>, %arg3: memref<48x32xf32, #tpu.memory_space<vmem>>, %arg4: memref<2x32x96xf32, #tpu.memory_space<vmem>>, %arg5: memref<2x32x32xf32, #tpu.memory_space<vmem>>, %arg6: memref<2x32x128xf32, #tpu.memory_space<vmem>>, %arg7: memref<2x128x32xf32, #tpu.memory_space<vmem>>, %arg8: memref<2x8x128xf32, #tpu.memory_space<vmem>>, %arg9: memref<2x32xf32, #tpu.memory_space<vmem>>, %arg10: memref<32x128xf32, #tpu.memory_space<vmem>>, %arg11: memref<1x128xf32, #tpu.memory_space<vmem>>, %arg12: memref<2x128xf32, #tpu.memory_space<vmem>>) attributes {dimension_semantics = [#tpu.dimension_semantics<arbitrary>], iteration_bounds = array<i64: 1>, scalar_prefetch = 0 : i64, scratch_operands = 0 : i64, tpu.core_type = #tpu.core_type<tc>, window_params = [{pipeline_mode = #tpu.pipeline_mode<synchronous>, transform_indices = @transform_0, window_bounds = array<i64: 48, 192>}, {pipeline_mode = #tpu.pipeline_mode<synchronous>, transform_indices = @transform_1, window_bounds = array<i64: 192, 32>}, {pipeline_mode = #tpu.pipeline_mode<synchronous>, transform_indices = @transform_2, window_bounds = array<i64: 48, 32>}, {pipeline_mode = #tpu.pipeline_mode<synchronous>, transform_indices = @transform_3, window_bounds = array<i64: 2, 32, 96>}, {pipeline_mode = #tpu.pipeline_mode<synchronous>, transform_indices = @transform_4, window_bounds = array<i64: 2, 32, 32>}, {pipeline_mode = #tpu.pipeline_mode<synchronous>, transform_indices = @transform_5, window_bounds = array<i64: 2, 32, 128>}, {pipeline_mode = #tpu.pipeline_mode<synchronous>, transform_indices = @transform_6, window_bounds = array<i64: 2, 128, 32>}, {pipeline_mode = #tpu.pipeline_mode<synchronous>, transform_indices = @transform_7, window_bounds = array<i64: 2, 8, 128>}, {pipeline_mode = #tpu.pipeline_mode<synchronous>, transform_indices = @transform_8, window_bounds = array<i64: 2, 32>}, {pipeline_mode = #tpu.pipeline_mode<synchronous>, transform_indices = @transform_9, window_bounds = array<i64: 32, 128>}, {pipeline_mode = #tpu.pipeline_mode<synchronous>, transform_indices = @transform_10, window_bounds = array<i64: 1, 128>}, {pipeline_mode = #tpu.pipeline_mode<synchronous>, transform_indices = @transform_11, window_bounds = array<i64: 2, 128>}]} {
    %c0 = arith.constant 0 : index
    %c0_0 = arith.constant 0 : index
    %0 = vector.load %arg3[%c0, %c0_0] : memref<48x32xf32, #tpu.memory_space<vmem>>, vector<48x32xf32>
    %c0_1 = arith.constant 0 : index
    %c0_2 = arith.constant 0 : index
    %1 = vector.load %arg1[%c0_1, %c0_2] : memref<48x192xf32, #tpu.memory_space<vmem>>, vector<48x192xf32>
    %c0_3 = arith.constant 0 : index
    %c0_4 = arith.constant 0 : index
    %2 = vector.load %arg2[%c0_3, %c0_4] : memref<192x32xf32, #tpu.memory_space<vmem>>, vector<192x32xf32>
    %cst = arith.constant dense<0.000000e+00> : vector<48x32xf32>
    %3 = tpu.matmul %1, %2, %cst {dimension_numbers = #tpu.dot_dimension_numbers<[1], [0], [0], [1], [0, 0, 1, 1], [], []>} : vector<48x192xf32>, vector<192x32xf32>, vector<48x32xf32> -> vector<48x32xf32>
    %4 = arith.addf %0, %3 : vector<48x32xf32>
    %5 = tpu.iota {dimensions = array<i32: 1>} : vector<1x24xi32>
    %c17_i32 = arith.constant 17 : i32
    %6 = vector.broadcast %c17_i32 : i32 to vector<1x24xi32>
    %7 = arith.cmpi slt, %5, %6 : vector<1x24xi32>
    %cst_5 = arith.constant 0.000000e+00 : f32
    %cst_6 = arith.constant -1.000000e+30 : f32
    %8 = vector.broadcast %cst_5 : f32 to vector<1x24xf32>
    %9 = vector.broadcast %cst_6 : f32 to vector<1x24xf32>
    %10 = arith.select %7, %8, %9 : vector<1x24xi1>, vector<1x24xf32>
    %c0_7 = arith.constant 0 : index
    %c0_8 = arith.constant 0 : index
    %c0_9 = arith.constant 0 : index
    %11 = vector.load %arg8[%c0_7, %c0_8, %c0_9] : memref<2x8x128xf32, #tpu.memory_space<vmem>>, vector<1x8x128xf32>
    %12 = vector.shape_cast %11 : vector<1x8x128xf32> to vector<8x128xf32>
    %13 = vector.extract_strided_slice %12 {offsets = [0, 0], sizes = [1, 32], strides = [1, 1]} : vector<8x128xf32> to vector<1x32xf32>
    %14 = vector.extract_strided_slice %12 {offsets = [1, 0], sizes = [1, 32], strides = [1, 1]} : vector<8x128xf32> to vector<1x32xf32>
    %15 = vector.extract_strided_slice %12 {offsets = [2, 0], sizes = [1, 32], strides = [1, 1]} : vector<8x128xf32> to vector<1x32xf32>
    %16 = vector.extract_strided_slice %12 {offsets = [3, 0], sizes = [1, 32], strides = [1, 1]} : vector<8x128xf32> to vector<1x32xf32>
    %17 = vector.extract_strided_slice %12 {offsets = [4, 0], sizes = [1, 96], strides = [1, 1]} : vector<8x128xf32> to vector<1x96xf32>
    %18 = vector.extract_strided_slice %12 {offsets = [5, 0], sizes = [1, 32], strides = [1, 1]} : vector<8x128xf32> to vector<1x32xf32>
    %19 = vector.extract_strided_slice %12 {offsets = [6, 0], sizes = [1, 128], strides = [1, 1]} : vector<8x128xf32> to vector<1x128xf32>
    %20 = vector.extract_strided_slice %12 {offsets = [7, 0], sizes = [1, 32], strides = [1, 1]} : vector<8x128xf32> to vector<1x32xf32>
    %cst_10 = arith.constant dense<0.000000e+00> : vector<48xf32>
    %21 = vector.multi_reduction <add>, %4, %cst_10 [1] : vector<48x32xf32> to vector<48xf32>
    %22 = vector.shape_cast %21 : vector<48xf32> to vector<48x1xf32>
    %cst_11 = arith.constant 3.200000e+01 : f32
    %23 = vector.broadcast %cst_11 : f32 to vector<48x1xf32>
    %24 = arith.divf %22, %23 : vector<48x1xf32>
    %25 = vector.broadcast %24 : vector<48x1xf32> to vector<48x32xf32>
    %26 = arith.subf %4, %25 : vector<48x32xf32>
    %27 = arith.mulf %26, %26 : vector<48x32xf32>
    %cst_12 = arith.constant dense<0.000000e+00> : vector<48xf32>
    %28 = vector.multi_reduction <add>, %27, %cst_12 [1] : vector<48x32xf32> to vector<48xf32>
    %29 = vector.shape_cast %28 : vector<48xf32> to vector<48x1xf32>
    %cst_13 = arith.constant 3.200000e+01 : f32
    %30 = vector.broadcast %cst_13 : f32 to vector<48x1xf32>
    %31 = arith.divf %29, %30 : vector<48x1xf32>
    %cst_14 = arith.constant 9.99999997E-7 : f32
    %32 = vector.broadcast %cst_14 : f32 to vector<48x1xf32>
    %33 = arith.addf %31, %32 : vector<48x1xf32>
    %34 = math.rsqrt %33 : vector<48x1xf32>
    %35 = vector.broadcast %34 : vector<48x1xf32> to vector<48x32xf32>
    %36 = arith.mulf %26, %35 : vector<48x32xf32>
    %37 = vector.broadcast %13 : vector<1x32xf32> to vector<48x32xf32>
    %38 = arith.mulf %36, %37 : vector<48x32xf32>
    %39 = vector.broadcast %14 : vector<1x32xf32> to vector<48x32xf32>
    %40 = arith.addf %38, %39 : vector<48x32xf32>
    %c0_15 = arith.constant 0 : index
    %c0_16 = arith.constant 0 : index
    %c0_17 = arith.constant 0 : index
    %41 = vector.load %arg4[%c0_15, %c0_16, %c0_17] : memref<2x32x96xf32, #tpu.memory_space<vmem>>, vector<1x32x96xf32>
    %42 = vector.shape_cast %41 : vector<1x32x96xf32> to vector<32x96xf32>
    %cst_18 = arith.constant dense<0.000000e+00> : vector<48x96xf32>
    %43 = tpu.matmul %40, %42, %cst_18 {dimension_numbers = #tpu.dot_dimension_numbers<[1], [0], [0], [1], [0, 0, 1, 1], [], []>} : vector<48x32xf32>, vector<32x96xf32>, vector<48x96xf32> -> vector<48x96xf32>
    %44 = vector.broadcast %17 : vector<1x96xf32> to vector<48x96xf32>
    %45 = arith.addf %43, %44 : vector<48x96xf32>
    %46 = vector.extract_strided_slice %45 {offsets = [0, 0], sizes = [24, 8], strides = [1, 1]} : vector<48x96xf32> to vector<24x8xf32>
    %47 = vector.extract_strided_slice %45 {offsets = [0, 32], sizes = [24, 8], strides = [1, 1]} : vector<48x96xf32> to vector<24x8xf32>
    %48 = vector.extract_strided_slice %45 {offsets = [0, 64], sizes = [24, 8], strides = [1, 1]} : vector<48x96xf32> to vector<24x8xf32>
    %cst_19 = arith.constant dense<0.000000e+00> : vector<24x24xf32>
    %49 = tpu.matmul %46, %47, %cst_19 {dimension_numbers = #tpu.dot_dimension_numbers<[1], [1], [0], [0], [0, 0, 1, 0], [], []>} : vector<24x8xf32>, vector<24x8xf32>, vector<24x24xf32> -> vector<24x24xf32>
    %cst_20 = arith.constant 0.353553385 : f32
    %50 = vector.broadcast %cst_20 : f32 to vector<24x24xf32>
    %51 = arith.mulf %49, %50 : vector<24x24xf32>
    %52 = vector.broadcast %10 : vector<1x24xf32> to vector<24x24xf32>
    %53 = arith.addf %51, %52 : vector<24x24xf32>
    %cst_21 = arith.constant dense<0xFF800000> : vector<24xf32>
    %54 = vector.multi_reduction <maximumf>, %53, %cst_21 [1] : vector<24x24xf32> to vector<24xf32>
    %55 = vector.shape_cast %54 : vector<24xf32> to vector<24x1xf32>
    %56 = vector.broadcast %55 : vector<24x1xf32> to vector<24x24xf32>
    %57 = arith.subf %53, %56 : vector<24x24xf32>
    %58 = math.exp %57 : vector<24x24xf32>
    %cst_22 = arith.constant dense<0.000000e+00> : vector<24xf32>
    %59 = vector.multi_reduction <add>, %58, %cst_22 [1] : vector<24x24xf32> to vector<24xf32>
    %60 = vector.shape_cast %59 : vector<24xf32> to vector<24x1xf32>
    %61 = tpu.reciprocal %60 {approx = true} : vector<24x1xf32> -> vector<24x1xf32>
    %62 = vector.broadcast %61 : vector<24x1xf32> to vector<24x24xf32>
    %63 = arith.mulf %58, %62 : vector<24x24xf32>
    %cst_23 = arith.constant dense<0.000000e+00> : vector<24x8xf32>
    %64 = tpu.matmul %63, %48, %cst_23 {dimension_numbers = #tpu.dot_dimension_numbers<[1], [0], [0], [1], [0, 0, 1, 1], [], []>} : vector<24x24xf32>, vector<24x8xf32>, vector<24x8xf32> -> vector<24x8xf32>
    %65 = vector.extract_strided_slice %45 {offsets = [0, 8], sizes = [24, 8], strides = [1, 1]} : vector<48x96xf32> to vector<24x8xf32>
    %66 = vector.extract_strided_slice %45 {offsets = [0, 40], sizes = [24, 8], strides = [1, 1]} : vector<48x96xf32> to vector<24x8xf32>
    %67 = vector.extract_strided_slice %45 {offsets = [0, 72], sizes = [24, 8], strides = [1, 1]} : vector<48x96xf32> to vector<24x8xf32>
    %cst_24 = arith.constant dense<0.000000e+00> : vector<24x24xf32>
    %68 = tpu.matmul %65, %66, %cst_24 {dimension_numbers = #tpu.dot_dimension_numbers<[1], [1], [0], [0], [0, 0, 1, 0], [], []>} : vector<24x8xf32>, vector<24x8xf32>, vector<24x24xf32> -> vector<24x24xf32>
    %cst_25 = arith.constant 0.353553385 : f32
    %69 = vector.broadcast %cst_25 : f32 to vector<24x24xf32>
    %70 = arith.mulf %68, %69 : vector<24x24xf32>
    %71 = vector.broadcast %10 : vector<1x24xf32> to vector<24x24xf32>
    %72 = arith.addf %70, %71 : vector<24x24xf32>
    %cst_26 = arith.constant dense<0xFF800000> : vector<24xf32>
    %73 = vector.multi_reduction <maximumf>, %72, %cst_26 [1] : vector<24x24xf32> to vector<24xf32>
    %74 = vector.shape_cast %73 : vector<24xf32> to vector<24x1xf32>
    %75 = vector.broadcast %74 : vector<24x1xf32> to vector<24x24xf32>
    %76 = arith.subf %72, %75 : vector<24x24xf32>
    %77 = math.exp %76 : vector<24x24xf32>
    %cst_27 = arith.constant dense<0.000000e+00> : vector<24xf32>
    %78 = vector.multi_reduction <add>, %77, %cst_27 [1] : vector<24x24xf32> to vector<24xf32>
    %79 = vector.shape_cast %78 : vector<24xf32> to vector<24x1xf32>
    %80 = tpu.reciprocal %79 {approx = true} : vector<24x1xf32> -> vector<24x1xf32>
    %81 = vector.broadcast %80 : vector<24x1xf32> to vector<24x24xf32>
    %82 = arith.mulf %77, %81 : vector<24x24xf32>
    %cst_28 = arith.constant dense<0.000000e+00> : vector<24x8xf32>
    %83 = tpu.matmul %82, %67, %cst_28 {dimension_numbers = #tpu.dot_dimension_numbers<[1], [0], [0], [1], [0, 0, 1, 1], [], []>} : vector<24x24xf32>, vector<24x8xf32>, vector<24x8xf32> -> vector<24x8xf32>
    %84 = vector.extract_strided_slice %45 {offsets = [0, 16], sizes = [24, 8], strides = [1, 1]} : vector<48x96xf32> to vector<24x8xf32>
    %85 = vector.extract_strided_slice %45 {offsets = [0, 48], sizes = [24, 8], strides = [1, 1]} : vector<48x96xf32> to vector<24x8xf32>
    %86 = vector.extract_strided_slice %45 {offsets = [0, 80], sizes = [24, 8], strides = [1, 1]} : vector<48x96xf32> to vector<24x8xf32>
    %cst_29 = arith.constant dense<0.000000e+00> : vector<24x24xf32>
    %87 = tpu.matmul %84, %85, %cst_29 {dimension_numbers = #tpu.dot_dimension_numbers<[1], [1], [0], [0], [0, 0, 1, 0], [], []>} : vector<24x8xf32>, vector<24x8xf32>, vector<24x24xf32> -> vector<24x24xf32>
    %cst_30 = arith.constant 0.353553385 : f32
    %88 = vector.broadcast %cst_30 : f32 to vector<24x24xf32>
    %89 = arith.mulf %87, %88 : vector<24x24xf32>
    %90 = vector.broadcast %10 : vector<1x24xf32> to vector<24x24xf32>
    %91 = arith.addf %89, %90 : vector<24x24xf32>
    %cst_31 = arith.constant dense<0xFF800000> : vector<24xf32>
    %92 = vector.multi_reduction <maximumf>, %91, %cst_31 [1] : vector<24x24xf32> to vector<24xf32>
    %93 = vector.shape_cast %92 : vector<24xf32> to vector<24x1xf32>
    %94 = vector.broadcast %93 : vector<24x1xf32> to vector<24x24xf32>
    %95 = arith.subf %91, %94 : vector<24x24xf32>
    %96 = math.exp %95 : vector<24x24xf32>
    %cst_32 = arith.constant dense<0.000000e+00> : vector<24xf32>
    %97 = vector.multi_reduction <add>, %96, %cst_32 [1] : vector<24x24xf32> to vector<24xf32>
    %98 = vector.shape_cast %97 : vector<24xf32> to vector<24x1xf32>
    %99 = tpu.reciprocal %98 {approx = true} : vector<24x1xf32> -> vector<24x1xf32>
    %100 = vector.broadcast %99 : vector<24x1xf32> to vector<24x24xf32>
    %101 = arith.mulf %96, %100 : vector<24x24xf32>
    %cst_33 = arith.constant dense<0.000000e+00> : vector<24x8xf32>
    %102 = tpu.matmul %101, %86, %cst_33 {dimension_numbers = #tpu.dot_dimension_numbers<[1], [0], [0], [1], [0, 0, 1, 1], [], []>} : vector<24x24xf32>, vector<24x8xf32>, vector<24x8xf32> -> vector<24x8xf32>
    %103 = vector.extract_strided_slice %45 {offsets = [0, 24], sizes = [24, 8], strides = [1, 1]} : vector<48x96xf32> to vector<24x8xf32>
    %104 = vector.extract_strided_slice %45 {offsets = [0, 56], sizes = [24, 8], strides = [1, 1]} : vector<48x96xf32> to vector<24x8xf32>
    %105 = vector.extract_strided_slice %45 {offsets = [0, 88], sizes = [24, 8], strides = [1, 1]} : vector<48x96xf32> to vector<24x8xf32>
    %cst_34 = arith.constant dense<0.000000e+00> : vector<24x24xf32>
    %106 = tpu.matmul %103, %104, %cst_34 {dimension_numbers = #tpu.dot_dimension_numbers<[1], [1], [0], [0], [0, 0, 1, 0], [], []>} : vector<24x8xf32>, vector<24x8xf32>, vector<24x24xf32> -> vector<24x24xf32>
    %cst_35 = arith.constant 0.353553385 : f32
    %107 = vector.broadcast %cst_35 : f32 to vector<24x24xf32>
    %108 = arith.mulf %106, %107 : vector<24x24xf32>
    %109 = vector.broadcast %10 : vector<1x24xf32> to vector<24x24xf32>
    %110 = arith.addf %108, %109 : vector<24x24xf32>
    %cst_36 = arith.constant dense<0xFF800000> : vector<24xf32>
    %111 = vector.multi_reduction <maximumf>, %110, %cst_36 [1] : vector<24x24xf32> to vector<24xf32>
    %112 = vector.shape_cast %111 : vector<24xf32> to vector<24x1xf32>
    %113 = vector.broadcast %112 : vector<24x1xf32> to vector<24x24xf32>
    %114 = arith.subf %110, %113 : vector<24x24xf32>
    %115 = math.exp %114 : vector<24x24xf32>
    %cst_37 = arith.constant dense<0.000000e+00> : vector<24xf32>
    %116 = vector.multi_reduction <add>, %115, %cst_37 [1] : vector<24x24xf32> to vector<24xf32>
    %117 = vector.shape_cast %116 : vector<24xf32> to vector<24x1xf32>
    %118 = tpu.reciprocal %117 {approx = true} : vector<24x1xf32> -> vector<24x1xf32>
    %119 = vector.broadcast %118 : vector<24x1xf32> to vector<24x24xf32>
    %120 = arith.mulf %115, %119 : vector<24x24xf32>
    %cst_38 = arith.constant dense<0.000000e+00> : vector<24x8xf32>
    %121 = tpu.matmul %120, %105, %cst_38 {dimension_numbers = #tpu.dot_dimension_numbers<[1], [0], [0], [1], [0, 0, 1, 1], [], []>} : vector<24x24xf32>, vector<24x8xf32>, vector<24x8xf32> -> vector<24x8xf32>
    %122 = tpu.concatenate %64, %83, %102, %121 in 1 : vector<24x8xf32>, vector<24x8xf32>, vector<24x8xf32>, vector<24x8xf32> -> vector<24x32xf32>
    %123 = vector.extract_strided_slice %45 {offsets = [24, 0], sizes = [24, 8], strides = [1, 1]} : vector<48x96xf32> to vector<24x8xf32>
    %124 = vector.extract_strided_slice %45 {offsets = [24, 32], sizes = [24, 8], strides = [1, 1]} : vector<48x96xf32> to vector<24x8xf32>
    %125 = vector.extract_strided_slice %45 {offsets = [24, 64], sizes = [24, 8], strides = [1, 1]} : vector<48x96xf32> to vector<24x8xf32>
    %cst_39 = arith.constant dense<0.000000e+00> : vector<24x24xf32>
    %126 = tpu.matmul %123, %124, %cst_39 {dimension_numbers = #tpu.dot_dimension_numbers<[1], [1], [0], [0], [0, 0, 1, 0], [], []>} : vector<24x8xf32>, vector<24x8xf32>, vector<24x24xf32> -> vector<24x24xf32>
    %cst_40 = arith.constant 0.353553385 : f32
    %127 = vector.broadcast %cst_40 : f32 to vector<24x24xf32>
    %128 = arith.mulf %126, %127 : vector<24x24xf32>
    %129 = vector.broadcast %10 : vector<1x24xf32> to vector<24x24xf32>
    %130 = arith.addf %128, %129 : vector<24x24xf32>
    %cst_41 = arith.constant dense<0xFF800000> : vector<24xf32>
    %131 = vector.multi_reduction <maximumf>, %130, %cst_41 [1] : vector<24x24xf32> to vector<24xf32>
    %132 = vector.shape_cast %131 : vector<24xf32> to vector<24x1xf32>
    %133 = vector.broadcast %132 : vector<24x1xf32> to vector<24x24xf32>
    %134 = arith.subf %130, %133 : vector<24x24xf32>
    %135 = math.exp %134 : vector<24x24xf32>
    %cst_42 = arith.constant dense<0.000000e+00> : vector<24xf32>
    %136 = vector.multi_reduction <add>, %135, %cst_42 [1] : vector<24x24xf32> to vector<24xf32>
    %137 = vector.shape_cast %136 : vector<24xf32> to vector<24x1xf32>
    %138 = tpu.reciprocal %137 {approx = true} : vector<24x1xf32> -> vector<24x1xf32>
    %139 = vector.broadcast %138 : vector<24x1xf32> to vector<24x24xf32>
    %140 = arith.mulf %135, %139 : vector<24x24xf32>
    %cst_43 = arith.constant dense<0.000000e+00> : vector<24x8xf32>
    %141 = tpu.matmul %140, %125, %cst_43 {dimension_numbers = #tpu.dot_dimension_numbers<[1], [0], [0], [1], [0, 0, 1, 1], [], []>} : vector<24x24xf32>, vector<24x8xf32>, vector<24x8xf32> -> vector<24x8xf32>
    %142 = vector.extract_strided_slice %45 {offsets = [24, 8], sizes = [24, 8], strides = [1, 1]} : vector<48x96xf32> to vector<24x8xf32>
    %143 = vector.extract_strided_slice %45 {offsets = [24, 40], sizes = [24, 8], strides = [1, 1]} : vector<48x96xf32> to vector<24x8xf32>
    %144 = vector.extract_strided_slice %45 {offsets = [24, 72], sizes = [24, 8], strides = [1, 1]} : vector<48x96xf32> to vector<24x8xf32>
    %cst_44 = arith.constant dense<0.000000e+00> : vector<24x24xf32>
    %145 = tpu.matmul %142, %143, %cst_44 {dimension_numbers = #tpu.dot_dimension_numbers<[1], [1], [0], [0], [0, 0, 1, 0], [], []>} : vector<24x8xf32>, vector<24x8xf32>, vector<24x24xf32> -> vector<24x24xf32>
    %cst_45 = arith.constant 0.353553385 : f32
    %146 = vector.broadcast %cst_45 : f32 to vector<24x24xf32>
    %147 = arith.mulf %145, %146 : vector<24x24xf32>
    %148 = vector.broadcast %10 : vector<1x24xf32> to vector<24x24xf32>
    %149 = arith.addf %147, %148 : vector<24x24xf32>
    %cst_46 = arith.constant dense<0xFF800000> : vector<24xf32>
    %150 = vector.multi_reduction <maximumf>, %149, %cst_46 [1] : vector<24x24xf32> to vector<24xf32>
    %151 = vector.shape_cast %150 : vector<24xf32> to vector<24x1xf32>
    %152 = vector.broadcast %151 : vector<24x1xf32> to vector<24x24xf32>
    %153 = arith.subf %149, %152 : vector<24x24xf32>
    %154 = math.exp %153 : vector<24x24xf32>
    %cst_47 = arith.constant dense<0.000000e+00> : vector<24xf32>
    %155 = vector.multi_reduction <add>, %154, %cst_47 [1] : vector<24x24xf32> to vector<24xf32>
    %156 = vector.shape_cast %155 : vector<24xf32> to vector<24x1xf32>
    %157 = tpu.reciprocal %156 {approx = true} : vector<24x1xf32> -> vector<24x1xf32>
    %158 = vector.broadcast %157 : vector<24x1xf32> to vector<24x24xf32>
    %159 = arith.mulf %154, %158 : vector<24x24xf32>
    %cst_48 = arith.constant dense<0.000000e+00> : vector<24x8xf32>
    %160 = tpu.matmul %159, %144, %cst_48 {dimension_numbers = #tpu.dot_dimension_numbers<[1], [0], [0], [1], [0, 0, 1, 1], [], []>} : vector<24x24xf32>, vector<24x8xf32>, vector<24x8xf32> -> vector<24x8xf32>
    %161 = vector.extract_strided_slice %45 {offsets = [24, 16], sizes = [24, 8], strides = [1, 1]} : vector<48x96xf32> to vector<24x8xf32>
    %162 = vector.extract_strided_slice %45 {offsets = [24, 48], sizes = [24, 8], strides = [1, 1]} : vector<48x96xf32> to vector<24x8xf32>
    %163 = vector.extract_strided_slice %45 {offsets = [24, 80], sizes = [24, 8], strides = [1, 1]} : vector<48x96xf32> to vector<24x8xf32>
    %cst_49 = arith.constant dense<0.000000e+00> : vector<24x24xf32>
    %164 = tpu.matmul %161, %162, %cst_49 {dimension_numbers = #tpu.dot_dimension_numbers<[1], [1], [0], [0], [0, 0, 1, 0], [], []>} : vector<24x8xf32>, vector<24x8xf32>, vector<24x24xf32> -> vector<24x24xf32>
    %cst_50 = arith.constant 0.353553385 : f32
    %165 = vector.broadcast %cst_50 : f32 to vector<24x24xf32>
    %166 = arith.mulf %164, %165 : vector<24x24xf32>
    %167 = vector.broadcast %10 : vector<1x24xf32> to vector<24x24xf32>
    %168 = arith.addf %166, %167 : vector<24x24xf32>
    %cst_51 = arith.constant dense<0xFF800000> : vector<24xf32>
    %169 = vector.multi_reduction <maximumf>, %168, %cst_51 [1] : vector<24x24xf32> to vector<24xf32>
    %170 = vector.shape_cast %169 : vector<24xf32> to vector<24x1xf32>
    %171 = vector.broadcast %170 : vector<24x1xf32> to vector<24x24xf32>
    %172 = arith.subf %168, %171 : vector<24x24xf32>
    %173 = math.exp %172 : vector<24x24xf32>
    %cst_52 = arith.constant dense<0.000000e+00> : vector<24xf32>
    %174 = vector.multi_reduction <add>, %173, %cst_52 [1] : vector<24x24xf32> to vector<24xf32>
    %175 = vector.shape_cast %174 : vector<24xf32> to vector<24x1xf32>
    %176 = tpu.reciprocal %175 {approx = true} : vector<24x1xf32> -> vector<24x1xf32>
    %177 = vector.broadcast %176 : vector<24x1xf32> to vector<24x24xf32>
    %178 = arith.mulf %173, %177 : vector<24x24xf32>
    %cst_53 = arith.constant dense<0.000000e+00> : vector<24x8xf32>
    %179 = tpu.matmul %178, %163, %cst_53 {dimension_numbers = #tpu.dot_dimension_numbers<[1], [0], [0], [1], [0, 0, 1, 1], [], []>} : vector<24x24xf32>, vector<24x8xf32>, vector<24x8xf32> -> vector<24x8xf32>
    %180 = vector.extract_strided_slice %45 {offsets = [24, 24], sizes = [24, 8], strides = [1, 1]} : vector<48x96xf32> to vector<24x8xf32>
    %181 = vector.extract_strided_slice %45 {offsets = [24, 56], sizes = [24, 8], strides = [1, 1]} : vector<48x96xf32> to vector<24x8xf32>
    %182 = vector.extract_strided_slice %45 {offsets = [24, 88], sizes = [24, 8], strides = [1, 1]} : vector<48x96xf32> to vector<24x8xf32>
    %cst_54 = arith.constant dense<0.000000e+00> : vector<24x24xf32>
    %183 = tpu.matmul %180, %181, %cst_54 {dimension_numbers = #tpu.dot_dimension_numbers<[1], [1], [0], [0], [0, 0, 1, 0], [], []>} : vector<24x8xf32>, vector<24x8xf32>, vector<24x24xf32> -> vector<24x24xf32>
    %cst_55 = arith.constant 0.353553385 : f32
    %184 = vector.broadcast %cst_55 : f32 to vector<24x24xf32>
    %185 = arith.mulf %183, %184 : vector<24x24xf32>
    %186 = vector.broadcast %10 : vector<1x24xf32> to vector<24x24xf32>
    %187 = arith.addf %185, %186 : vector<24x24xf32>
    %cst_56 = arith.constant dense<0xFF800000> : vector<24xf32>
    %188 = vector.multi_reduction <maximumf>, %187, %cst_56 [1] : vector<24x24xf32> to vector<24xf32>
    %189 = vector.shape_cast %188 : vector<24xf32> to vector<24x1xf32>
    %190 = vector.broadcast %189 : vector<24x1xf32> to vector<24x24xf32>
    %191 = arith.subf %187, %190 : vector<24x24xf32>
    %192 = math.exp %191 : vector<24x24xf32>
    %cst_57 = arith.constant dense<0.000000e+00> : vector<24xf32>
    %193 = vector.multi_reduction <add>, %192, %cst_57 [1] : vector<24x24xf32> to vector<24xf32>
    %194 = vector.shape_cast %193 : vector<24xf32> to vector<24x1xf32>
    %195 = tpu.reciprocal %194 {approx = true} : vector<24x1xf32> -> vector<24x1xf32>
    %196 = vector.broadcast %195 : vector<24x1xf32> to vector<24x24xf32>
    %197 = arith.mulf %192, %196 : vector<24x24xf32>
    %cst_58 = arith.constant dense<0.000000e+00> : vector<24x8xf32>
    %198 = tpu.matmul %197, %182, %cst_58 {dimension_numbers = #tpu.dot_dimension_numbers<[1], [0], [0], [1], [0, 0, 1, 1], [], []>} : vector<24x24xf32>, vector<24x8xf32>, vector<24x8xf32> -> vector<24x8xf32>
    %199 = tpu.concatenate %141, %160, %179, %198 in 1 : vector<24x8xf32>, vector<24x8xf32>, vector<24x8xf32>, vector<24x8xf32> -> vector<24x32xf32>
    %200 = tpu.concatenate %122, %199 in 0 : vector<24x32xf32>, vector<24x32xf32> -> vector<48x32xf32>
    %c0_59 = arith.constant 0 : index
    %c0_60 = arith.constant 0 : index
    %c0_61 = arith.constant 0 : index
    %201 = vector.load %arg5[%c0_59, %c0_60, %c0_61] : memref<2x32x32xf32, #tpu.memory_space<vmem>>, vector<1x32x32xf32>
    %202 = vector.shape_cast %201 : vector<1x32x32xf32> to vector<32x32xf32>
    %cst_62 = arith.constant dense<0.000000e+00> : vector<48x32xf32>
    %203 = tpu.matmul %200, %202, %cst_62 {dimension_numbers = #tpu.dot_dimension_numbers<[1], [0], [0], [1], [0, 0, 1, 1], [], []>} : vector<48x32xf32>, vector<32x32xf32>, vector<48x32xf32> -> vector<48x32xf32>
    %204 = arith.addf %4, %203 : vector<48x32xf32>
    %205 = vector.broadcast %18 : vector<1x32xf32> to vector<48x32xf32>
    %206 = arith.addf %204, %205 : vector<48x32xf32>
    %cst_63 = arith.constant dense<0.000000e+00> : vector<48xf32>
    %207 = vector.multi_reduction <add>, %206, %cst_63 [1] : vector<48x32xf32> to vector<48xf32>
    %208 = vector.shape_cast %207 : vector<48xf32> to vector<48x1xf32>
    %cst_64 = arith.constant 3.200000e+01 : f32
    %209 = vector.broadcast %cst_64 : f32 to vector<48x1xf32>
    %210 = arith.divf %208, %209 : vector<48x1xf32>
    %211 = vector.broadcast %210 : vector<48x1xf32> to vector<48x32xf32>
    %212 = arith.subf %206, %211 : vector<48x32xf32>
    %213 = arith.mulf %212, %212 : vector<48x32xf32>
    %cst_65 = arith.constant dense<0.000000e+00> : vector<48xf32>
    %214 = vector.multi_reduction <add>, %213, %cst_65 [1] : vector<48x32xf32> to vector<48xf32>
    %215 = vector.shape_cast %214 : vector<48xf32> to vector<48x1xf32>
    %cst_66 = arith.constant 3.200000e+01 : f32
    %216 = vector.broadcast %cst_66 : f32 to vector<48x1xf32>
    %217 = arith.divf %215, %216 : vector<48x1xf32>
    %cst_67 = arith.constant 9.99999997E-7 : f32
    %218 = vector.broadcast %cst_67 : f32 to vector<48x1xf32>
    %219 = arith.addf %217, %218 : vector<48x1xf32>
    %220 = math.rsqrt %219 : vector<48x1xf32>
    %221 = vector.broadcast %220 : vector<48x1xf32> to vector<48x32xf32>
    %222 = arith.mulf %212, %221 : vector<48x32xf32>
    %223 = vector.broadcast %15 : vector<1x32xf32> to vector<48x32xf32>
    %224 = arith.mulf %222, %223 : vector<48x32xf32>
    %225 = vector.broadcast %16 : vector<1x32xf32> to vector<48x32xf32>
    %226 = arith.addf %224, %225 : vector<48x32xf32>
    %c0_68 = arith.constant 0 : index
    %c0_69 = arith.constant 0 : index
    %c0_70 = arith.constant 0 : index
    %227 = vector.load %arg6[%c0_68, %c0_69, %c0_70] : memref<2x32x128xf32, #tpu.memory_space<vmem>>, vector<1x32x128xf32>
    %228 = vector.shape_cast %227 : vector<1x32x128xf32> to vector<32x128xf32>
    %cst_71 = arith.constant dense<0.000000e+00> : vector<48x128xf32>
    %229 = tpu.matmul %226, %228, %cst_71 {dimension_numbers = #tpu.dot_dimension_numbers<[1], [0], [0], [1], [0, 0, 1, 1], [], []>} : vector<48x32xf32>, vector<32x128xf32>, vector<48x128xf32> -> vector<48x128xf32>
    %230 = vector.broadcast %19 : vector<1x128xf32> to vector<48x128xf32>
    %231 = arith.addf %229, %230 : vector<48x128xf32>
    %cst_72 = arith.constant 5.000000e-01 : f32
    %232 = vector.broadcast %cst_72 : f32 to vector<48x128xf32>
    %233 = arith.mulf %232, %231 : vector<48x128xf32>
    %cst_73 = arith.constant 0.707106769 : f32
    %234 = vector.broadcast %cst_73 : f32 to vector<48x128xf32>
    %235 = arith.mulf %231, %234 : vector<48x128xf32>
    %cst_74 = arith.constant 0.000000e+00 : f32
    %236 = vector.broadcast %cst_74 : f32 to vector<48x128xf32>
    %237 = arith.cmpf olt, %235, %236 : vector<48x128xf32>
    %cst_75 = arith.constant -1.000000e+00 : f32
    %cst_76 = arith.constant 1.000000e+00 : f32
    %238 = vector.broadcast %cst_75 : f32 to vector<48x128xf32>
    %239 = vector.broadcast %cst_76 : f32 to vector<48x128xf32>
    %240 = arith.select %237, %238, %239 : vector<48x128xi1>, vector<48x128xf32>
    %241 = math.absf %235 : vector<48x128xf32>
    %cst_77 = arith.constant 0.327591091 : f32
    %242 = vector.broadcast %cst_77 : f32 to vector<48x128xf32>
    %243 = arith.mulf %242, %241 : vector<48x128xf32>
    %cst_78 = arith.constant 1.000000e+00 : f32
    %244 = vector.broadcast %cst_78 : f32 to vector<48x128xf32>
    %245 = arith.addf %244, %243 : vector<48x128xf32>
    %246 = tpu.reciprocal %245 {approx = true} : vector<48x128xf32> -> vector<48x128xf32>
    %cst_79 = arith.constant 1.06140542 : f32
    %247 = vector.broadcast %cst_79 : f32 to vector<48x128xf32>
    %248 = arith.mulf %247, %246 : vector<48x128xf32>
    %cst_80 = arith.constant -1.45315206 : f32
    %249 = vector.broadcast %cst_80 : f32 to vector<48x128xf32>
    %250 = arith.addf %248, %249 : vector<48x128xf32>
    %251 = arith.mulf %250, %246 : vector<48x128xf32>
    %cst_81 = arith.constant 1.42141378 : f32
    %252 = vector.broadcast %cst_81 : f32 to vector<48x128xf32>
    %253 = arith.addf %251, %252 : vector<48x128xf32>
    %254 = arith.mulf %253, %246 : vector<48x128xf32>
    %cst_82 = arith.constant -0.284496725 : f32
    %255 = vector.broadcast %cst_82 : f32 to vector<48x128xf32>
    %256 = arith.addf %254, %255 : vector<48x128xf32>
    %257 = arith.mulf %256, %246 : vector<48x128xf32>
    %cst_83 = arith.constant 0.254829586 : f32
    %258 = vector.broadcast %cst_83 : f32 to vector<48x128xf32>
    %259 = arith.addf %257, %258 : vector<48x128xf32>
    %260 = arith.mulf %259, %246 : vector<48x128xf32>
    %cst_84 = arith.constant 0.000000e+00 : f32
    %261 = vector.broadcast %cst_84 : f32 to vector<48x128xf32>
    %262 = arith.subf %261, %241 : vector<48x128xf32>
    %263 = arith.mulf %262, %241 : vector<48x128xf32>
    %264 = math.exp %263 : vector<48x128xf32>
    %265 = arith.mulf %260, %264 : vector<48x128xf32>
    %cst_85 = arith.constant 1.000000e+00 : f32
    %266 = vector.broadcast %cst_85 : f32 to vector<48x128xf32>
    %267 = arith.subf %266, %265 : vector<48x128xf32>
    %268 = arith.mulf %240, %267 : vector<48x128xf32>
    %cst_86 = arith.constant 1.000000e+00 : f32
    %269 = vector.broadcast %cst_86 : f32 to vector<48x128xf32>
    %270 = arith.addf %269, %268 : vector<48x128xf32>
    %271 = arith.mulf %233, %270 : vector<48x128xf32>
    %c0_87 = arith.constant 0 : index
    %c0_88 = arith.constant 0 : index
    %c0_89 = arith.constant 0 : index
    %272 = vector.load %arg7[%c0_87, %c0_88, %c0_89] : memref<2x128x32xf32, #tpu.memory_space<vmem>>, vector<1x128x32xf32>
    %273 = vector.shape_cast %272 : vector<1x128x32xf32> to vector<128x32xf32>
    %cst_90 = arith.constant dense<0.000000e+00> : vector<48x32xf32>
    %274 = tpu.matmul %271, %273, %cst_90 {dimension_numbers = #tpu.dot_dimension_numbers<[1], [0], [0], [1], [0, 0, 1, 1], [], []>} : vector<48x128xf32>, vector<128x32xf32>, vector<48x32xf32> -> vector<48x32xf32>
    %275 = arith.addf %206, %274 : vector<48x32xf32>
    %276 = vector.broadcast %20 : vector<1x32xf32> to vector<48x32xf32>
    %277 = arith.addf %275, %276 : vector<48x32xf32>
    %c1 = arith.constant 1 : index
    %c0_91 = arith.constant 0 : index
    %c0_92 = arith.constant 0 : index
    %278 = vector.load %arg8[%c1, %c0_91, %c0_92] : memref<2x8x128xf32, #tpu.memory_space<vmem>>, vector<1x8x128xf32>
    %279 = vector.shape_cast %278 : vector<1x8x128xf32> to vector<8x128xf32>
    %280 = vector.extract_strided_slice %279 {offsets = [0, 0], sizes = [1, 32], strides = [1, 1]} : vector<8x128xf32> to vector<1x32xf32>
    %281 = vector.extract_strided_slice %279 {offsets = [1, 0], sizes = [1, 32], strides = [1, 1]} : vector<8x128xf32> to vector<1x32xf32>
    %282 = vector.extract_strided_slice %279 {offsets = [2, 0], sizes = [1, 32], strides = [1, 1]} : vector<8x128xf32> to vector<1x32xf32>
    %283 = vector.extract_strided_slice %279 {offsets = [3, 0], sizes = [1, 32], strides = [1, 1]} : vector<8x128xf32> to vector<1x32xf32>
    %284 = vector.extract_strided_slice %279 {offsets = [4, 0], sizes = [1, 96], strides = [1, 1]} : vector<8x128xf32> to vector<1x96xf32>
    %285 = vector.extract_strided_slice %279 {offsets = [5, 0], sizes = [1, 32], strides = [1, 1]} : vector<8x128xf32> to vector<1x32xf32>
    %286 = vector.extract_strided_slice %279 {offsets = [6, 0], sizes = [1, 128], strides = [1, 1]} : vector<8x128xf32> to vector<1x128xf32>
    %287 = vector.extract_strided_slice %279 {offsets = [7, 0], sizes = [1, 32], strides = [1, 1]} : vector<8x128xf32> to vector<1x32xf32>
    %cst_93 = arith.constant dense<0.000000e+00> : vector<48xf32>
    %288 = vector.multi_reduction <add>, %277, %cst_93 [1] : vector<48x32xf32> to vector<48xf32>
    %289 = vector.shape_cast %288 : vector<48xf32> to vector<48x1xf32>
    %cst_94 = arith.constant 3.200000e+01 : f32
    %290 = vector.broadcast %cst_94 : f32 to vector<48x1xf32>
    %291 = arith.divf %289, %290 : vector<48x1xf32>
    %292 = vector.broadcast %291 : vector<48x1xf32> to vector<48x32xf32>
    %293 = arith.subf %277, %292 : vector<48x32xf32>
    %294 = arith.mulf %293, %293 : vector<48x32xf32>
    %cst_95 = arith.constant dense<0.000000e+00> : vector<48xf32>
    %295 = vector.multi_reduction <add>, %294, %cst_95 [1] : vector<48x32xf32> to vector<48xf32>
    %296 = vector.shape_cast %295 : vector<48xf32> to vector<48x1xf32>
    %cst_96 = arith.constant 3.200000e+01 : f32
    %297 = vector.broadcast %cst_96 : f32 to vector<48x1xf32>
    %298 = arith.divf %296, %297 : vector<48x1xf32>
    %cst_97 = arith.constant 9.99999997E-7 : f32
    %299 = vector.broadcast %cst_97 : f32 to vector<48x1xf32>
    %300 = arith.addf %298, %299 : vector<48x1xf32>
    %301 = math.rsqrt %300 : vector<48x1xf32>
    %302 = vector.broadcast %301 : vector<48x1xf32> to vector<48x32xf32>
    %303 = arith.mulf %293, %302 : vector<48x32xf32>
    %304 = vector.broadcast %280 : vector<1x32xf32> to vector<48x32xf32>
    %305 = arith.mulf %303, %304 : vector<48x32xf32>
    %306 = vector.broadcast %281 : vector<1x32xf32> to vector<48x32xf32>
    %307 = arith.addf %305, %306 : vector<48x32xf32>
    %c1_98 = arith.constant 1 : index
    %c0_99 = arith.constant 0 : index
    %c0_100 = arith.constant 0 : index
    %308 = vector.load %arg4[%c1_98, %c0_99, %c0_100] : memref<2x32x96xf32, #tpu.memory_space<vmem>>, vector<1x32x96xf32>
    %309 = vector.shape_cast %308 : vector<1x32x96xf32> to vector<32x96xf32>
    %cst_101 = arith.constant dense<0.000000e+00> : vector<48x96xf32>
    %310 = tpu.matmul %307, %309, %cst_101 {dimension_numbers = #tpu.dot_dimension_numbers<[1], [0], [0], [1], [0, 0, 1, 1], [], []>} : vector<48x32xf32>, vector<32x96xf32>, vector<48x96xf32> -> vector<48x96xf32>
    %311 = vector.broadcast %284 : vector<1x96xf32> to vector<48x96xf32>
    %312 = arith.addf %310, %311 : vector<48x96xf32>
    %313 = vector.extract_strided_slice %312 {offsets = [0, 0], sizes = [24, 8], strides = [1, 1]} : vector<48x96xf32> to vector<24x8xf32>
    %314 = vector.extract_strided_slice %312 {offsets = [0, 32], sizes = [24, 8], strides = [1, 1]} : vector<48x96xf32> to vector<24x8xf32>
    %315 = vector.extract_strided_slice %312 {offsets = [0, 64], sizes = [24, 8], strides = [1, 1]} : vector<48x96xf32> to vector<24x8xf32>
    %cst_102 = arith.constant dense<0.000000e+00> : vector<24x24xf32>
    %316 = tpu.matmul %313, %314, %cst_102 {dimension_numbers = #tpu.dot_dimension_numbers<[1], [1], [0], [0], [0, 0, 1, 0], [], []>} : vector<24x8xf32>, vector<24x8xf32>, vector<24x24xf32> -> vector<24x24xf32>
    %cst_103 = arith.constant 0.353553385 : f32
    %317 = vector.broadcast %cst_103 : f32 to vector<24x24xf32>
    %318 = arith.mulf %316, %317 : vector<24x24xf32>
    %319 = vector.broadcast %10 : vector<1x24xf32> to vector<24x24xf32>
    %320 = arith.addf %318, %319 : vector<24x24xf32>
    %cst_104 = arith.constant dense<0xFF800000> : vector<24xf32>
    %321 = vector.multi_reduction <maximumf>, %320, %cst_104 [1] : vector<24x24xf32> to vector<24xf32>
    %322 = vector.shape_cast %321 : vector<24xf32> to vector<24x1xf32>
    %323 = vector.broadcast %322 : vector<24x1xf32> to vector<24x24xf32>
    %324 = arith.subf %320, %323 : vector<24x24xf32>
    %325 = math.exp %324 : vector<24x24xf32>
    %cst_105 = arith.constant dense<0.000000e+00> : vector<24xf32>
    %326 = vector.multi_reduction <add>, %325, %cst_105 [1] : vector<24x24xf32> to vector<24xf32>
    %327 = vector.shape_cast %326 : vector<24xf32> to vector<24x1xf32>
    %328 = tpu.reciprocal %327 {approx = true} : vector<24x1xf32> -> vector<24x1xf32>
    %329 = vector.broadcast %328 : vector<24x1xf32> to vector<24x24xf32>
    %330 = arith.mulf %325, %329 : vector<24x24xf32>
    %cst_106 = arith.constant dense<0.000000e+00> : vector<24x8xf32>
    %331 = tpu.matmul %330, %315, %cst_106 {dimension_numbers = #tpu.dot_dimension_numbers<[1], [0], [0], [1], [0, 0, 1, 1], [], []>} : vector<24x24xf32>, vector<24x8xf32>, vector<24x8xf32> -> vector<24x8xf32>
    %332 = vector.extract_strided_slice %312 {offsets = [0, 8], sizes = [24, 8], strides = [1, 1]} : vector<48x96xf32> to vector<24x8xf32>
    %333 = vector.extract_strided_slice %312 {offsets = [0, 40], sizes = [24, 8], strides = [1, 1]} : vector<48x96xf32> to vector<24x8xf32>
    %334 = vector.extract_strided_slice %312 {offsets = [0, 72], sizes = [24, 8], strides = [1, 1]} : vector<48x96xf32> to vector<24x8xf32>
    %cst_107 = arith.constant dense<0.000000e+00> : vector<24x24xf32>
    %335 = tpu.matmul %332, %333, %cst_107 {dimension_numbers = #tpu.dot_dimension_numbers<[1], [1], [0], [0], [0, 0, 1, 0], [], []>} : vector<24x8xf32>, vector<24x8xf32>, vector<24x24xf32> -> vector<24x24xf32>
    %cst_108 = arith.constant 0.353553385 : f32
    %336 = vector.broadcast %cst_108 : f32 to vector<24x24xf32>
    %337 = arith.mulf %335, %336 : vector<24x24xf32>
    %338 = vector.broadcast %10 : vector<1x24xf32> to vector<24x24xf32>
    %339 = arith.addf %337, %338 : vector<24x24xf32>
    %cst_109 = arith.constant dense<0xFF800000> : vector<24xf32>
    %340 = vector.multi_reduction <maximumf>, %339, %cst_109 [1] : vector<24x24xf32> to vector<24xf32>
    %341 = vector.shape_cast %340 : vector<24xf32> to vector<24x1xf32>
    %342 = vector.broadcast %341 : vector<24x1xf32> to vector<24x24xf32>
    %343 = arith.subf %339, %342 : vector<24x24xf32>
    %344 = math.exp %343 : vector<24x24xf32>
    %cst_110 = arith.constant dense<0.000000e+00> : vector<24xf32>
    %345 = vector.multi_reduction <add>, %344, %cst_110 [1] : vector<24x24xf32> to vector<24xf32>
    %346 = vector.shape_cast %345 : vector<24xf32> to vector<24x1xf32>
    %347 = tpu.reciprocal %346 {approx = true} : vector<24x1xf32> -> vector<24x1xf32>
    %348 = vector.broadcast %347 : vector<24x1xf32> to vector<24x24xf32>
    %349 = arith.mulf %344, %348 : vector<24x24xf32>
    %cst_111 = arith.constant dense<0.000000e+00> : vector<24x8xf32>
    %350 = tpu.matmul %349, %334, %cst_111 {dimension_numbers = #tpu.dot_dimension_numbers<[1], [0], [0], [1], [0, 0, 1, 1], [], []>} : vector<24x24xf32>, vector<24x8xf32>, vector<24x8xf32> -> vector<24x8xf32>
    %351 = vector.extract_strided_slice %312 {offsets = [0, 16], sizes = [24, 8], strides = [1, 1]} : vector<48x96xf32> to vector<24x8xf32>
    %352 = vector.extract_strided_slice %312 {offsets = [0, 48], sizes = [24, 8], strides = [1, 1]} : vector<48x96xf32> to vector<24x8xf32>
    %353 = vector.extract_strided_slice %312 {offsets = [0, 80], sizes = [24, 8], strides = [1, 1]} : vector<48x96xf32> to vector<24x8xf32>
    %cst_112 = arith.constant dense<0.000000e+00> : vector<24x24xf32>
    %354 = tpu.matmul %351, %352, %cst_112 {dimension_numbers = #tpu.dot_dimension_numbers<[1], [1], [0], [0], [0, 0, 1, 0], [], []>} : vector<24x8xf32>, vector<24x8xf32>, vector<24x24xf32> -> vector<24x24xf32>
    %cst_113 = arith.constant 0.353553385 : f32
    %355 = vector.broadcast %cst_113 : f32 to vector<24x24xf32>
    %356 = arith.mulf %354, %355 : vector<24x24xf32>
    %357 = vector.broadcast %10 : vector<1x24xf32> to vector<24x24xf32>
    %358 = arith.addf %356, %357 : vector<24x24xf32>
    %cst_114 = arith.constant dense<0xFF800000> : vector<24xf32>
    %359 = vector.multi_reduction <maximumf>, %358, %cst_114 [1] : vector<24x24xf32> to vector<24xf32>
    %360 = vector.shape_cast %359 : vector<24xf32> to vector<24x1xf32>
    %361 = vector.broadcast %360 : vector<24x1xf32> to vector<24x24xf32>
    %362 = arith.subf %358, %361 : vector<24x24xf32>
    %363 = math.exp %362 : vector<24x24xf32>
    %cst_115 = arith.constant dense<0.000000e+00> : vector<24xf32>
    %364 = vector.multi_reduction <add>, %363, %cst_115 [1] : vector<24x24xf32> to vector<24xf32>
    %365 = vector.shape_cast %364 : vector<24xf32> to vector<24x1xf32>
    %366 = tpu.reciprocal %365 {approx = true} : vector<24x1xf32> -> vector<24x1xf32>
    %367 = vector.broadcast %366 : vector<24x1xf32> to vector<24x24xf32>
    %368 = arith.mulf %363, %367 : vector<24x24xf32>
    %cst_116 = arith.constant dense<0.000000e+00> : vector<24x8xf32>
    %369 = tpu.matmul %368, %353, %cst_116 {dimension_numbers = #tpu.dot_dimension_numbers<[1], [0], [0], [1], [0, 0, 1, 1], [], []>} : vector<24x24xf32>, vector<24x8xf32>, vector<24x8xf32> -> vector<24x8xf32>
    %370 = vector.extract_strided_slice %312 {offsets = [0, 24], sizes = [24, 8], strides = [1, 1]} : vector<48x96xf32> to vector<24x8xf32>
    %371 = vector.extract_strided_slice %312 {offsets = [0, 56], sizes = [24, 8], strides = [1, 1]} : vector<48x96xf32> to vector<24x8xf32>
    %372 = vector.extract_strided_slice %312 {offsets = [0, 88], sizes = [24, 8], strides = [1, 1]} : vector<48x96xf32> to vector<24x8xf32>
    %cst_117 = arith.constant dense<0.000000e+00> : vector<24x24xf32>
    %373 = tpu.matmul %370, %371, %cst_117 {dimension_numbers = #tpu.dot_dimension_numbers<[1], [1], [0], [0], [0, 0, 1, 0], [], []>} : vector<24x8xf32>, vector<24x8xf32>, vector<24x24xf32> -> vector<24x24xf32>
    %cst_118 = arith.constant 0.353553385 : f32
    %374 = vector.broadcast %cst_118 : f32 to vector<24x24xf32>
    %375 = arith.mulf %373, %374 : vector<24x24xf32>
    %376 = vector.broadcast %10 : vector<1x24xf32> to vector<24x24xf32>
    %377 = arith.addf %375, %376 : vector<24x24xf32>
    %cst_119 = arith.constant dense<0xFF800000> : vector<24xf32>
    %378 = vector.multi_reduction <maximumf>, %377, %cst_119 [1] : vector<24x24xf32> to vector<24xf32>
    %379 = vector.shape_cast %378 : vector<24xf32> to vector<24x1xf32>
    %380 = vector.broadcast %379 : vector<24x1xf32> to vector<24x24xf32>
    %381 = arith.subf %377, %380 : vector<24x24xf32>
    %382 = math.exp %381 : vector<24x24xf32>
    %cst_120 = arith.constant dense<0.000000e+00> : vector<24xf32>
    %383 = vector.multi_reduction <add>, %382, %cst_120 [1] : vector<24x24xf32> to vector<24xf32>
    %384 = vector.shape_cast %383 : vector<24xf32> to vector<24x1xf32>
    %385 = tpu.reciprocal %384 {approx = true} : vector<24x1xf32> -> vector<24x1xf32>
    %386 = vector.broadcast %385 : vector<24x1xf32> to vector<24x24xf32>
    %387 = arith.mulf %382, %386 : vector<24x24xf32>
    %cst_121 = arith.constant dense<0.000000e+00> : vector<24x8xf32>
    %388 = tpu.matmul %387, %372, %cst_121 {dimension_numbers = #tpu.dot_dimension_numbers<[1], [0], [0], [1], [0, 0, 1, 1], [], []>} : vector<24x24xf32>, vector<24x8xf32>, vector<24x8xf32> -> vector<24x8xf32>
    %389 = tpu.concatenate %331, %350, %369, %388 in 1 : vector<24x8xf32>, vector<24x8xf32>, vector<24x8xf32>, vector<24x8xf32> -> vector<24x32xf32>
    %390 = vector.extract_strided_slice %312 {offsets = [24, 0], sizes = [24, 8], strides = [1, 1]} : vector<48x96xf32> to vector<24x8xf32>
    %391 = vector.extract_strided_slice %312 {offsets = [24, 32], sizes = [24, 8], strides = [1, 1]} : vector<48x96xf32> to vector<24x8xf32>
    %392 = vector.extract_strided_slice %312 {offsets = [24, 64], sizes = [24, 8], strides = [1, 1]} : vector<48x96xf32> to vector<24x8xf32>
    %cst_122 = arith.constant dense<0.000000e+00> : vector<24x24xf32>
    %393 = tpu.matmul %390, %391, %cst_122 {dimension_numbers = #tpu.dot_dimension_numbers<[1], [1], [0], [0], [0, 0, 1, 0], [], []>} : vector<24x8xf32>, vector<24x8xf32>, vector<24x24xf32> -> vector<24x24xf32>
    %cst_123 = arith.constant 0.353553385 : f32
    %394 = vector.broadcast %cst_123 : f32 to vector<24x24xf32>
    %395 = arith.mulf %393, %394 : vector<24x24xf32>
    %396 = vector.broadcast %10 : vector<1x24xf32> to vector<24x24xf32>
    %397 = arith.addf %395, %396 : vector<24x24xf32>
    %cst_124 = arith.constant dense<0xFF800000> : vector<24xf32>
    %398 = vector.multi_reduction <maximumf>, %397, %cst_124 [1] : vector<24x24xf32> to vector<24xf32>
    %399 = vector.shape_cast %398 : vector<24xf32> to vector<24x1xf32>
    %400 = vector.broadcast %399 : vector<24x1xf32> to vector<24x24xf32>
    %401 = arith.subf %397, %400 : vector<24x24xf32>
    %402 = math.exp %401 : vector<24x24xf32>
    %cst_125 = arith.constant dense<0.000000e+00> : vector<24xf32>
    %403 = vector.multi_reduction <add>, %402, %cst_125 [1] : vector<24x24xf32> to vector<24xf32>
    %404 = vector.shape_cast %403 : vector<24xf32> to vector<24x1xf32>
    %405 = tpu.reciprocal %404 {approx = true} : vector<24x1xf32> -> vector<24x1xf32>
    %406 = vector.broadcast %405 : vector<24x1xf32> to vector<24x24xf32>
    %407 = arith.mulf %402, %406 : vector<24x24xf32>
    %cst_126 = arith.constant dense<0.000000e+00> : vector<24x8xf32>
    %408 = tpu.matmul %407, %392, %cst_126 {dimension_numbers = #tpu.dot_dimension_numbers<[1], [0], [0], [1], [0, 0, 1, 1], [], []>} : vector<24x24xf32>, vector<24x8xf32>, vector<24x8xf32> -> vector<24x8xf32>
    %409 = vector.extract_strided_slice %312 {offsets = [24, 8], sizes = [24, 8], strides = [1, 1]} : vector<48x96xf32> to vector<24x8xf32>
    %410 = vector.extract_strided_slice %312 {offsets = [24, 40], sizes = [24, 8], strides = [1, 1]} : vector<48x96xf32> to vector<24x8xf32>
    %411 = vector.extract_strided_slice %312 {offsets = [24, 72], sizes = [24, 8], strides = [1, 1]} : vector<48x96xf32> to vector<24x8xf32>
    %cst_127 = arith.constant dense<0.000000e+00> : vector<24x24xf32>
    %412 = tpu.matmul %409, %410, %cst_127 {dimension_numbers = #tpu.dot_dimension_numbers<[1], [1], [0], [0], [0, 0, 1, 0], [], []>} : vector<24x8xf32>, vector<24x8xf32>, vector<24x24xf32> -> vector<24x24xf32>
    %cst_128 = arith.constant 0.353553385 : f32
    %413 = vector.broadcast %cst_128 : f32 to vector<24x24xf32>
    %414 = arith.mulf %412, %413 : vector<24x24xf32>
    %415 = vector.broadcast %10 : vector<1x24xf32> to vector<24x24xf32>
    %416 = arith.addf %414, %415 : vector<24x24xf32>
    %cst_129 = arith.constant dense<0xFF800000> : vector<24xf32>
    %417 = vector.multi_reduction <maximumf>, %416, %cst_129 [1] : vector<24x24xf32> to vector<24xf32>
    %418 = vector.shape_cast %417 : vector<24xf32> to vector<24x1xf32>
    %419 = vector.broadcast %418 : vector<24x1xf32> to vector<24x24xf32>
    %420 = arith.subf %416, %419 : vector<24x24xf32>
    %421 = math.exp %420 : vector<24x24xf32>
    %cst_130 = arith.constant dense<0.000000e+00> : vector<24xf32>
    %422 = vector.multi_reduction <add>, %421, %cst_130 [1] : vector<24x24xf32> to vector<24xf32>
    %423 = vector.shape_cast %422 : vector<24xf32> to vector<24x1xf32>
    %424 = tpu.reciprocal %423 {approx = true} : vector<24x1xf32> -> vector<24x1xf32>
    %425 = vector.broadcast %424 : vector<24x1xf32> to vector<24x24xf32>
    %426 = arith.mulf %421, %425 : vector<24x24xf32>
    %cst_131 = arith.constant dense<0.000000e+00> : vector<24x8xf32>
    %427 = tpu.matmul %426, %411, %cst_131 {dimension_numbers = #tpu.dot_dimension_numbers<[1], [0], [0], [1], [0, 0, 1, 1], [], []>} : vector<24x24xf32>, vector<24x8xf32>, vector<24x8xf32> -> vector<24x8xf32>
    %428 = vector.extract_strided_slice %312 {offsets = [24, 16], sizes = [24, 8], strides = [1, 1]} : vector<48x96xf32> to vector<24x8xf32>
    %429 = vector.extract_strided_slice %312 {offsets = [24, 48], sizes = [24, 8], strides = [1, 1]} : vector<48x96xf32> to vector<24x8xf32>
    %430 = vector.extract_strided_slice %312 {offsets = [24, 80], sizes = [24, 8], strides = [1, 1]} : vector<48x96xf32> to vector<24x8xf32>
    %cst_132 = arith.constant dense<0.000000e+00> : vector<24x24xf32>
    %431 = tpu.matmul %428, %429, %cst_132 {dimension_numbers = #tpu.dot_dimension_numbers<[1], [1], [0], [0], [0, 0, 1, 0], [], []>} : vector<24x8xf32>, vector<24x8xf32>, vector<24x24xf32> -> vector<24x24xf32>
    %cst_133 = arith.constant 0.353553385 : f32
    %432 = vector.broadcast %cst_133 : f32 to vector<24x24xf32>
    %433 = arith.mulf %431, %432 : vector<24x24xf32>
    %434 = vector.broadcast %10 : vector<1x24xf32> to vector<24x24xf32>
    %435 = arith.addf %433, %434 : vector<24x24xf32>
    %cst_134 = arith.constant dense<0xFF800000> : vector<24xf32>
    %436 = vector.multi_reduction <maximumf>, %435, %cst_134 [1] : vector<24x24xf32> to vector<24xf32>
    %437 = vector.shape_cast %436 : vector<24xf32> to vector<24x1xf32>
    %438 = vector.broadcast %437 : vector<24x1xf32> to vector<24x24xf32>
    %439 = arith.subf %435, %438 : vector<24x24xf32>
    %440 = math.exp %439 : vector<24x24xf32>
    %cst_135 = arith.constant dense<0.000000e+00> : vector<24xf32>
    %441 = vector.multi_reduction <add>, %440, %cst_135 [1] : vector<24x24xf32> to vector<24xf32>
    %442 = vector.shape_cast %441 : vector<24xf32> to vector<24x1xf32>
    %443 = tpu.reciprocal %442 {approx = true} : vector<24x1xf32> -> vector<24x1xf32>
    %444 = vector.broadcast %443 : vector<24x1xf32> to vector<24x24xf32>
    %445 = arith.mulf %440, %444 : vector<24x24xf32>
    %cst_136 = arith.constant dense<0.000000e+00> : vector<24x8xf32>
    %446 = tpu.matmul %445, %430, %cst_136 {dimension_numbers = #tpu.dot_dimension_numbers<[1], [0], [0], [1], [0, 0, 1, 1], [], []>} : vector<24x24xf32>, vector<24x8xf32>, vector<24x8xf32> -> vector<24x8xf32>
    %447 = vector.extract_strided_slice %312 {offsets = [24, 24], sizes = [24, 8], strides = [1, 1]} : vector<48x96xf32> to vector<24x8xf32>
    %448 = vector.extract_strided_slice %312 {offsets = [24, 56], sizes = [24, 8], strides = [1, 1]} : vector<48x96xf32> to vector<24x8xf32>
    %449 = vector.extract_strided_slice %312 {offsets = [24, 88], sizes = [24, 8], strides = [1, 1]} : vector<48x96xf32> to vector<24x8xf32>
    %cst_137 = arith.constant dense<0.000000e+00> : vector<24x24xf32>
    %450 = tpu.matmul %447, %448, %cst_137 {dimension_numbers = #tpu.dot_dimension_numbers<[1], [1], [0], [0], [0, 0, 1, 0], [], []>} : vector<24x8xf32>, vector<24x8xf32>, vector<24x24xf32> -> vector<24x24xf32>
    %cst_138 = arith.constant 0.353553385 : f32
    %451 = vector.broadcast %cst_138 : f32 to vector<24x24xf32>
    %452 = arith.mulf %450, %451 : vector<24x24xf32>
    %453 = vector.broadcast %10 : vector<1x24xf32> to vector<24x24xf32>
    %454 = arith.addf %452, %453 : vector<24x24xf32>
    %cst_139 = arith.constant dense<0xFF800000> : vector<24xf32>
    %455 = vector.multi_reduction <maximumf>, %454, %cst_139 [1] : vector<24x24xf32> to vector<24xf32>
    %456 = vector.shape_cast %455 : vector<24xf32> to vector<24x1xf32>
    %457 = vector.broadcast %456 : vector<24x1xf32> to vector<24x24xf32>
    %458 = arith.subf %454, %457 : vector<24x24xf32>
    %459 = math.exp %458 : vector<24x24xf32>
    %cst_140 = arith.constant dense<0.000000e+00> : vector<24xf32>
    %460 = vector.multi_reduction <add>, %459, %cst_140 [1] : vector<24x24xf32> to vector<24xf32>
    %461 = vector.shape_cast %460 : vector<24xf32> to vector<24x1xf32>
    %462 = tpu.reciprocal %461 {approx = true} : vector<24x1xf32> -> vector<24x1xf32>
    %463 = vector.broadcast %462 : vector<24x1xf32> to vector<24x24xf32>
    %464 = arith.mulf %459, %463 : vector<24x24xf32>
    %cst_141 = arith.constant dense<0.000000e+00> : vector<24x8xf32>
    %465 = tpu.matmul %464, %449, %cst_141 {dimension_numbers = #tpu.dot_dimension_numbers<[1], [0], [0], [1], [0, 0, 1, 1], [], []>} : vector<24x24xf32>, vector<24x8xf32>, vector<24x8xf32> -> vector<24x8xf32>
    %466 = tpu.concatenate %408, %427, %446, %465 in 1 : vector<24x8xf32>, vector<24x8xf32>, vector<24x8xf32>, vector<24x8xf32> -> vector<24x32xf32>
    %467 = tpu.concatenate %389, %466 in 0 : vector<24x32xf32>, vector<24x32xf32> -> vector<48x32xf32>
    %c1_142 = arith.constant 1 : index
    %c0_143 = arith.constant 0 : index
    %c0_144 = arith.constant 0 : index
    %468 = vector.load %arg5[%c1_142, %c0_143, %c0_144] : memref<2x32x32xf32, #tpu.memory_space<vmem>>, vector<1x32x32xf32>
    %469 = vector.shape_cast %468 : vector<1x32x32xf32> to vector<32x32xf32>
    %cst_145 = arith.constant dense<0.000000e+00> : vector<48x32xf32>
    %470 = tpu.matmul %467, %469, %cst_145 {dimension_numbers = #tpu.dot_dimension_numbers<[1], [0], [0], [1], [0, 0, 1, 1], [], []>} : vector<48x32xf32>, vector<32x32xf32>, vector<48x32xf32> -> vector<48x32xf32>
    %471 = arith.addf %277, %470 : vector<48x32xf32>
    %472 = vector.broadcast %285 : vector<1x32xf32> to vector<48x32xf32>
    %473 = arith.addf %471, %472 : vector<48x32xf32>
    %cst_146 = arith.constant dense<0.000000e+00> : vector<48xf32>
    %474 = vector.multi_reduction <add>, %473, %cst_146 [1] : vector<48x32xf32> to vector<48xf32>
    %475 = vector.shape_cast %474 : vector<48xf32> to vector<48x1xf32>
    %cst_147 = arith.constant 3.200000e+01 : f32
    %476 = vector.broadcast %cst_147 : f32 to vector<48x1xf32>
    %477 = arith.divf %475, %476 : vector<48x1xf32>
    %478 = vector.broadcast %477 : vector<48x1xf32> to vector<48x32xf32>
    %479 = arith.subf %473, %478 : vector<48x32xf32>
    %480 = arith.mulf %479, %479 : vector<48x32xf32>
    %cst_148 = arith.constant dense<0.000000e+00> : vector<48xf32>
    %481 = vector.multi_reduction <add>, %480, %cst_148 [1] : vector<48x32xf32> to vector<48xf32>
    %482 = vector.shape_cast %481 : vector<48xf32> to vector<48x1xf32>
    %cst_149 = arith.constant 3.200000e+01 : f32
    %483 = vector.broadcast %cst_149 : f32 to vector<48x1xf32>
    %484 = arith.divf %482, %483 : vector<48x1xf32>
    %cst_150 = arith.constant 9.99999997E-7 : f32
    %485 = vector.broadcast %cst_150 : f32 to vector<48x1xf32>
    %486 = arith.addf %484, %485 : vector<48x1xf32>
    %487 = math.rsqrt %486 : vector<48x1xf32>
    %488 = vector.broadcast %487 : vector<48x1xf32> to vector<48x32xf32>
    %489 = arith.mulf %479, %488 : vector<48x32xf32>
    %490 = vector.broadcast %282 : vector<1x32xf32> to vector<48x32xf32>
    %491 = arith.mulf %489, %490 : vector<48x32xf32>
    %492 = vector.broadcast %283 : vector<1x32xf32> to vector<48x32xf32>
    %493 = arith.addf %491, %492 : vector<48x32xf32>
    %c1_151 = arith.constant 1 : index
    %c0_152 = arith.constant 0 : index
    %c0_153 = arith.constant 0 : index
    %494 = vector.load %arg6[%c1_151, %c0_152, %c0_153] : memref<2x32x128xf32, #tpu.memory_space<vmem>>, vector<1x32x128xf32>
    %495 = vector.shape_cast %494 : vector<1x32x128xf32> to vector<32x128xf32>
    %cst_154 = arith.constant dense<0.000000e+00> : vector<48x128xf32>
    %496 = tpu.matmul %493, %495, %cst_154 {dimension_numbers = #tpu.dot_dimension_numbers<[1], [0], [0], [1], [0, 0, 1, 1], [], []>} : vector<48x32xf32>, vector<32x128xf32>, vector<48x128xf32> -> vector<48x128xf32>
    %497 = vector.broadcast %286 : vector<1x128xf32> to vector<48x128xf32>
    %498 = arith.addf %496, %497 : vector<48x128xf32>
    %cst_155 = arith.constant 5.000000e-01 : f32
    %499 = vector.broadcast %cst_155 : f32 to vector<48x128xf32>
    %500 = arith.mulf %499, %498 : vector<48x128xf32>
    %cst_156 = arith.constant 0.707106769 : f32
    %501 = vector.broadcast %cst_156 : f32 to vector<48x128xf32>
    %502 = arith.mulf %498, %501 : vector<48x128xf32>
    %cst_157 = arith.constant 0.000000e+00 : f32
    %503 = vector.broadcast %cst_157 : f32 to vector<48x128xf32>
    %504 = arith.cmpf olt, %502, %503 : vector<48x128xf32>
    %cst_158 = arith.constant -1.000000e+00 : f32
    %cst_159 = arith.constant 1.000000e+00 : f32
    %505 = vector.broadcast %cst_158 : f32 to vector<48x128xf32>
    %506 = vector.broadcast %cst_159 : f32 to vector<48x128xf32>
    %507 = arith.select %504, %505, %506 : vector<48x128xi1>, vector<48x128xf32>
    %508 = math.absf %502 : vector<48x128xf32>
    %cst_160 = arith.constant 0.327591091 : f32
    %509 = vector.broadcast %cst_160 : f32 to vector<48x128xf32>
    %510 = arith.mulf %509, %508 : vector<48x128xf32>
    %cst_161 = arith.constant 1.000000e+00 : f32
    %511 = vector.broadcast %cst_161 : f32 to vector<48x128xf32>
    %512 = arith.addf %511, %510 : vector<48x128xf32>
    %513 = tpu.reciprocal %512 {approx = true} : vector<48x128xf32> -> vector<48x128xf32>
    %cst_162 = arith.constant 1.06140542 : f32
    %514 = vector.broadcast %cst_162 : f32 to vector<48x128xf32>
    %515 = arith.mulf %514, %513 : vector<48x128xf32>
    %cst_163 = arith.constant -1.45315206 : f32
    %516 = vector.broadcast %cst_163 : f32 to vector<48x128xf32>
    %517 = arith.addf %515, %516 : vector<48x128xf32>
    %518 = arith.mulf %517, %513 : vector<48x128xf32>
    %cst_164 = arith.constant 1.42141378 : f32
    %519 = vector.broadcast %cst_164 : f32 to vector<48x128xf32>
    %520 = arith.addf %518, %519 : vector<48x128xf32>
    %521 = arith.mulf %520, %513 : vector<48x128xf32>
    %cst_165 = arith.constant -0.284496725 : f32
    %522 = vector.broadcast %cst_165 : f32 to vector<48x128xf32>
    %523 = arith.addf %521, %522 : vector<48x128xf32>
    %524 = arith.mulf %523, %513 : vector<48x128xf32>
    %cst_166 = arith.constant 0.254829586 : f32
    %525 = vector.broadcast %cst_166 : f32 to vector<48x128xf32>
    %526 = arith.addf %524, %525 : vector<48x128xf32>
    %527 = arith.mulf %526, %513 : vector<48x128xf32>
    %cst_167 = arith.constant 0.000000e+00 : f32
    %528 = vector.broadcast %cst_167 : f32 to vector<48x128xf32>
    %529 = arith.subf %528, %508 : vector<48x128xf32>
    %530 = arith.mulf %529, %508 : vector<48x128xf32>
    %531 = math.exp %530 : vector<48x128xf32>
    %532 = arith.mulf %527, %531 : vector<48x128xf32>
    %cst_168 = arith.constant 1.000000e+00 : f32
    %533 = vector.broadcast %cst_168 : f32 to vector<48x128xf32>
    %534 = arith.subf %533, %532 : vector<48x128xf32>
    %535 = arith.mulf %507, %534 : vector<48x128xf32>
    %cst_169 = arith.constant 1.000000e+00 : f32
    %536 = vector.broadcast %cst_169 : f32 to vector<48x128xf32>
    %537 = arith.addf %536, %535 : vector<48x128xf32>
    %538 = arith.mulf %500, %537 : vector<48x128xf32>
    %c1_170 = arith.constant 1 : index
    %c0_171 = arith.constant 0 : index
    %c0_172 = arith.constant 0 : index
    %539 = vector.load %arg7[%c1_170, %c0_171, %c0_172] : memref<2x128x32xf32, #tpu.memory_space<vmem>>, vector<1x128x32xf32>
    %540 = vector.shape_cast %539 : vector<1x128x32xf32> to vector<128x32xf32>
    %cst_173 = arith.constant dense<0.000000e+00> : vector<48x32xf32>
    %541 = tpu.matmul %538, %540, %cst_173 {dimension_numbers = #tpu.dot_dimension_numbers<[1], [0], [0], [1], [0, 0, 1, 1], [], []>} : vector<48x128xf32>, vector<128x32xf32>, vector<48x32xf32> -> vector<48x32xf32>
    %542 = arith.addf %473, %541 : vector<48x32xf32>
    %543 = vector.broadcast %287 : vector<1x32xf32> to vector<48x32xf32>
    %544 = arith.addf %542, %543 : vector<48x32xf32>
    %c0_174 = arith.constant 0 : index
    %c0_175 = arith.constant 0 : index
    %545 = vector.load %arg9[%c0_174, %c0_175] : memref<2x32xf32, #tpu.memory_space<vmem>>, vector<2x32xf32>
    %546 = vector.extract_strided_slice %544 {offsets = [0, 0], sizes = [1, 32], strides = [1, 1]} : vector<48x32xf32> to vector<1x32xf32>
    %547 = vector.extract_strided_slice %544 {offsets = [24, 0], sizes = [1, 32], strides = [1, 1]} : vector<48x32xf32> to vector<1x32xf32>
    %548 = tpu.concatenate %546, %547 in 0 : vector<1x32xf32>, vector<1x32xf32> -> vector<2x32xf32>
    %549 = vector.extract_strided_slice %545 {offsets = [0, 0], sizes = [1, 32], strides = [1, 1]} : vector<2x32xf32> to vector<1x32xf32>
    %550 = vector.extract_strided_slice %545 {offsets = [1, 0], sizes = [1, 32], strides = [1, 1]} : vector<2x32xf32> to vector<1x32xf32>
    %cst_176 = arith.constant dense<0.000000e+00> : vector<2xf32>
    %551 = vector.multi_reduction <add>, %548, %cst_176 [1] : vector<2x32xf32> to vector<2xf32>
    %552 = vector.shape_cast %551 : vector<2xf32> to vector<2x1xf32>
    %cst_177 = arith.constant 3.200000e+01 : f32
    %553 = vector.broadcast %cst_177 : f32 to vector<2x1xf32>
    %554 = arith.divf %552, %553 : vector<2x1xf32>
    %555 = vector.broadcast %554 : vector<2x1xf32> to vector<2x32xf32>
    %556 = arith.subf %548, %555 : vector<2x32xf32>
    %557 = arith.mulf %556, %556 : vector<2x32xf32>
    %cst_178 = arith.constant dense<0.000000e+00> : vector<2xf32>
    %558 = vector.multi_reduction <add>, %557, %cst_178 [1] : vector<2x32xf32> to vector<2xf32>
    %559 = vector.shape_cast %558 : vector<2xf32> to vector<2x1xf32>
    %cst_179 = arith.constant 3.200000e+01 : f32
    %560 = vector.broadcast %cst_179 : f32 to vector<2x1xf32>
    %561 = arith.divf %559, %560 : vector<2x1xf32>
    %cst_180 = arith.constant 9.99999997E-7 : f32
    %562 = vector.broadcast %cst_180 : f32 to vector<2x1xf32>
    %563 = arith.addf %561, %562 : vector<2x1xf32>
    %564 = math.rsqrt %563 : vector<2x1xf32>
    %565 = vector.broadcast %564 : vector<2x1xf32> to vector<2x32xf32>
    %566 = arith.mulf %556, %565 : vector<2x32xf32>
    %567 = vector.broadcast %549 : vector<1x32xf32> to vector<2x32xf32>
    %568 = arith.mulf %566, %567 : vector<2x32xf32>
    %569 = vector.broadcast %550 : vector<1x32xf32> to vector<2x32xf32>
    %570 = arith.addf %568, %569 : vector<2x32xf32>
    %c0_181 = arith.constant 0 : index
    %c0_182 = arith.constant 0 : index
    %571 = vector.load %arg10[%c0_181, %c0_182] : memref<32x128xf32, #tpu.memory_space<vmem>>, vector<32x128xf32>
    %cst_183 = arith.constant dense<0.000000e+00> : vector<2x128xf32>
    %572 = tpu.matmul %570, %571, %cst_183 {dimension_numbers = #tpu.dot_dimension_numbers<[1], [0], [0], [1], [0, 0, 1, 1], [], []>} : vector<2x32xf32>, vector<32x128xf32>, vector<2x128xf32> -> vector<2x128xf32>
    %c0_184 = arith.constant 0 : index
    %c0_185 = arith.constant 0 : index
    %573 = vector.load %arg11[%c0_184, %c0_185] : memref<1x128xf32, #tpu.memory_space<vmem>>, vector<1x128xf32>
    %574 = vector.broadcast %573 : vector<1x128xf32> to vector<2x128xf32>
    %575 = arith.addf %572, %574 : vector<2x128xf32>
    %c0_186 = arith.constant 0 : index
    %c0_187 = arith.constant 0 : index
    %576 = vector.load %arg12[%c0_186, %c0_187] : memref<2x128xf32, #tpu.memory_space<vmem>>, vector<2x128xf32>
    tpu.vector_store %arg12[%c0_186, %c0_187], %575 {strides = array<i32>} : memref<2x128xf32, #tpu.memory_space<vmem>>, vector<2x128xf32>,
    return
  }
  func.func @transform_0(%arg0: i32) -> (i32, i32) {
    %c0_i32 = arith.constant 0 : i32
    %c0_i32_0 = arith.constant 0 : i32
    %c0_i32_1 = arith.constant 0 : i32
    return %c0_i32, %c0_i32_0 : i32, i32
  }
  func.func @transform_1(%arg0: i32) -> (i32, i32) {
    %c0_i32 = arith.constant 0 : i32
    %c0_i32_0 = arith.constant 0 : i32
    %c0_i32_1 = arith.constant 0 : i32
    return %c0_i32, %c0_i32_0 : i32, i32
  }
  func.func @transform_2(%arg0: i32) -> (i32, i32) {
    %c0_i32 = arith.constant 0 : i32
    %c0_i32_0 = arith.constant 0 : i32
    %c0_i32_1 = arith.constant 0 : i32
    return %c0_i32, %c0_i32_0 : i32, i32
  }
  func.func @transform_3(%arg0: i32) -> (i32, i32, i32) {
    %c0_i32 = arith.constant 0 : i32
    %c0_i32_0 = arith.constant 0 : i32
    %c0_i32_1 = arith.constant 0 : i32
    %c0_i32_2 = arith.constant 0 : i32
    return %c0_i32, %c0_i32_0, %c0_i32_1 : i32, i32, i32
  }
  func.func @transform_4(%arg0: i32) -> (i32, i32, i32) {
    %c0_i32 = arith.constant 0 : i32
    %c0_i32_0 = arith.constant 0 : i32
    %c0_i32_1 = arith.constant 0 : i32
    %c0_i32_2 = arith.constant 0 : i32
    return %c0_i32, %c0_i32_0, %c0_i32_1 : i32, i32, i32
  }
  func.func @transform_5(%arg0: i32) -> (i32, i32, i32) {
    %c0_i32 = arith.constant 0 : i32
    %c0_i32_0 = arith.constant 0 : i32
    %c0_i32_1 = arith.constant 0 : i32
    %c0_i32_2 = arith.constant 0 : i32
    return %c0_i32, %c0_i32_0, %c0_i32_1 : i32, i32, i32
  }
  func.func @transform_6(%arg0: i32) -> (i32, i32, i32) {
    %c0_i32 = arith.constant 0 : i32
    %c0_i32_0 = arith.constant 0 : i32
    %c0_i32_1 = arith.constant 0 : i32
    %c0_i32_2 = arith.constant 0 : i32
    return %c0_i32, %c0_i32_0, %c0_i32_1 : i32, i32, i32
  }
  func.func @transform_7(%arg0: i32) -> (i32, i32, i32) {
    %c0_i32 = arith.constant 0 : i32
    %c0_i32_0 = arith.constant 0 : i32
    %c0_i32_1 = arith.constant 0 : i32
    %c0_i32_2 = arith.constant 0 : i32
    return %c0_i32, %c0_i32_0, %c0_i32_1 : i32, i32, i32
  }
  func.func @transform_8(%arg0: i32) -> (i32, i32) {
    %c0_i32 = arith.constant 0 : i32
    %c0_i32_0 = arith.constant 0 : i32
    %c0_i32_1 = arith.constant 0 : i32
    return %c0_i32, %c0_i32_0 : i32, i32
  }
  func.func @transform_9(%arg0: i32) -> (i32, i32) {
    %c0_i32 = arith.constant 0 : i32
    %c0_i32_0 = arith.constant 0 : i32
    %c0_i32_1 = arith.constant 0 : i32
    return %c0_i32, %c0_i32_0 : i32, i32
  }
  func.func @transform_10(%arg0: i32) -> (i32, i32) {
    %c0_i32 = arith.constant 0 : i32
    %c0_i32_0 = arith.constant 0 : i32
    %c0_i32_1 = arith.constant 0 : i32
    return %c0_i32, %c0_i32_0 : i32, i32
  }
  func.func @transform_11(%arg0: i32) -> (i32, i32) {
    %c0_i32 = arith.constant 0 : i32
    %c0_i32_0 = arith.constant 0 : i32
    %c0_i32_1 = arith.constant 0 : i32
    return %c0_i32, %c0_i32_0 : i32, i32
  }
}

</mosaic_0001>

<bundles_post_ra>
// kernel: vit_forward.1
= control target key start
LH: loop header
LB: loop body
LE: loop exit
PB: predicated region body
PF: predicated region fallthrough
CT: control target
= control target key end

     0   :  { %v8021_v3 = vmov 0.0|0.0   ;;  %vm81_vm0 = vcmask 523264   ;;  %s10158_s0 = inlined_call_operand.vmem [shape: f32[48,192], index: 0, kind: input, shape index: {}]   ;;  %s10159_s1 = inlined_call_operand.vmem [shape: f32[192,32], index: 1, kind: input, shape index: {}]   ;;  %s10160_s2 = inlined_call_operand.vmem [shape: f32[48,32], index: 2, kind: input, shape index: {}]   ;;  %s10161_s3 = inlined_call_operand.vmem [shape: f32[2,32,96], index: 3, kind: input, shape index: {}]   ;;  %s10162_s4 = inlined_call_operand.vmem [shape: f32[2,32,32], index: 4, kind: input, shape index: {}]   ;;  %s10163_s5 = inlined_call_operand.vmem [shape: f32[2,32,128], index: 5, kind: input, shape index: {}]   ;;  %s10164_s6 = inlined_call_operand.vmem [shape: f32[2,128,32], index: 6, kind: input, shape index: {}]   ;;  %s10165_s7 = inlined_call_operand.vmem [shape: f32[2,8,128], index: 7, kind: input, shape index: {}]   ;;  %s10166_s8 = inlined_call_operand.vmem [shape: f32[2,32], index: 8, kind: input, shape index: {}]   ;;  %s10167_s9 = inlined_call_operand.vmem [shape: f32[32,128], index: 9, kind: input, shape index: {}]   ;;  %s10168_s10 = inlined_call_operand.vmem [shape: f32[1,128], index: 10, kind: input, shape index: {}]   ;;  %s10169_s11 = inlined_call_operand.hbm [shape: f32[2,128], index: 11, kind: output, shape index: {}]  }
   0x1   :  { %v57_v0 = vld [vmem:[%s10159_s1] sm:$0xff]  ;;  %v58_v1 = vld [vmem:[%s10159_s1 + $0x8] sm:$0xff]  ;;  %v59_v2 = vld [vmem:[%s10159_s1 + $0x10] sm:$0xff]  ;;  %7259 = vmatprep.subr.bf16.mxu0 %v8021_v3  ;;  %7303 = vmatprep.subr.bf16.mxu1 %v8021_v3 }
   0x2   :  { %v7260_v4 = vpack.c.bf16 %v58_v1, %v57_v0  ;;  %v60_v5 = vld [vmem:[%s10159_s1 + $0x18] sm:$0xff]  ;;  %v61_v7 = vld [vmem:[%s10159_s1 + $0x20] sm:$0xff]  ;;  %v62_v8 = vld [vmem:[%s10159_s1 + $0x28] sm:$0xff] }
   0x3   :  { %v7263_v6 = vpack.c.bf16 %v60_v5, %v59_v2  ;;  %v7266_v9 = vpack.c.bf16 %v62_v8, %v61_v7  ;;  %v63_v10 = vld [vmem:[%s10159_s1 + $0x30] sm:$0xff]  ;;  %v64_v11 = vld [vmem:[%s10159_s1 + $0x38] sm:$0xff]  ;;  %v46_v12 = vld [vmem:[%s10158_s0 + $0x8] sm:$0xff] }
   0x4   :  { %7261 = vmatpush1.bf16.msra.mxu0 %v7260_v4  ;;  %6066 = vmatprep.mubr.msk.f32.mxu0 %vm81_vm0, %v46_v12  ;;  %v7269_v13 = vpack.c.bf16 %v64_v11, %v63_v10 }
   0x5   :  { %7262 = vmatprep.subr.bf16.mxu0 %v8021_v3 }
   0x8   :  { %7264 = vmatpush1.bf16.msra.mxu0 %v7263_v6 }
   0x9   :  { %7265 = vmatprep.subr.bf16.mxu0 %v8021_v3 }
   0xc   :  { %7267 = vmatpush1.bf16.msra.mxu0 %v7266_v9 }
   0xd   :  { %16 = vsyncpa [#allocation3], 0  ;;  %7268 = vmatprep.subr.bf16.mxu0 %v8021_v3  ;;  %v65_v14 = vld [vmem:[%s10159_s1 + $0x40] sm:$0xff]  ;;  %v66_v15 = vld [vmem:[%s10159_s1 + $0x48] sm:$0xff]  ;;  %vm206_vm1 = vcmask 261120   ;;  %s8022_s28 = smov 96  }
   0xe   :  { %v7272_v16 = vpack.c.bf16 %v66_v15, %v65_v14  ;;  %v67_v17 = vld [vmem:[%s10159_s1 + $0x50] sm:$0xff]  ;;  %v68_v18 = vld [vmem:[%s10159_s1 + $0x58] sm:$0xff]  ;;  %v69_v20 = vld [vmem:[%s10159_s1 + $0x60] sm:$0xff]  ;;  %vm8023_vm2 = vmmov 0   ;;  %vm436_vm3 = vcmask 64512   ;;  %vm535_vm6 = vcmask 195584  }
   0xf   :  { %v7275_v19 = vpack.c.bf16 %v68_v18, %v67_v17  ;;  %v70_v21 = vld [vmem:[%s10159_s1 + $0x68] sm:$0xff]  ;;  %v71_v23 = vld [vmem:[%s10159_s1 + $0x70] sm:$0xff]  ;;  %v72_v24 = vld [vmem:[%s10159_s1 + $0x78] sm:$0xff]  ;;  %s8026_s29 = smov 64   ;;  %s8027_s30 = smov 88   ;;  %vm1429_vm7 = vcmask 130048  }
  0x10   :  { %7270 = vmatpush1.bf16.msra.mxu0 %v7269_v13  ;;  %v7278_v22 = vpack.c.bf16 %v70_v21, %v69_v20  ;;  %v7281_v25 = vpack.c.bf16 %v72_v24, %v71_v23  ;;  %v73_v26 = vld [vmem:[%s10159_s1 + $0x80] sm:$0xff]  ;;  %v74_v27 = vld [vmem:[%s10159_s1 + $0x88] sm:$0xff]  ;;  %v75_v29 = vld [vmem:[%s10159_s1 + $0x90] sm:$0xff]  ;;  %s8028_s12 = smov 120   ;;  %s8030_s16 = smov 80  }
  0x11   :  { %7271 = vmatprep.subr.bf16.mxu0 %v8021_v3  ;;  %v7284_v28 = vpack.c.bf16 %v74_v27, %v73_v26  ;;  %v76_v30 = vld [vmem:[%s10159_s1 + $0x98] sm:$0xff]  ;;  %v77_v32 = vld [vmem:[%s10159_s1 + $0xa0] sm:$0xff]  ;;  %v78_v33 = vld [vmem:[%s10159_s1 + $0xa8] sm:$0xff]  ;;  %s8031_s17 = smov 72   ;;  %s8032_s18 = smov 112  }
  0x12   :  { %v7287_v31 = vpack.c.bf16 %v76_v30, %v75_v29  ;;  %v7290_v34 = vpack.c.bf16 %v78_v33, %v77_v32  ;;  %v79_v35 = vld [vmem:[%s10159_s1 + $0xb0] sm:$0xff]  ;;  %v80_v36 = vld [vmem:[%s10159_s1 + $0xb8] sm:$0xff]  ;;  %v45_v38 = vld [vmem:[%s10158_s0] sm:$0xff]  ;;  %s8033_s19 = smov 104   ;;  %s8034_s20 = smov 48  }
  0x13   :  { %v7293_v37 = vpack.c.bf16 %v80_v36, %v79_v35  ;;  %v48_v39 = vld [vmem:[%s10158_s0 + $0x18] sm:$0xff]  ;;  %v47_v40 = vld [vmem:[%s10158_s0 + $0x10] sm:$0xff]  ;;  %v50_v41 = vld [vmem:[%s10158_s0 + $0x28] sm:$0xff]  ;;  %s8035_s21 = smov 40   ;;  %s8036_s22 = smov 8  }
  0x14   :  { %7273 = vmatpush1.bf16.msra.mxu0 %v7272_v16  ;;  %v49_v42 = vld [vmem:[%s10158_s0 + $0x20] sm:$0xff]  ;;  %v52_v43 = vld [vmem:[%s10158_s0 + $0x38] sm:$0xff]  ;;  %v51_v44 = vld [vmem:[%s10158_s0 + $0x30] sm:$0xff]  ;;  %s8037_s15 = smov 16   ;;  %s8038_s1 = smov 24  }
  0x15   :  { %7274 = vmatprep.subr.bf16.mxu0 %v8021_v3  ;;  %v39_v45 = vld [vmem:[%s10160_s2] sm:$0xff]  ;;  %v40_v49 = vld [vmem:[%s10160_s2 + $0x8] sm:$0xff]  ;;  %v41_v54 = vld [vmem:[%s10160_s2 + $0x10] sm:$0xff] }
  0x16   :  { %v42_v59 = vld [vmem:[%s10160_s2 + $0x18] sm:$0xff]  ;;  %v307_v23 = vld [vmem:[%s10161_s3 + $0x8] sm:$0xff]  ;;  %v53_v26 = vld [vmem:[%s10158_s0 + $0x40] sm:$0xff] }
  0x17   :  { %v308_v27 = vld [vmem:[%s10161_s3 + $0x10] sm:$0xff]  ;;  %v56_v29 = vld [vmem:[%s10158_s0 + $0x58] sm:$0xff]  ;;  %vm8359_vm4 = vmpackc.low %vm436_vm3, %vm436_vm3 }
  0x18   :  { %7276 = vmatpush1.bf16.msra.mxu0 %v7275_v19 }
  0x19   :  { %7277 = vmatprep.subr.bf16.mxu0 %v8021_v3 }
  0x1c   :  { %7279 = vmatpush1.bf16.msra.mxu0 %v7278_v22  ;;  %v306_v22 = vld [vmem:[%s10161_s3] sm:$0xff] }
  0x1d   :  { %7280 = vmatprep.subr.bf16.mxu0 %v8021_v3  ;;  %v7295_v24 = vpack.c.bf16 %v307_v23, %v306_v22 }
  0x20   :  { %7282 = vmatpush1.bf16.msra.mxu0 %v7281_v25  ;;  %v54_v25 = vld [vmem:[%s10158_s0 + $0x48] sm:$0xff] }
  0x21   :  { %7283 = vmatprep.subr.bf16.mxu0 %v8021_v3 }
  0x24   :  { %7285 = vmatpush1.bf16.msra.mxu0 %v7284_v28  ;;  %v309_v28 = vld [vmem:[%s10161_s3 + $0x18] sm:$0xff] }
  0x25   :  { %7286 = vmatprep.subr.bf16.mxu0 %v8021_v3  ;;  %v7299_v30 = vpack.c.bf16 %v309_v28, %v308_v27 }
  0x28   :  { %7288 = vmatpush1.bf16.msra.mxu0 %v7287_v31  ;;  %v55_v31 = vld [vmem:[%s10158_s0 + $0x50] sm:$0xff] }
  0x29   :  { %7289 = vmatprep.subr.bf16.mxu0 %v8021_v3 }
  0x2c   :  { %7291 = vmatpush1.bf16.msra.mxu0 %v7290_v34  ;;  %v201_v34 = vlaneseq }
  0x2d   :  { %7292 = vmatprep.subr.bf16.mxu0 %v8021_v3 }
  0x30   :  { %7294 = vmatpush1.bf16.msra.mxu0 %v7293_v37 }
  0x31   :  { %7296 = vmatprep.subr.bf16.mxu0 %v7295_v24 }
  0x33   :  { %165 = vmatmul.mubr.f32.vlgmr.msra.gmra.mrb[0].mxu0 %v45_v38  ;;  %v8294_v38 = vshrl.u32 %v201_v34, 7 }
  0x34   :  { %6067 = vmatprep.mubr.msk.f32.mxu0 %vm81_vm0, %v48_v39  ;;  %7298 = vmatpush3.bf16.msra.mxu0 %v7295_v24 }
  0x35   :  { %7300 = vmatprep.subr.bf16.mxu0 %v7299_v30 }
  0x37   :  { %170 = vmatmul.mubr.f32.gmra.mrb[2].mxu0 %v47_v40 }
  0x38   :  { %6068 = vmatprep.mubr.msk.f32.mxu0 %vm81_vm0, %v50_v41  ;;  %7302 = vmatpush3.bf16.msra.mxu0 %v7299_v30  ;;  %v8025_v30 = vmov -1e+30  }
  0x39   :  { %7321 = vmatprep.subr.bf16.mxu0 %v8021_v3 }
  0x3b   :  { %175 = vmatmul.mubr.f32.gmra.mrb[4].mxu0 %v49_v42  ;;  %v8297_v42 = vsub.s32 0, %v8294_v38 }
  0x3c   :  { %6069 = vmatprep.mubr.msk.f32.mxu0 %vm81_vm0, %v52_v43  ;;  %v205_v43 = vld [vmem:[%s10165_s7] sm:$0xff] }
  0x3f   :  { %180 = vmatmul.mubr.f32.gmra.mrb[6].mxu0 %v51_v44 }
  0x40   :  { %6070 = vmatprep.mubr.msk.f32.mxu0 %vm81_vm0, %v54_v25 }
  0x43   :  { %185 = vmatmul.mubr.f32.gmra.mrb[8].mxu0 %v53_v26 }
  0x44   :  { %6071 = vmatprep.mubr.msk.f32.mxu0 %vm81_vm0, %v56_v29  ;;  %v202_v29 = vand.u32 127, %v201_v34 }
  0x46   :  { %vm203_vm5 = vcmp.lt.s32.totalorder %v202_v29, 17 }
  0x47   :  { %190 = vmatmul.mubr.f32.gmra.mrb[10].mxu0 %v55_v31  ;;  %v8381_v31 = vsel %vm203_vm5, 0.0, %v8025_v30  ;;  %vm5943_vm5 = vcmask 254976  }
 0x106   :  { %v166_v46 = vpop.f32.mrb[0].mxu0 }
 0x107   :  { %v8217_v47 = vadd.f32 %v166_v46, %v39_v45  ;;  %v168_v48 = vpop.f32.mrb[1].mxu0  ;;  %v8303_v46 = vsub.s32 1, %v8294_v38 }
 0x109   :  { %v207_v50 = vsel %vm206_vm1, %v8217_v47, 0.0 }
 0x10a   :  { %v171_v51 = vpop.f32.mrb[2].mxu0  ;;  %208 = vadd.xlane.f32.xlu0 %v207_v50 }
 0x10b   :  { %v8224_v52 = vadd.f32 %v171_v51, %v40_v49  ;;  %v173_v53 = vpop.f32.mrb[3].mxu0  ;;  %v8306_v49 = vrot.slane %v205_v43, %v8297_v42 }
 0x10d   :  { %v210_v55 = vsel %vm206_vm1, %v8224_v52, 0.0 }
 0x10e   :  { %v176_v56 = vpop.f32.mrb[4].mxu0  ;;  %211 = vadd.xlane.f32.xlu0 %v210_v55 }
 0x10f   :  { %v8231_v57 = vadd.f32 %v176_v56, %v41_v54  ;;  %v178_v58 = vpop.f32.mrb[5].mxu0  ;;  %v8310_v54 = vrot.slane %v205_v43, %v8303_v46 }
 0x111   :  { %v213_v60 = vsel %vm206_vm1, %v8231_v57, 0.0 }
 0x112   :  { %v181_v61 = vpop.f32.mrb[6].mxu0  ;;  %214 = vadd.xlane.f32.xlu1 %v213_v60 }
 0x113   :  { %v8238_v62 = vadd.f32 %v181_v61, %v42_v59  ;;  %v183_v63 = vpop.f32.mrb[7].mxu0 }
 0x115   :  { %v216_v0 = vsel %vm206_vm1, %v8238_v62, 0.0 }
 0x116   :  { %217 = vadd.xlane.f32.xlu1 %v216_v0 }
 0x197   :  { %v209_v1 = vpop.xlane.xlu0 %208 }
 0x198   :  { %v226_v2 = vmul.f32 0.03125, %v209_v1 }
 0x19a   :  { %v8243_v4 = vsub.f32 %v8217_v47, %v226_v2 }
 0x19b   :  { %v212_v5 = vpop.xlane.xlu0 %211 }
 0x19c   :  { %v227_v6 = vmul.f32 0.03125, %v212_v5  ;;  %v238_v7 = vmul.f32 %v8243_v4, %v8243_v4 }
 0x19e   :  { %v8248_v8 = vsub.f32 %v8224_v52, %v227_v6  ;;  %v244_v9 = vsel %vm206_vm1, %v238_v7, 0.0 }
 0x19f   :  { %v215_v10 = vpop.xlane.xlu1 %214  ;;  %245 = vadd.xlane.f32.xlu0 %v244_v9 }
 0x1a0   :  { %v228_v11 = vmul.f32 0.03125, %v215_v10  ;;  %v239_v12 = vmul.f32 %v8248_v8, %v8248_v8 }
 0x1a2   :  { %v8254_v13 = vsub.f32 %v8231_v57, %v228_v11  ;;  %v247_v14 = vsel %vm206_vm1, %v239_v12, 0.0  ;;  %v312_v12 = vsub.s32 4, %v8294_v38 }
 0x1a3   :  { %v218_v15 = vpop.xlane.xlu1 %217  ;;  %248 = vadd.xlane.f32.xlu1 %v247_v14 }
 0x1a4   :  { %v229_v16 = vmul.f32 0.03125, %v218_v15  ;;  %v240_v17 = vmul.f32 %v8254_v13, %v8254_v13 }
 0x1a6   :  { %v8260_v18 = vsub.f32 %v8238_v62, %v229_v16  ;;  %v250_v19 = vsel %vm206_vm1, %v240_v17, 0.0 }
 0x1a7   :  { %251 = vadd.xlane.f32.xlu0 %v250_v19  ;;  %v8024_v19 = vmov 0.0  }
 0x1a8   :  { %v241_v20 = vmul.f32 %v8260_v18, %v8260_v18  ;;  %6607 = vmatprep.mubr.msk.f32.mxu1 %vm8023_vm2, %v8024_v19 }
 0x1aa   :  { %v253_v21 = vsel %vm206_vm1, %v241_v20, 0.0 }
 0x1ab   :  { %254 = vadd.xlane.f32.xlu1 %v253_v21 }
 0x22c   :  { %v246_v32 = vpop.xlane.xlu0 %245 }
 0x22d   :  { %v262_v33 = vmul.f32 0.03125, %v246_v32 }
 0x22f   :  { %v268_v35 = vadd.f32 1e-06, %v262_v33 }
 0x230   :  { %v249_v36 = vpop.xlane.xlu1 %248 }
 0x231   :  { %7705 = vrsqrt.f32 %v268_v35  ;;  %v263_v37 = vmul.f32 0.03125, %v249_v36 }
 0x233   :  { %v269_v39 = vadd.f32 1e-06, %v263_v37 }
 0x234   :  { %v252_v40 = vpop.xlane.xlu0 %251 }
 0x235   :  { %7707 = vrsqrt.f32 %v269_v39  ;;  %v264_v41 = vmul.f32 0.03125, %v252_v40 }
 0x237   :  { %v270_v44 = vadd.f32 1e-06, %v264_v41 }
 0x238   :  { %v255_v45 = vpop.xlane.xlu1 %254 }
 0x239   :  { %7709 = vrsqrt.f32 %v270_v44  ;;  %v265_v48 = vmul.f32 0.03125, %v255_v45 }
 0x23b   :  { %v7706_v50 = vpop.eup %7705  ;;  %v271_v51 = vadd.f32 1e-06, %v265_v48 }
 0x23c   :  { %v280_v53 = vmul.f32 %v7706_v50, %v8243_v4 }
 0x23d   :  { %7711 = vrsqrt.f32 %v271_v51 }
 0x23e   :  { %v290_v55 = vmul.f32 %v8306_v49, %v280_v53 }
 0x23f   :  { %v7708_v56 = vpop.eup %7707 }
 0x240   :  { %v281_v58 = vmul.f32 %v7708_v56, %v8248_v8  ;;  %v300_v59 = vadd.f32 %v8310_v54, %v290_v55  ;;  %v8327_v8 = vpop.f32.mrb[8].mxu0 }
 0x241   :  { %v188_v9 = vpop.f32.mrb[9].mxu0 }
 0x242   :  { %v291_v60 = vmul.f32 %v8306_v49, %v281_v58  ;;  %6592 = vmatprep.mubr.msk.f32.mxu0 %vm206_vm1, %v300_v59  ;;  %v8329_v10 = vpop.f32.mrb[10].mxu0 }
 0x243   :  { %v7710_v61 = vpop.eup %7709  ;;  %v193_v11 = vpop.f32.mrb[11].mxu0 }
 0x244   :  { %v301_v63 = vadd.f32 %v8310_v54, %v291_v60  ;;  %v282_v0 = vmul.f32 %v7710_v61, %v8254_v13  ;;  %v8334_v13 = vrot.slane %v205_v43, %v312_v12 }
 0x246   :  { %6593 = vmatmul.mubr.msk.f32.vlgmr.msra.gmra.mrb[12].mxu0 %vm206_vm1, %v301_v63  ;;  %v292_v1 = vmul.f32 %v8306_v49, %v282_v0 }
 0x247   :  { %v7712_v2 = vpop.eup %7711 }
 0x248   :  { %v302_v4 = vadd.f32 %v8310_v54, %v292_v1  ;;  %v283_v5 = vmul.f32 %v7712_v2, %v8260_v18 }
 0x24a   :  { %6595 = vmatprep.mubr.msk.f32.mxu0 %vm206_vm1, %v302_v4  ;;  %v293_v6 = vmul.f32 %v8306_v49, %v283_v5 }
 0x24c   :  { %v303_v7 = vadd.f32 %v8310_v54, %v293_v6 }
 0x24e   :  { %6596 = vmatmul.mubr.msk.f32.gmra.mrb[14].mxu0 %vm206_vm1, %v303_v7  ;;  %v44_v7 = vld [vmem:[%s10160_s2 + $0x28] sm:$0xff] }
 0x24f   :  { %v8407_v9 = vadd.f32 %v8329_v10, %v44_v7 }
 0x319   :  { %v6594_v14 = vpop.f32.mrb[12].mxu0 }
 0x31a   :  { %v8337_v15 = vadd.f32 %v6594_v14, %v8334_v13  ;;  %v398_v16 = vpop.f32.mrb[13].mxu0  ;;  %v222_v14 = vsel %vm206_vm1, %v8407_v9, 0.0 }
 0x31b   :  { %v8340_v17 = vadd.f32 %v398_v16, %v8334_v13  ;;  %v43_v16 = vld [vmem:[%s10160_s2 + $0x20] sm:$0xff]  ;;  %s8029_s2 = smov 56  }
 0x31d   :  { %v8344_v18 = vpack.i.bf16 %v8337_v15, %v8340_v17 }
 0x31f   :  { %7546 = vrot.lane.b32.xlu0 %v8344_v18, %s8022_s28 }
 0x321   :  { %v8350_v20 = vpop.f32.mrb[14].mxu0 }
 0x322   :  { %v408_v21 = vpop.f32.mrb[15].mxu0 }
 0x323   :  { %v8353_v22 = vadd.f32 %v408_v21, %v8334_v13  ;;  %v8418_v21 = vadd.f32 %v8327_v8, %v43_v16 }
 0x325   :  { %434 = vrot.lane.b32.xlu1 %v8353_v22, %s8022_s28  ;;  %v219_v10 = vsel %vm206_vm1, %v8418_v21, 0.0 }
 0x391   :  { %v7547_v23 = vpop.permute.xlu0 %7546 }
 0x392   :  { %v7549_v24 = vunpack.i.h.bf16 %v7547_v23  ;;  %v7548_v25 = vunpack.i.l.bf16 %v7547_v23 }
 0x394   :  { %v7304_v27 = vpack.c.bf16 %v7549_v24, %v7548_v25 }
 0x396   :  { %7306 = vmatpush3.bf16.xpose.msk.msra.mxu1 %vm8359_vm4, %v7304_v27 }
 0x397   :  { %6605 = vmatprep.subr.mxu1 %v8024_v19  ;;  %v435_v28 = vpop.permute.xlu1 %434 }
 0x39e   :  { %6606 = vmatpush3.xpose.msk.msra.mxu1 %vm436_vm3, %v435_v28 }
 0x39f   :  { %7307 = vmatprep.subr.bf16.mxu1 %v8021_v3 }
 0x3a1   :  { %6608 = vmatmul.mubr.msk.f32.vlgmr.msra.gmra.mrb[0].mxu1 %vm436_vm3, %v8340_v17 }
 0x3a2   :  { %6610 = vmatprep.mubr.msk.f32.mxu1 %vm8023_vm2, %v8024_v19 }
 0x3a5   :  { %6611 = vmatmul.mubr.msk.f32.gmra.mrb[2].mxu1 %vm436_vm3, %v8337_v15 }
 0x3a6   :  { %6613 = vmatprep.mubr.msk.f32.mxu1 %vm8023_vm2, %v8024_v19 }
 0x3a9   :  { %6614 = vmatmul.mubr.msk.f32.gmra.mrb[4].mxu1 %vm436_vm3, %v8353_v22 }
 0x3aa   :  { %6622 = vmatprep.mubr.msk.f32.mxu1 %vm8023_vm2, %v8024_v19 }
 0x474   :  { %v515_v32 = vpop.f32.mrb[0].mxu1 }
 0x475   :  { %v529_v33 = vmul.f32 0.35355338, %v515_v32  ;;  %v6609_v35 = vpop.f32.mrb[1].mxu1 }
 0x477   :  { %v532_v36 = vadd.f32 %v529_v33, %v8381_v31 }
 0x478   :  { %v520_v37 = vpop.f32.mrb[2].mxu1 }
 0x479   :  { %v530_v39 = vmul.f32 0.35355338, %v520_v37  ;;  %v6612_v40 = vpop.f32.mrb[3].mxu1  ;;  %v536_v41 = vsel %vm535_vm6, %v532_v36, -inf }
 0x47a   :  { %537 = vmax.xlane.f32.xlu1 %v536_v41 }
 0x47b   :  { %v533_v43 = vadd.f32 %v530_v39, %v8381_v31 }
 0x47c   :  { %v525_v44 = vpop.f32.mrb[4].mxu1 }
 0x47d   :  { %v531_v34 = vmul.f32 0.35355338, %v525_v44  ;;  %v6615_v45 = vpop.f32.mrb[5].mxu1  ;;  %v539_v48 = vsel %vm535_vm6, %v533_v43, -inf }
 0x47e   :  { %540 = vmax.xlane.f32.xlu0 %v539_v48 }
 0x47f   :  { %v534_v50 = vadd.f32 %v531_v34, %v8381_v31 }
 0x481   :  { %v542_v51 = vsel %vm535_vm6, %v534_v50, -inf }
 0x482   :  { %543 = vmax.xlane.f32.xlu0 %v542_v51 }
 0x507   :  { %v538_v53 = vpop.xlane.xlu1 %537 }
 0x508   :  { %v545_v55 = vsub.f32 %v532_v36, %v538_v53 }
 0x50a   :  { %v548_v56 = vmul.f32 1.442695, %v545_v55 }
 0x50b   :  { %v541_v58 = vpop.xlane.xlu0 %540 }
 0x50c   :  { %7713 = vpow2.f32 %v548_v56  ;;  %v546_v59 = vsub.f32 %v533_v43, %v541_v58 }
 0x50e   :  { %v550_v60 = vmul.f32 1.442695, %v546_v59 }
 0x50f   :  { %v544_v2 = vpop.xlane.xlu0 %543 }
 0x510   :  { %7715 = vpow2.f32 %v550_v60  ;;  %v547_v4 = vsub.f32 %v534_v50, %v544_v2 }
 0x512   :  { %v552_v5 = vmul.f32 1.442695, %v547_v4 }
 0x514   :  { %7717 = vpow2.f32 %v552_v5 }
 0x516   :  { %v7714_v61 = vpop.eup %7713 }
 0x517   :  { %v554_v63 = vsel %vm535_vm6, %v7714_v61, 0.0 }
 0x518   :  { %555 = vadd.xlane.f32.xlu1 %v554_v63 }
 0x51a   :  { %v7716_v0 = vpop.eup %7715 }
 0x51b   :  { %v557_v1 = vsel %vm535_vm6, %v7716_v0, 0.0 }
 0x51c   :  { %558 = vadd.xlane.f32.xlu0 %v557_v1 }
 0x51e   :  { %v7718_v6 = vpop.eup %7717 }
 0x51f   :  { %v560_v11 = vsel %vm535_vm6, %v7718_v6, 0.0 }
 0x529   :  { %573 = vrot.lane.b32.xlu1 %v8353_v22, %s8026_s29 }
 0x52d   :  { %7556 = vrot.lane.b32.xlu1 %v8344_v18, %s8027_s30 }
 0x531   :  { %677 = vrot.lane.b32.xlu1 %v8353_v22, %s8027_s30 }
 0x532   :  { %7551 = vrot.lane.b32.xlu0 %v8344_v18, %s8026_s29 }
 0x536   :  { %667 = vrot.lane.b32.xlu0 %v8340_v17, %s8028_s12 }
 0x53a   :  { %671 = vrot.lane.b32.xlu0 %v8353_v22, %s8028_s12 }
 0x555   :  { %561 = vadd.xlane.f32.xlu1 %v560_v11 }
 0x559   :  { %223 = vadd.xlane.f32.xlu0 %v222_v14 }
 0x566   :  { %669 = vrot.lane.b32.xlu1 %v8337_v15, %s8028_s12 }
 0x58a   :  { %220 = vadd.xlane.f32.xlu1 %v219_v10 }
 0x5a5   :  { %v556_v23 = vpop.xlane.xlu1 %555 }
 0x5a6   :  { %7719 = vrcp.f32 %v556_v23 }
 0x5a9   :  { %v559_v24 = vpop.xlane.xlu0 %558  ;;  %v574_v27 = vpop.permute.xlu1 %573 }
 0x5aa   :  { %7721 = vrcp.f32 %v559_v24 }
 0x5ad   :  { %v7552_v25 = vpop.permute.xlu0 %7551  ;;  %v7557_v33 = vpop.permute.xlu1 %7556 }
 0x5ae   :  { %v7554_v28 = vunpack.i.h.bf16 %v7552_v25  ;;  %v7553_v29 = vunpack.i.l.bf16 %v7552_v25  ;;  %v7559_v36 = vunpack.i.h.bf16 %v7557_v33  ;;  %v7558_v37 = vunpack.i.l.bf16 %v7557_v33 }
 0x5b0   :  { %v7308_v30 = vpack.c.bf16 %v7554_v28, %v7553_v29  ;;  %v7720_v32 = vpop.eup %7719  ;;  %v7311_v40 = vpack.c.bf16 %v7559_v36, %v7558_v37 }
 0x5b1   :  { %v566_v8 = vmul.f32 %v7720_v32, %v7714_v61  ;;  %v678_v41 = vpop.permute.xlu1 %677  ;;  %v668_v45 = vpop.permute.xlu0 %667 }
 0x5b2   :  { %7309 = vmatpush3.bf16.msra.mxu1 %v7308_v30 }
 0x5b3   :  { %6620 = vmatprep.subr.mxu1 %v8024_v19 }
 0x5b4   :  { %v7722_v35 = vpop.eup %7721 }
 0x5b5   :  { %v567_v39 = vmul.f32 %v7722_v35, %v7716_v0  ;;  %v672_v50 = vpop.permute.xlu0 %671 }
 0x5b6   :  { %6621 = vmatpush3.msra.mxu1 %v574_v27 }
 0x5b7   :  { %6623 = vmatmul.mubr.msk.f32.vlgmr.msra.gmra.mrb[6].mxu1 %vm535_vm6, %v566_v8  ;;  %7310 = vmatprep.subr.bf16.mxu1 %v8021_v3 }
 0x5b8   :  { %6625 = vmatprep.mubr.msk.f32.mxu1 %vm8023_vm2, %v8024_v19 }
 0x5bb   :  { %6626 = vmatmul.mubr.msk.f32.gmra.mrb[8].mxu1 %vm535_vm6, %v567_v39 }
 0x5bc   :  { %6628 = vmatprep.mubr.msk.f32.mxu1 %vm8023_vm2, %v8024_v19 }
 0x5bd   :  { %7313 = vmatpush3.bf16.xpose.msk.msra.mxu1 %vm8359_vm4, %v7311_v40 }
 0x5be   :  { %6635 = vmatprep.subr.mxu1 %v8024_v19 }
 0x5c5   :  { %6636 = vmatpush3.xpose.msk.msra.mxu1 %vm436_vm3, %v678_v41 }
 0x5c6   :  { %7314 = vmatprep.subr.bf16.mxu1 %v8021_v3 }
 0x5e2   :  { %v562_v43 = vpop.xlane.xlu1 %561 }
 0x5e3   :  { %7723 = vrcp.f32 %v562_v43 }
 0x5e6   :  { %v670_v48 = vpop.permute.xlu1 %669  ;;  %v224_v51 = vpop.xlane.xlu0 %223 }
 0x5e7   :  { %v231_v53 = vmul.f32 0.03125, %v224_v51 }
 0x5e9   :  { %v237_v58 = vsub.f32 %v8407_v9, %v231_v53 }
 0x5eb   :  { %v243_v63 = vmul.f32 %v237_v58, %v237_v58 }
 0x5ed   :  { %v7724_v44 = vpop.eup %7723  ;;  %v259_v0 = vsel %vm206_vm1, %v243_v63, 0.0 }
 0x5ee   :  { %v568_v34 = vmul.f32 %v7724_v44, %v7718_v6 }
 0x5f0   :  { %6629 = vmatmul.mubr.msk.f32.gmra.mrb[10].mxu1 %vm535_vm6, %v568_v34 }
 0x5f1   :  { %6637 = vmatprep.mubr.msk.f32.mxu1 %vm8023_vm2, %v8024_v19 }
 0x5f4   :  { %6638 = vmatmul.mubr.msk.f32.vlgmr.msra.gmra.mrb[12].mxu1 %vm436_vm3, %v668_v45 }
 0x5f5   :  { %6640 = vmatprep.mubr.msk.f32.mxu1 %vm8023_vm2, %v8024_v19 }
 0x5f8   :  { %6641 = vmatmul.mubr.msk.f32.gmra.mrb[14].mxu1 %vm436_vm3, %v670_v48 }
 0x5f9   :  { %6643 = vmatprep.mubr.msk.f32.mxu1 %vm8023_vm2, %v8024_v19 }
 0x5fc   :  { %6644 = vmatmul.mubr.msk.f32.gmra.mrb[16].mxu1 %vm436_vm3, %v672_v50 }
 0x5fd   :  { %6652 = vmatprep.mubr.msk.f32.mxu1 %vm8023_vm2, %v8024_v19 }
 0x617   :  { %v221_v55 = vpop.xlane.xlu1 %220 }
 0x618   :  { %v230_v56 = vmul.f32 0.03125, %v221_v55 }
 0x61a   :  { %v236_v59 = vsub.f32 %v8418_v21, %v230_v56 }
 0x61c   :  { %v242_v60 = vmul.f32 %v236_v59, %v236_v59 }
 0x61e   :  { %v256_v61 = vsel %vm206_vm1, %v242_v60, 0.0 }
 0x61f   :  { %257 = vadd.xlane.f32.xlu0 %v256_v61 }
 0x623   :  { %260 = vadd.xlane.f32.xlu0 %v259_v0 }
 0x68a   :  { %v8451_v1 = vpop.f32.mrb[6].mxu1 }
 0x68b   :  { %v6624_v2 = vpop.f32.mrb[7].mxu1 }
 0x68e   :  { %v8453_v4 = vpop.f32.mrb[8].mxu1 }
 0x68f   :  { %v6627_v5 = vpop.f32.mrb[9].mxu1 }
 0x6ac   :  { %v258_v6 = vpop.xlane.xlu0 %257 }
 0x6ad   :  { %v266_v7 = vmul.f32 0.03125, %v258_v6 }
 0x6af   :  { %v272_v11 = vadd.f32 1e-06, %v266_v7 }
 0x6b0   :  { %v261_v14 = vpop.xlane.xlu0 %260 }
 0x6b1   :  { %7725 = vrsqrt.f32 %v272_v11  ;;  %v267_v16 = vmul.f32 0.03125, %v261_v14 }
 0x6b3   :  { %v273_v10 = vadd.f32 1e-06, %v267_v16 }
 0x6b5   :  { %7727 = vrsqrt.f32 %v273_v10 }
 0x6bb   :  { %v7726_v23 = vpop.eup %7725 }
 0x6bc   :  { %v284_v24 = vmul.f32 %v7726_v23, %v236_v59 }
 0x6be   :  { %v294_v25 = vmul.f32 %v8306_v49, %v284_v24 }
 0x6bf   :  { %v7728_v27 = vpop.eup %7727 }
 0x6c0   :  { %v304_v28 = vadd.f32 %v8310_v54, %v294_v25  ;;  %v285_v29 = vmul.f32 %v7728_v27, %v237_v58  ;;  %v8500_v25 = vadd.f32 %v8350_v20, %v8334_v13 }
 0x6c2   :  { %6598 = vmatprep.mubr.msk.f32.mxu0 %vm206_vm1, %v304_v28  ;;  %v295_v30 = vmul.f32 %v8306_v49, %v285_v29 }
 0x6c3   :  { %v8459_v32 = vpop.f32.mrb[10].mxu1 }
 0x6c4   :  { %v6630_v33 = vpop.f32.mrb[11].mxu1  ;;  %v305_v8 = vadd.f32 %v8310_v54, %v295_v30 }
 0x6c6   :  { %6599 = vmatmul.mubr.msk.f32.gmra.mrb[16].mxu0 %vm206_vm1, %v305_v8 }
 0x6c7   :  { %v757_v35 = vpop.f32.mrb[12].mxu1  ;;  %6682 = vmatprep.mubr.msk.f32.mxu0 %vm8023_vm2, %v8024_v19 }
 0x6c8   :  { %v771_v36 = vmul.f32 0.35355338, %v757_v35  ;;  %v6639_v37 = vpop.f32.mrb[13].mxu1 }
 0x6ca   :  { %v774_v39 = vadd.f32 %v771_v36, %v8381_v31 }
 0x6cb   :  { %v762_v40 = vpop.f32.mrb[14].mxu1 }
 0x6cc   :  { %v772_v41 = vmul.f32 0.35355338, %v762_v40  ;;  %v6642_v43 = vpop.f32.mrb[15].mxu1  ;;  %v777_v49 = vsel %vm535_vm6, %v774_v39, -inf }
 0x6cd   :  { %778 = vmax.xlane.f32.xlu1 %v777_v49 }
 0x6ce   :  { %v775_v44 = vadd.f32 %v772_v41, %v8381_v31 }
 0x6cf   :  { %v767_v34 = vpop.f32.mrb[16].mxu1 }
 0x6d0   :  { %v773_v54 = vmul.f32 0.35355338, %v767_v34  ;;  %v6645_v45 = vpop.f32.mrb[17].mxu1  ;;  %v780_v48 = vsel %vm535_vm6, %v775_v44, -inf }
 0x6d1   :  { %781 = vmax.xlane.f32.xlu0 %v780_v48 }
 0x6d2   :  { %v776_v50 = vadd.f32 %v773_v54, %v8381_v31 }
 0x6d4   :  { %v783_v51 = vsel %vm535_vm6, %v776_v50, -inf }
 0x6d5   :  { %784 = vmax.xlane.f32.xlu1 %v783_v51 }
 0x6e6   :  { %7561 = vrot.lane.b32.xlu1 %v8344_v18, %s8029_s2 }
 0x6ea   :  { %7566 = vrot.lane.b32.xlu1 %v8344_v18, %s8030_s16 }
 0x6ee   :  { %918 = vrot.lane.b32.xlu1 %v8353_v22, %s8030_s16 }
 0x75a   :  { %v779_v53 = vpop.xlane.xlu1 %778 }
 0x75b   :  { %v786_v55 = vsub.f32 %v774_v39, %v779_v53 }
 0x75d   :  { %v789_v56 = vmul.f32 1.442695, %v786_v55 }
 0x75e   :  { %v782_v58 = vpop.xlane.xlu0 %781 }
 0x75f   :  { %7729 = vpow2.f32 %v789_v56  ;;  %v787_v59 = vsub.f32 %v775_v44, %v782_v58 }
 0x761   :  { %v791_v60 = vmul.f32 1.442695, %v787_v59 }
 0x762   :  { %v785_v61 = vpop.xlane.xlu1 %784 }
 0x763   :  { %7731 = vpow2.f32 %v791_v60  ;;  %v788_v16 = vsub.f32 %v776_v50, %v785_v61 }
 0x765   :  { %v793_v10 = vmul.f32 1.442695, %v788_v16 }
 0x766   :  { %v7562_v63 = vpop.permute.xlu1 %7561 }
 0x767   :  { %v7564_v0 = vunpack.i.h.bf16 %v7562_v63  ;;  %v7563_v2 = vunpack.i.l.bf16 %v7562_v63  ;;  %7733 = vpow2.f32 %v793_v10 }
 0x769   :  { %v8477_v5 = vpop.eup %7729  ;;  %v7315_v6 = vpack.c.bf16 %v7564_v0, %v7563_v2 }
 0x76a   :  { %v795_v7 = vsel %vm535_vm6, %v8477_v5, 0.0 }
 0x76b   :  { %796 = vadd.xlane.f32.xlu0 %v795_v7  ;;  %7316 = vmatpush3.bf16.msra.mxu1 %v7315_v6 }
 0x76c   :  { %6650 = vmatprep.subr.mxu1 %v8024_v19 }
 0x76d   :  { %v8482_v11 = vpop.eup %7731 }
 0x76e   :  { %v798_v14 = vsel %vm535_vm6, %v8482_v11, 0.0 }
 0x76f   :  { %799 = vadd.xlane.f32.xlu1 %v798_v14 }
 0x771   :  { %v8505_v28 = vpop.eup %7733 }
 0x772   :  { %v801_v30 = vsel %vm535_vm6, %v8505_v28, 0.0 }
 0x780   :  { %7571 = vrot.lane.b32.xlu1 %v8344_v18, %s8031_s17 }
 0x781   :  { %814 = vrot.lane.b32.xlu0 %v8353_v22, %s8029_s2 }
 0x784   :  { %910 = vrot.lane.b32.xlu1 %v8337_v15, %s8032_s18 }
 0x788   :  { %1159 = vrot.lane.b32.xlu1 %v8353_v22, %s8031_s17 }
 0x78c   :  { %1149 = vrot.lane.b32.xlu1 %v8340_v17, %s8033_s19 }
 0x790   :  { %1153 = vrot.lane.b32.xlu1 %v8353_v22, %s8033_s19 }
 0x799   :  { %v6600_v23 = vpop.f32.mrb[16].mxu0 }
 0x79a   :  { %v418_v24 = vpop.f32.mrb[17].mxu0  ;;  %v8520_v20 = vadd.f32 %v6600_v23, %v8334_v13 }
 0x79b   :  { %v8503_v27 = vadd.f32 %v418_v24, %v8334_v13  ;;  %v7567_v13 = vpop.permute.xlu1 %7566 }
 0x79c   :  { %v7569_v36 = vunpack.i.h.bf16 %v7567_v13  ;;  %v7568_v37 = vunpack.i.l.bf16 %v7567_v13 }
 0x79d   :  { %v8509_v29 = vpack.i.bf16 %v8503_v27, %v8500_v25 }
 0x79e   :  { %v7318_v40 = vpack.c.bf16 %v7569_v36, %v7568_v37 }
 0x79f   :  { %7581 = vrot.lane.b32.xlu1 %v8509_v29, %s8027_s30 }
 0x7a0   :  { %802 = vadd.xlane.f32.xlu0 %v801_v30 }
 0x7a3   :  { %7586 = vrot.lane.b32.xlu1 %v8509_v29, %s8030_s16 }
 0x7a7   :  { %1676 = vrot.lane.b32.xlu1 %v8503_v27, %s8028_s12 }
 0x7ab   :  { %1925 = vrot.lane.b32.xlu1 %v8520_v20, %s8030_s16 }
 0x7af   :  { %1915 = vrot.lane.b32.xlu1 %v8500_v25, %s8032_s18 }
 0x7b3   :  { %1919 = vrot.lane.b32.xlu1 %v8520_v20, %s8032_s18 }
 0x7b6   :  { %908 = vrot.lane.b32.xlu0 %v8340_v17, %s8032_s18 }
 0x7b7   :  { %2156 = vrot.lane.b32.xlu1 %v8500_v25, %s8033_s19 }
 0x7ba   :  { %912 = vrot.lane.b32.xlu0 %v8353_v22, %s8032_s18 }
 0x7bb   :  { %2160 = vrot.lane.b32.xlu1 %v8520_v20, %s8033_s19 }
 0x7be   :  { %7576 = vrot.lane.b32.xlu0 %v8509_v29, %s8022_s28 }
 0x7bf   :  { %7596 = vrot.lane.b32.xlu1 %v8344_v18, %s8034_s20 }
 0x7c2   :  { %1151 = vrot.lane.b32.xlu0 %v8337_v15, %s8033_s19  ;;  %v919_v15 = vpop.permute.xlu1 %918 }
 0x7c3   :  { %1296 = vrot.lane.b32.xlu1 %v8353_v22, %s8035_s21 }
 0x7c6   :  { %1443 = vrot.lane.b32.xlu0 %v8520_v20, %s8022_s28 }
 0x7ca   :  { %1684 = vrot.lane.b32.xlu0 %v8520_v20, %s8027_s30 }
 0x7ce   :  { %1674 = vrot.lane.b32.xlu0 %v8500_v25, %s8028_s12 }
 0x7d2   :  { %1678 = vrot.lane.b32.xlu0 %v8520_v20, %s8028_s12 }
 0x7d6   :  { %7591 = vrot.lane.b32.xlu0 %v8509_v29, %s8031_s17 }
 0x7da   :  { %1917 = vrot.lane.b32.xlu0 %v8503_v27, %s8032_s18 }
 0x7de   :  { %2166 = vrot.lane.b32.xlu0 %v8520_v20, %s8031_s17 }
 0x7e2   :  { %2158 = vrot.lane.b32.xlu0 %v8503_v27, %s8033_s19 }
 0x7e6   :  { %1055 = vrot.lane.b32.xlu0 %v8353_v22, %s8034_s20 }
 0x7ea   :  { %7601 = vrot.lane.b32.xlu0 %v8344_v18, %s8035_s21 }
 0x7ee   :  { %7606 = vrot.lane.b32.xlu0 %v8509_v29, %s8026_s29 }
 0x7f8   :  { %v797_v17 = vpop.xlane.xlu0 %796 }
 0x7f9   :  { %7735 = vrcp.f32 %v797_v17 }
 0x7fc   :  { %v815_v33 = vpop.permute.xlu0 %814  ;;  %v800_v8 = vpop.xlane.xlu1 %799 }
 0x7fd   :  { %7737 = vrcp.f32 %v800_v8  ;;  %6651 = vmatpush3.msra.mxu1 %v815_v33 }
 0x7fe   :  { %7317 = vmatprep.subr.bf16.mxu1 %v8021_v3 }
 0x800   :  { %v7572_v35 = vpop.permute.xlu1 %7571 }
 0x801   :  { %v7573_v14 = vunpack.i.l.bf16 %v7572_v35 }
 0x803   :  { %v7736_v22 = vpop.eup %7735 }
 0x804   :  { %v807_v39 = vmul.f32 %v7736_v22, %v8477_v5  ;;  %v911_v18 = vpop.permute.xlu1 %910 }
 0x806   :  { %6653 = vmatmul.mubr.msk.f32.vlgmr.msra.gmra.mrb[18].mxu1 %vm535_vm6, %v807_v39 }
 0x807   :  { %v7738_v41 = vpop.eup %7737  ;;  %7320 = vmatpush3.bf16.xpose.msk.msra.mxu1 %vm8359_vm4, %v7318_v40  ;;  %6655 = vmatprep.mubr.msk.f32.mxu1 %vm8023_vm2, %v8024_v19 }
 0x808   :  { %v1160_v43 = vpop.permute.xlu1 %1159  ;;  %v808_v49 = vmul.f32 %v7738_v41, %v8482_v11  ;;  %6665 = vmatprep.subr.mxu1 %v8024_v19  ;;  %v7574_v11 = vunpack.i.h.bf16 %v7572_v35 }
 0x80a   :  { %6656 = vmatmul.mubr.msk.f32.gmra.mrb[20].mxu1 %vm535_vm6, %v808_v49  ;;  %v7325_v10 = vpack.c.bf16 %v7574_v11, %v7573_v14 }
 0x80b   :  { %6658 = vmatprep.mubr.msk.f32.mxu1 %vm8023_vm2, %v8024_v19 }
 0x80c   :  { %v1150_v44 = vpop.permute.xlu1 %1149 }
 0x80f   :  { %6666 = vmatpush3.xpose.msk.msra.mxu1 %vm436_vm3, %v919_v15 }
 0x810   :  { %v1154_v34 = vpop.permute.xlu1 %1153  ;;  %7324 = vmatprep.subr.bf16.mxu1 %v8021_v3 }
 0x814   :  { %v7582_v54 = vpop.permute.xlu1 %7581 }
 0x815   :  { %v7584_v8 = vunpack.i.h.bf16 %v7582_v54  ;;  %v7583_v35 = vunpack.i.l.bf16 %v7582_v54 }
 0x817   :  { %v7339_v37 = vpack.c.bf16 %v7584_v8, %v7583_v35 }
 0x818   :  { %v8580_v45 = vpop.permute.xlu1 %7586 }
 0x81c   :  { %v8582_v48 = vpop.permute.xlu1 %1676 }
 0x820   :  { %v8584_v50 = vpop.permute.xlu1 %1925 }
 0x824   :  { %v8586_v51 = vpop.permute.xlu1 %1915 }
 0x828   :  { %v8588_v53 = vpop.permute.xlu1 %1919 }
 0x82c   :  { %v8590_v55 = vpop.permute.xlu1 %2156 }
 0x82d   :  { %v803_v56 = vpop.xlane.xlu0 %802 }
 0x82e   :  { %7739 = vrcp.f32 %v803_v56 }
 0x830   :  { %v8592_v58 = vpop.permute.xlu1 %2160 }
 0x831   :  { %v909_v59 = vpop.permute.xlu0 %908 }
 0x834   :  { %v7597_v60 = vpop.permute.xlu1 %7596 }
 0x835   :  { %v7599_v61 = vunpack.i.h.bf16 %v7597_v60  ;;  %v7598_v63 = vunpack.i.l.bf16 %v7597_v60  ;;  %v913_v0 = vpop.permute.xlu0 %912 }
 0x837   :  { %v7322_v2 = vpack.c.bf16 %v7599_v61, %v7598_v63 }
 0x838   :  { %v7740_v5 = vpop.eup %7739 }
 0x839   :  { %v7577_v6 = vpop.permute.xlu0 %7576  ;;  %7323 = vmatpush3.bf16.msra.mxu0 %v7322_v2  ;;  %v809_v7 = vmul.f32 %v7740_v5, %v8505_v28 }
 0x83a   :  { %6680 = vmatprep.subr.mxu0 %v8024_v19  ;;  %v7579_v28 = vunpack.i.h.bf16 %v7577_v6  ;;  %v7578_v30 = vunpack.i.l.bf16 %v7577_v6 }
 0x83b   :  { %6659 = vmatmul.mubr.msk.f32.gmra.mrb[22].mxu1 %vm535_vm6, %v809_v7 }
 0x83c   :  { %6667 = vmatprep.mubr.msk.f32.mxu1 %vm8023_vm2, %v8024_v19  ;;  %v7332_v15 = vpack.c.bf16 %v7579_v28, %v7578_v30 }
 0x83d   :  { %v1152_v16 = vpop.permute.xlu0 %1151 }
 0x83f   :  { %6668 = vmatmul.mubr.msk.f32.vlgmr.msra.gmra.mrb[24].mxu1 %vm436_vm3, %v909_v59 }
 0x840   :  { %7327 = vmatpush3.bf16.xpose.msk.msra.mxu1 %vm8359_vm4, %v7325_v10  ;;  %6670 = vmatprep.mubr.msk.f32.mxu1 %vm8023_vm2, %v8024_v19 }
 0x841   :  { %v1444_v23 = vpop.permute.xlu0 %1443  ;;  %6695 = vmatprep.subr.mxu1 %v8024_v19 }
 0x843   :  { %6671 = vmatmul.mubr.msk.f32.gmra.mrb[26].mxu1 %vm436_vm3, %v911_v18  ;;  %v7589_v18 = vunpack.i.h.bf16 %v8580_v45 }
 0x844   :  { %6673 = vmatprep.mubr.msk.f32.mxu1 %vm8023_vm2, %v8024_v19 }
 0x845   :  { %v1685_v24 = vpop.permute.xlu0 %1684 }
 0x847   :  { %6674 = vmatmul.mubr.msk.f32.gmra.mrb[28].mxu1 %vm436_vm3, %v913_v0 }
 0x848   :  { %6696 = vmatpush3.xpose.msk.msra.mxu1 %vm436_vm3, %v1160_v43  ;;  %6697 = vmatprep.mubr.msk.f32.mxu1 %vm8023_vm2, %v8024_v19 }
 0x849   :  { %v1675_v13 = vpop.permute.xlu0 %1674  ;;  %7331 = vmatprep.subr.bf16.mxu1 %v8021_v3 }
 0x84b   :  { %6698 = vmatmul.mubr.msk.f32.vlgmr.msra.gmra.mrb[30].mxu1 %vm436_vm3, %v1150_v44 }
 0x84c   :  { %7334 = vmatpush3.bf16.xpose.msk.msra.mxu1 %vm8359_vm4, %v7332_v15  ;;  %6700 = vmatprep.mubr.msk.f32.mxu1 %vm8023_vm2, %v8024_v19 }
 0x84d   :  { %v1679_v17 = vpop.permute.xlu0 %1678  ;;  %6725 = vmatprep.subr.mxu1 %v8024_v19 }
 0x84f   :  { %6701 = vmatmul.mubr.msk.f32.gmra.mrb[32].mxu1 %vm436_vm3, %v1152_v16 }
 0x850   :  { %6703 = vmatprep.mubr.msk.f32.mxu1 %vm8023_vm2, %v8024_v19 }
 0x851   :  { %v7592_v33 = vpop.permute.xlu0 %7591 }
 0x852   :  { %v7594_v41 = vunpack.i.h.bf16 %v7592_v33  ;;  %v7593_v43 = vunpack.i.l.bf16 %v7592_v33 }
 0x853   :  { %6704 = vmatmul.mubr.msk.f32.gmra.mrb[34].mxu1 %vm436_vm3, %v1154_v34 }
 0x854   :  { %6726 = vmatpush3.xpose.msk.msra.mxu1 %vm436_vm3, %v1444_v23  ;;  %6727 = vmatprep.mubr.msk.f32.mxu1 %vm8023_vm2, %v8024_v19  ;;  %v7353_v49 = vpack.c.bf16 %v7594_v41, %v7593_v43 }
 0x855   :  { %v1918_v36 = vpop.permute.xlu0 %1917  ;;  %7338 = vmatprep.subr.bf16.mxu1 %v8021_v3 }
 0x857   :  { %6728 = vmatmul.mubr.msk.f32.vlgmr.msra.gmra.mrb[36].mxu1 %vm436_vm3, %v8500_v25  ;;  %v7588_v25 = vunpack.i.l.bf16 %v8580_v45 }
 0x858   :  { %7341 = vmatpush3.bf16.xpose.msk.msra.mxu1 %vm8359_vm4, %v7339_v37  ;;  %6730 = vmatprep.mubr.msk.f32.mxu1 %vm8023_vm2, %v8024_v19 }
 0x859   :  { %v2167_v22 = vpop.permute.xlu0 %2166  ;;  %6755 = vmatprep.subr.mxu1 %v8024_v19 }
 0x85b   :  { %6731 = vmatmul.mubr.msk.f32.gmra.mrb[38].mxu1 %vm436_vm3, %v8503_v27  ;;  %v7346_v27 = vpack.c.bf16 %v7589_v18, %v7588_v25 }
 0x85c   :  { %6733 = vmatprep.mubr.msk.f32.mxu1 %vm8023_vm2, %v8024_v19 }
 0x85d   :  { %v2159_v39 = vpop.permute.xlu0 %2158 }
 0x85f   :  { %6734 = vmatmul.mubr.msk.f32.gmra.mrb[40].mxu1 %vm436_vm3, %v8520_v20 }
 0x860   :  { %6756 = vmatpush3.xpose.msk.msra.mxu1 %vm436_vm3, %v1685_v24  ;;  %6757 = vmatprep.mubr.msk.f32.mxu1 %vm8023_vm2, %v8024_v19 }
 0x861   :  { %v1056_v40 = vpop.permute.xlu0 %1055  ;;  %7345 = vmatprep.subr.bf16.mxu1 %v8021_v3 }
 0x862   :  { %6681 = vmatpush3.msra.mxu0 %v1056_v40 }
 0x863   :  { %6758 = vmatmul.mubr.msk.f32.vlgmr.msra.gmra.mrb[42].mxu1 %vm436_vm3, %v1675_v13  ;;  %7328 = vmatprep.subr.bf16.mxu0 %v8021_v3 }
 0x864   :  { %7348 = vmatpush3.bf16.xpose.msk.msra.mxu1 %vm8359_vm4, %v7346_v27  ;;  %6760 = vmatprep.mubr.msk.f32.mxu1 %vm8023_vm2, %v8024_v19 }
 0x865   :  { %6785 = vmatprep.subr.mxu1 %v8024_v19 }
 0x867   :  { %6761 = vmatmul.mubr.msk.f32.gmra.mrb[44].mxu1 %vm436_vm3, %v8582_v48 }
 0x868   :  { %6763 = vmatprep.mubr.msk.f32.mxu1 %vm8023_vm2, %v8024_v19 }
 0x86b   :  { %6764 = vmatmul.mubr.msk.f32.gmra.mrb[46].mxu1 %vm436_vm3, %v1679_v17 }
 0x86c   :  { %6786 = vmatpush3.xpose.msk.msra.mxu1 %vm436_vm3, %v8584_v50  ;;  %6787 = vmatprep.mubr.msk.f32.mxu1 %vm8023_vm2, %v8024_v19 }
 0x86d   :  { %7352 = vmatprep.subr.bf16.mxu1 %v8021_v3 }
 0x86f   :  { %6788 = vmatmul.mubr.msk.f32.vlgmr.msra.gmra.mrb[48].mxu1 %vm436_vm3, %v8586_v51 }
 0x870   :  { %7355 = vmatpush3.bf16.xpose.msk.msra.mxu1 %vm8359_vm4, %v7353_v49  ;;  %6790 = vmatprep.mubr.msk.f32.mxu1 %vm8023_vm2, %v8024_v19 }
 0x871   :  { %6815 = vmatprep.subr.mxu1 %v8024_v19 }
 0x873   :  { %6791 = vmatmul.mubr.msk.f32.gmra.mrb[50].mxu1 %vm436_vm3, %v1918_v36 }
 0x874   :  { %6793 = vmatprep.mubr.msk.f32.mxu1 %vm8023_vm2, %v8024_v19 }
 0x877   :  { %6794 = vmatmul.mubr.msk.f32.gmra.mrb[52].mxu1 %vm436_vm3, %v8588_v53 }
 0x878   :  { %6816 = vmatpush3.xpose.msk.msra.mxu1 %vm436_vm3, %v2167_v22  ;;  %6817 = vmatprep.mubr.msk.f32.mxu1 %vm8023_vm2, %v8024_v19 }
 0x87b   :  { %6818 = vmatmul.mubr.msk.f32.vlgmr.msra.gmra.mrb[54].mxu1 %vm436_vm3, %v8590_v55 }
 0x87c   :  { %6820 = vmatprep.mubr.msk.f32.mxu1 %vm8023_vm2, %v8024_v19 }
 0x87f   :  { %6821 = vmatmul.mubr.msk.f32.gmra.mrb[56].mxu1 %vm436_vm3, %v2159_v39 }
 0x880   :  { %6823 = vmatprep.mubr.msk.f32.mxu1 %vm8023_vm2, %v8024_v19 }
 0x883   :  { %6824 = vmatmul.mubr.msk.f32.gmra.mrb[58].mxu1 %vm436_vm3, %v8592_v58 }
 0x8d9   :  { %v8687_v44 = vpop.f32.mrb[18].mxu1 }
 0x8da   :  { %v6654_v34 = vpop.f32.mrb[19].mxu1 }
 0x8dd   :  { %v8689_v54 = vpop.f32.mrb[20].mxu1 }
 0x8de   :  { %v6657_v45 = vpop.f32.mrb[21].mxu1 }
 0x90e   :  { %v8691_v48 = vpop.f32.mrb[22].mxu1 }
 0x90f   :  { %v6660_v50 = vpop.f32.mrb[23].mxu1 }
 0x912   :  { %v998_v51 = vpop.f32.mrb[24].mxu1 }
 0x913   :  { %v1012_v53 = vmul.f32 0.35355338, %v998_v51  ;;  %v6669_v55 = vpop.f32.mrb[25].mxu1 }
 0x915   :  { %v8694_v56 = vadd.f32 %v1012_v53, %v8381_v31 }
 0x916   :  { %v1003_v59 = vpop.f32.mrb[26].mxu1 }
 0x917   :  { %v1013_v60 = vmul.f32 0.35355338, %v1003_v59  ;;  %v6672_v61 = vpop.f32.mrb[27].mxu1  ;;  %v1018_v58 = vsel %vm535_vm6, %v8694_v56, -inf }
 0x918   :  { %1019 = vmax.xlane.f32.xlu0 %v1018_v58 }
 0x919   :  { %v8699_v63 = vadd.f32 %v1013_v60, %v8381_v31 }
 0x91a   :  { %v1008_v0 = vpop.f32.mrb[28].mxu1 }
 0x91b   :  { %v1014_v2 = vmul.f32 0.35355338, %v1008_v0  ;;  %v6675_v5 = vpop.f32.mrb[29].mxu1  ;;  %v1021_v6 = vsel %vm535_vm6, %v8699_v63, -inf }
 0x91c   :  { %1022 = vmax.xlane.f32.xlu1 %v1021_v6 }
 0x91d   :  { %v8704_v7 = vadd.f32 %v1014_v2, %v8381_v31 }
 0x91e   :  { %v1239_v11 = vpop.f32.mrb[30].mxu1 }
 0x91f   :  { %v1253_v14 = vmul.f32 0.35355338, %v1239_v11  ;;  %v6699_v16 = vpop.f32.mrb[31].mxu1  ;;  %v1024_v10 = vsel %vm535_vm6, %v8704_v7, -inf }
 0x920   :  { %1025 = vmax.xlane.f32.xlu0 %v1024_v10 }
 0x921   :  { %v8709_v23 = vadd.f32 %v1253_v14, %v8381_v31 }
 0x922   :  { %v1244_v24 = vpop.f32.mrb[32].mxu1 }
 0x923   :  { %v1254_v28 = vmul.f32 0.35355338, %v1244_v24  ;;  %v6702_v30 = vpop.f32.mrb[33].mxu1  ;;  %v1259_v13 = vsel %vm535_vm6, %v8709_v23, -inf }
 0x924   :  { %1260 = vmax.xlane.f32.xlu0 %v1259_v13 }
 0x925   :  { %v8714_v15 = vadd.f32 %v1254_v28, %v8381_v31 }
 0x926   :  { %v1249_v17 = vpop.f32.mrb[34].mxu1 }
 0x927   :  { %v1255_v33 = vmul.f32 0.35355338, %v1249_v17  ;;  %v6705_v8 = vpop.f32.mrb[35].mxu1  ;;  %v1262_v35 = vsel %vm535_vm6, %v8714_v15, -inf }
 0x928   :  { %1263 = vmax.xlane.f32.xlu0 %v1262_v35 }
 0x929   :  { %v8719_v36 = vadd.f32 %v1255_v33, %v8381_v31 }
 0x92a   :  { %v1523_v37 = vpop.f32.mrb[36].mxu1 }
 0x92b   :  { %v1537_v22 = vmul.f32 0.35355338, %v1523_v37  ;;  %v6729_v39 = vpop.f32.mrb[37].mxu1  ;;  %v1265_v18 = vsel %vm535_vm6, %v8719_v36, -inf }
 0x92c   :  { %1266 = vmax.xlane.f32.xlu1 %v1265_v18 }
 0x92d   :  { %v8724_v25 = vadd.f32 %v1537_v22, %v8381_v31 }
 0x92e   :  { %v1528_v40 = vpop.f32.mrb[38].mxu1 }
 0x92f   :  { %v1538_v27 = vmul.f32 0.35355338, %v1528_v40  ;;  %v6732_v41 = vpop.f32.mrb[39].mxu1  ;;  %v1543_v43 = vsel %vm535_vm6, %v8724_v25, -inf }
 0x930   :  { %1544 = vmax.xlane.f32.xlu0 %v1543_v43 }
 0x931   :  { %v8729_v49 = vadd.f32 %v1538_v27, %v8381_v31 }
 0x932   :  { %v1533_v34 = vpop.f32.mrb[40].mxu1 }
 0x933   :  { %v1539_v45 = vmul.f32 0.35355338, %v1533_v34  ;;  %v6735_v50 = vpop.f32.mrb[41].mxu1  ;;  %v1546_v51 = vsel %vm535_vm6, %v8729_v49, -inf }
 0x934   :  { %1547 = vmax.xlane.f32.xlu1 %v1546_v51 }
 0x935   :  { %v8734_v53 = vadd.f32 %v1539_v45, %v8381_v31 }
 0x936   :  { %v1764_v55 = vpop.f32.mrb[42].mxu1 }
 0x937   :  { %v1778_v59 = vmul.f32 0.35355338, %v1764_v55  ;;  %v6759_v60 = vpop.f32.mrb[43].mxu1  ;;  %v1549_v61 = vsel %vm535_vm6, %v8734_v53, -inf }
 0x938   :  { %1550 = vmax.xlane.f32.xlu0 %v1549_v61 }
 0x939   :  { %v8739_v58 = vadd.f32 %v1778_v59, %v8381_v31 }
 0x93a   :  { %v1769_v0 = vpop.f32.mrb[44].mxu1 }
 0x93b   :  { %v1779_v2 = vmul.f32 0.35355338, %v1769_v0  ;;  %v6762_v5 = vpop.f32.mrb[45].mxu1  ;;  %v1784_v6 = vsel %vm535_vm6, %v8739_v58, -inf }
 0x93c   :  { %1785 = vmax.xlane.f32.xlu1 %v1784_v6 }
 0x93d   :  { %v8744_v11 = vadd.f32 %v1779_v2, %v8381_v31 }
 0x93e   :  { %v1774_v14 = vpop.f32.mrb[46].mxu1 }
 0x93f   :  { %v1780_v16 = vmul.f32 0.35355338, %v1774_v14  ;;  %v6765_v10 = vpop.f32.mrb[47].mxu1  ;;  %v1787_v24 = vsel %vm535_vm6, %v8744_v11, -inf }
 0x940   :  { %1788 = vmax.xlane.f32.xlu0 %v1787_v24 }
 0x941   :  { %v8749_v28 = vadd.f32 %v1780_v16, %v8381_v31 }
 0x942   :  { %v2005_v30 = vpop.f32.mrb[48].mxu1 }
 0x943   :  { %v2019_v13 = vmul.f32 0.35355338, %v2005_v30  ;;  %v6789_v17 = vpop.f32.mrb[49].mxu1  ;;  %v1790_v33 = vsel %vm535_vm6, %v8749_v28, -inf }
 0x944   :  { %1791 = vmax.xlane.f32.xlu1 %v1790_v33  ;;  %v8789_v33 = vpop.permute.xlu1 %1296 }
 0x945   :  { %v8754_v8 = vadd.f32 %v2019_v13, %v8381_v31  ;;  %v8785_v13 = vpop.permute.xlu0 %7601 }
 0x946   :  { %v2010_v35 = vpop.f32.mrb[50].mxu1 }
 0x947   :  { %v6792_v37 = vpop.f32.mrb[51].mxu1  ;;  %v2025_v22 = vsel %vm535_vm6, %v8754_v8, -inf  ;;  %v2020_v6 = vmul.f32 0.35355338, %v2010_v35 }
 0x948   :  { %2026 = vmax.xlane.f32.xlu0 %v2025_v22 }
 0x949   :  { %v8776_v16 = vadd.f32 %v2020_v6, %v8381_v31  ;;  %v8787_v17 = vpop.permute.xlu0 %7606 }
 0x94a   :  { %v2015_v39 = vpop.f32.mrb[52].mxu1 }
 0x94b   :  { %v2021_v18 = vmul.f32 0.35355338, %v2015_v39  ;;  %v6795_v40 = vpop.f32.mrb[53].mxu1  ;;  %v2028_v10 = vsel %vm535_vm6, %v8776_v16, -inf }
 0x94d   :  { %v8759_v27 = vadd.f32 %v2021_v18, %v8381_v31 }
 0x94e   :  { %v2246_v41 = vpop.f32.mrb[54].mxu1 }
 0x94f   :  { %v6819_v43 = vpop.f32.mrb[55].mxu1  ;;  %v2031_v34 = vsel %vm535_vm6, %v8759_v27, -inf  ;;  %v2260_v14 = vmul.f32 0.35355338, %v2246_v41 }
 0x950   :  { %2032 = vmax.xlane.f32.xlu0 %v2031_v34 }
 0x951   :  { %v8781_v24 = vadd.f32 %v2260_v14, %v8381_v31 }
 0x952   :  { %v2251_v45 = vpop.f32.mrb[56].mxu1 }
 0x953   :  { %v2261_v50 = vmul.f32 0.35355338, %v2251_v45  ;;  %v6822_v51 = vpop.f32.mrb[57].mxu1  ;;  %v2266_v30 = vsel %vm535_vm6, %v8781_v24, -inf }
 0x955   :  { %1580 = vrot.lane.b32.xlu1 %v8520_v20, %s8026_s29  ;;  %v8766_v55 = vadd.f32 %v2261_v50, %v8381_v31 }
 0x956   :  { %v2256_v59 = vpop.f32.mrb[58].mxu1 }
 0x957   :  { %v2262_v60 = vmul.f32 0.35355338, %v2256_v59  ;;  %v6825_v61 = vpop.f32.mrb[59].mxu1  ;;  %v2269_v0 = vsel %vm535_vm6, %v8766_v55, -inf }
 0x958   :  { %2270 = vmax.xlane.f32.xlu0 %v2269_v0 }
 0x959   :  { %v8771_v2 = vadd.f32 %v2262_v60, %v8381_v31 }
 0x95b   :  { %v2272_v5 = vsel %vm535_vm6, %v8771_v2, -inf }
 0x95c   :  { %2273 = vmax.xlane.f32.xlu0 %v2272_v5 }
 0x979   :  { %2029 = vmax.xlane.f32.xlu1 %v2028_v10 }
 0x97d   :  { %2267 = vmax.xlane.f32.xlu1 %v2266_v30 }
 0x9a5   :  { %v1020_v35 = vpop.xlane.xlu0 %1019 }
 0x9a6   :  { %v1027_v37 = vsub.f32 %v8694_v56, %v1020_v35 }
 0x9a8   :  { %v1030_v22 = vmul.f32 1.442695, %v1027_v37 }
 0x9a9   :  { %v1023_v39 = vpop.xlane.xlu1 %1022 }
 0x9aa   :  { %7741 = vpow2.f32 %v1030_v22  ;;  %v1028_v18 = vsub.f32 %v8699_v63, %v1023_v39 }
 0x9ac   :  { %v1032_v40 = vmul.f32 1.442695, %v1028_v18 }
 0x9ad   :  { %v1026_v41 = vpop.xlane.xlu0 %1025 }
 0x9ae   :  { %7743 = vpow2.f32 %v1032_v40  ;;  %v1029_v43 = vsub.f32 %v8704_v7, %v1026_v41 }
 0x9b0   :  { %v1034_v34 = vmul.f32 1.442695, %v1029_v43 }
 0x9b1   :  { %v1261_v45 = vpop.xlane.xlu0 %1260 }
 0x9b2   :  { %7745 = vpow2.f32 %v1034_v34  ;;  %v1268_v50 = vsub.f32 %v8709_v23, %v1261_v45 }
 0x9b4   :  { %v8795_v51 = vpop.eup %7741  ;;  %v1271_v59 = vmul.f32 1.442695, %v1268_v50 }
 0x9b5   :  { %v1264_v60 = vpop.xlane.xlu0 %1263  ;;  %v1036_v56 = vsel %vm535_vm6, %v8795_v51, 0.0 }
 0x9b6   :  { %7747 = vpow2.f32 %v1271_v59  ;;  %v1269_v63 = vsub.f32 %v8714_v15, %v1264_v60  ;;  %1037 = vadd.xlane.f32.xlu0 %v1036_v56 }
 0x9b8   :  { %v8800_v61 = vpop.eup %7743  ;;  %v1273_v0 = vmul.f32 1.442695, %v1269_v63 }
 0x9b9   :  { %v1267_v7 = vpop.xlane.xlu1 %1266  ;;  %v1039_v5 = vsel %vm535_vm6, %v8800_v61, 0.0 }
 0x9ba   :  { %7749 = vpow2.f32 %v1273_v0  ;;  %v1270_v23 = vsub.f32 %v8719_v36, %v1267_v7  ;;  %1040 = vadd.xlane.f32.xlu1 %v1039_v5 }
 0x9bc   :  { %v8805_v6 = vpop.eup %7745  ;;  %v1275_v14 = vmul.f32 1.442695, %v1270_v23 }
 0x9bd   :  { %v1545_v10 = vpop.xlane.xlu0 %1544  ;;  %v1042_v30 = vsel %vm535_vm6, %v8805_v6, 0.0 }
 0x9be   :  { %7751 = vpow2.f32 %v1275_v14  ;;  %v1552_v15 = vsub.f32 %v8724_v25, %v1545_v10  ;;  %1043 = vadd.xlane.f32.xlu1 %v1042_v30 }
 0x9c0   :  { %v8810_v35 = vpop.eup %7747  ;;  %v1555_v37 = vmul.f32 1.442695, %v1552_v15 }
 0x9c1   :  { %v1548_v22 = vpop.xlane.xlu1 %1547  ;;  %v1277_v39 = vsel %vm535_vm6, %v8810_v35, 0.0 }
 0x9c2   :  { %7753 = vpow2.f32 %v1555_v37  ;;  %v1553_v36 = vsub.f32 %v8729_v49, %v1548_v22  ;;  %1278 = vadd.xlane.f32.xlu1 %v1277_v39 }
 0x9c4   :  { %v8815_v18 = vpop.eup %7749  ;;  %v1557_v40 = vmul.f32 1.442695, %v1553_v36 }
 0x9c5   :  { %v1551_v41 = vpop.xlane.xlu0 %1550  ;;  %v1280_v43 = vsel %vm535_vm6, %v8815_v18, 0.0 }
 0x9c6   :  { %7755 = vpow2.f32 %v1557_v40  ;;  %v1554_v25 = vsub.f32 %v8734_v53, %v1551_v41  ;;  %1281 = vadd.xlane.f32.xlu0 %v1280_v43 }
 0x9c8   :  { %v8820_v34 = vpop.eup %7751  ;;  %v1559_v45 = vmul.f32 1.442695, %v1554_v25 }
 0x9c9   :  { %v1786_v50 = vpop.xlane.xlu1 %1785  ;;  %v1283_v59 = vsel %vm535_vm6, %v8820_v34, 0.0 }
 0x9ca   :  { %7757 = vpow2.f32 %v1559_v45  ;;  %v1793_v49 = vsub.f32 %v8739_v58, %v1786_v50  ;;  %1284 = vadd.xlane.f32.xlu0 %v1283_v59 }
 0x9cc   :  { %v8825_v60 = vpop.eup %7753  ;;  %v1796_v56 = vmul.f32 1.442695, %v1793_v49 }
 0x9cd   :  { %v1561_v63 = vsel %vm535_vm6, %v8825_v60, 0.0  ;;  %v1789_v30 = vpop.xlane.xlu0 %1788 }
 0x9ce   :  { %7759 = vpow2.f32 %v1796_v56  ;;  %1562 = vadd.xlane.f32.xlu0 %v1561_v63  ;;  %v1794_v15 = vsub.f32 %v8744_v11, %v1789_v30 }
 0x9d0   :  { %v8829_v53 = vpop.eup %7755  ;;  %v1798_v39 = vmul.f32 1.442695, %v1794_v15 }
 0x9d1   :  { %v1564_v0 = vsel %vm535_vm6, %v8829_v53, 0.0  ;;  %v1792_v14 = vpop.xlane.xlu1 %1791 }
 0x9d2   :  { %1565 = vadd.xlane.f32.xlu1 %v1564_v0  ;;  %v1795_v10 = vsub.f32 %v8749_v28, %v1792_v14 }
 0x9d4   :  { %v8833_v7 = vpop.eup %7757  ;;  %v1800_v37 = vmul.f32 1.442695, %v1795_v10 }
 0x9d5   :  { %v1567_v58 = vsel %vm535_vm6, %v8833_v7, 0.0  ;;  %v2027_v22 = vpop.xlane.xlu0 %2026  ;;  %v8852_v40 = vpop.permute.xlu1 %1580 }
 0x9d6   :  { %1568 = vadd.xlane.f32.xlu0 %v1567_v58  ;;  %7761 = vpow2.f32 %v1800_v37  ;;  %v2034_v36 = vsub.f32 %v8754_v8, %v2027_v22 }
 0x9d7   :  { %7763 = vpow2.f32 %v1798_v39 }
 0x9d8   :  { %v8837_v5 = vpop.eup %7759  ;;  %v2037_v41 = vmul.f32 1.442695, %v2034_v36 }
 0x9d9   :  { %v1802_v23 = vsel %vm535_vm6, %v8837_v5, 0.0 }
 0x9da   :  { %1803 = vadd.xlane.f32.xlu1 %v1802_v23  ;;  %7765 = vpow2.f32 %v2037_v41 }
 0x9dd   :  { %v2033_v43 = vpop.xlane.xlu0 %2032 }
 0x9de   :  { %v2036_v28 = vsub.f32 %v8759_v27, %v2033_v43 }
 0x9e0   :  { %v8856_v11 = vpop.eup %7761  ;;  %v2041_v56 = vmul.f32 1.442695, %v2036_v28 }
 0x9e1   :  { %v1808_v63 = vsel %vm535_vm6, %v8856_v11, 0.0  ;;  %v8861_v0 = vpop.eup %7763 }
 0x9e2   :  { %v1805_v27 = vsel %vm535_vm6, %v8861_v0, 0.0 }
 0x9e5   :  { %v2271_v37 = vpop.xlane.xlu0 %2270 }
 0x9e6   :  { %v2276_v36 = vsub.f32 %v8766_v55, %v2271_v37  ;;  %v7608_v37 = vunpack.i.l.bf16 %v8787_v17 }
 0x9e8   :  { %v2280_v43 = vmul.f32 1.442695, %v2276_v36 }
 0x9e9   :  { %v2274_v22 = vpop.xlane.xlu0 %2273 }
 0x9ea   :  { %v2277_v39 = vsub.f32 %v8771_v2, %v2274_v22 }
 0x9eb   :  { %7611 = vrot.lane.b32.xlu1 %v8509_v29, %s8029_s2 }
 0x9ec   :  { %1821 = vrot.lane.b32.xlu0 %v8520_v20, %s8029_s2  ;;  %v2282_v41 = vmul.f32 1.442695, %v2277_v39 }
 0x9f0   :  { %7616 = vrot.lane.b32.xlu0 %v8509_v29, %s8034_s20 }
 0x9f4   :  { %2062 = vrot.lane.b32.xlu0 %v8520_v20, %s8034_s20 }
 0xa06   :  { %v2030_v25 = vpop.xlane.xlu1 %2029 }
 0xa07   :  { %v2035_v45 = vsub.f32 %v8776_v16, %v2030_v25  ;;  %v8865_v16 = vpop.eup %7765 }
 0xa09   :  { %v2039_v50 = vmul.f32 1.442695, %v2035_v45 }
 0xa0a   :  { %v2268_v59 = vpop.xlane.xlu1 %2267 }
 0xa0b   :  { %v2275_v49 = vsub.f32 %v8781_v24, %v2268_v59  ;;  %7767 = vpow2.f32 %v2039_v50  ;;  %v2043_v24 = vsel %vm535_vm6, %v8865_v16, 0.0 }
 0xa0d   :  { %v2278_v8 = vmul.f32 1.442695, %v2275_v49 }
 0xa0f   :  { %7769 = vpow2.f32 %v2278_v8  ;;  %1809 = vadd.xlane.f32.xlu1 %v1808_v63 }
 0xa10   :  { %7771 = vpow2.f32 %v2041_v56 }
 0xa11   :  { %7773 = vpow2.f32 %v2282_v41 }
 0xa13   :  { %1806 = vadd.xlane.f32.xlu0 %v1805_v27 }
 0xa15   :  { %v8869_v58 = vpop.eup %7767 }
 0xa16   :  { %v2046_v10 = vsel %vm535_vm6, %v8869_v58, 0.0 }
 0xa17   :  { %2044 = vadd.xlane.f32.xlu0 %v2043_v24 }
 0xa19   :  { %v8871_v23 = vpop.eup %7769 }
 0xa1a   :  { %v2284_v14 = vsel %vm535_vm6, %v8871_v23, 0.0  ;;  %v8877_v30 = vpop.eup %7771 }
 0xa1b   :  { %2285 = vadd.xlane.f32.xlu1 %v2284_v14  ;;  %2047 = vadd.xlane.f32.xlu0 %v2046_v10  ;;  %v2049_v15 = vsel %vm535_vm6, %v8877_v30, 0.0  ;;  %v8887_v50 = vpop.eup %7773 }
 0xa1c   :  { %v2290_v49 = vsel %vm535_vm6, %v8887_v50, 0.0 }
 0xa1f   :  { %2050 = vadd.xlane.f32.xlu0 %v2049_v15  ;;  %v7609_v15 = vunpack.i.h.bf16 %v8787_v17 }
 0xa21   :  { %v7336_v39 = vpack.c.bf16 %v7609_v15, %v7608_v37 }
 0xa2c   :  { %2303 = vrot.lane.b32.xlu1 %v8520_v20, %s8035_s21  ;;  %v7604_v20 = vunpack.i.h.bf16 %v8785_v13 }
 0xa35   :  { %7621 = vrot.lane.b32.xlu0 %v8509_v29, %s8035_s21  ;;  %v7603_v29 = vunpack.i.l.bf16 %v8785_v13 }
 0xa37   :  { %v7329_v8 = vpack.c.bf16 %v7604_v20, %v7603_v29 }
 0xa43   :  { %v1038_v25 = vpop.xlane.xlu0 %1037 }
 0xa44   :  { %7775 = vrcp.f32 %v1038_v25 }
 0xa45   :  { %7777 = vpow2.f32 %v2280_v43 }
 0xa47   :  { %v1041_v45 = vpop.xlane.xlu1 %1040 }
 0xa48   :  { %7779 = vrcp.f32 %v1041_v45 }
 0xa4b   :  { %v1044_v28 = vpop.xlane.xlu1 %1043 }
 0xa4c   :  { %7781 = vrcp.f32 %v1044_v28 }
 0xa4e   :  { %v7776_v59 = vpop.eup %7775 }
 0xa4f   :  { %v1048_v2 = vmul.f32 %v7776_v59, %v8795_v51  ;;  %v1279_v55 = vpop.xlane.xlu1 %1278  ;;  %v8894_v56 = vpop.eup %7777 }
 0xa50   :  { %7783 = vrcp.f32 %v1279_v55  ;;  %2291 = vadd.xlane.f32.xlu1 %v2290_v49  ;;  %v2287_v51 = vsel %vm535_vm6, %v8894_v56, 0.0 }
 0xa51   :  { %6683 = vmatmul.mubr.msk.f32.vlgmr.msra.gmra.mrb[18].mxu0 %vm535_vm6, %v1048_v2 }
 0xa52   :  { %v7780_v63 = vpop.eup %7779  ;;  %7330 = vmatpush3.bf16.msra.mxu0 %v7329_v8  ;;  %6685 = vmatprep.mubr.msk.f32.mxu0 %vm8023_vm2, %v8024_v19 }
 0xa53   :  { %v1282_v13 = vpop.xlane.xlu0 %1281  ;;  %6710 = vmatprep.subr.mxu0 %v8024_v19  ;;  %v1049_v27 = vmul.f32 %v7780_v63, %v8800_v61 }
 0xa54   :  { %7785 = vrcp.f32 %v1282_v13  ;;  %2288 = vadd.xlane.f32.xlu0 %v2287_v51 }
 0xa55   :  { %6686 = vmatmul.mubr.msk.f32.gmra.mrb[20].mxu0 %vm535_vm6, %v1049_v27 }
 0xa56   :  { %v7782_v24 = vpop.eup %7781  ;;  %6711 = vmatpush3.msra.mxu0 %v8789_v33  ;;  %6688 = vmatprep.mubr.msk.f32.mxu0 %vm8023_vm2, %v8024_v19 }
 0xa57   :  { %v1285_v14 = vpop.xlane.xlu0 %1284  ;;  %v1050_v10 = vmul.f32 %v7782_v24, %v8805_v6  ;;  %7335 = vmatprep.subr.bf16.mxu0 %v8021_v3 }
 0xa58   :  { %7787 = vrcp.f32 %v1285_v14 }
 0xa59   :  { %6689 = vmatmul.mubr.msk.f32.gmra.mrb[22].mxu0 %vm535_vm6, %v1050_v10 }
 0xa5a   :  { %v7784_v61 = vpop.eup %7783  ;;  %6712 = vmatprep.mubr.msk.f32.mxu0 %vm8023_vm2, %v8024_v19 }
 0xa5b   :  { %v1289_v33 = vmul.f32 %v7784_v61, %v8810_v35  ;;  %v1563_v22 = vpop.xlane.xlu0 %1562 }
 0xa5c   :  { %7789 = vrcp.f32 %v1563_v22 }
 0xa5d   :  { %6713 = vmatmul.mubr.msk.f32.vlgmr.msra.gmra.mrb[24].mxu0 %vm535_vm6, %v1289_v33 }
 0xa5e   :  { %v7786_v6 = vpop.eup %7785  ;;  %7337 = vmatpush3.bf16.msra.mxu0 %v7336_v39  ;;  %6715 = vmatprep.mubr.msk.f32.mxu0 %vm8023_vm2, %v8024_v19 }
 0xa5f   :  { %v1566_v17 = vpop.xlane.xlu1 %1565  ;;  %6740 = vmatprep.subr.mxu0 %v8024_v19  ;;  %v1290_v36 = vmul.f32 %v7786_v6, %v8815_v18 }
 0xa60   :  { %7791 = vrcp.f32 %v1566_v17 }
 0xa61   :  { %1395 = vrot.lane.b32.xlu1 %v8689_v54, %s8036_s22  ;;  %6716 = vmatmul.mubr.msk.f32.gmra.mrb[26].mxu0 %vm535_vm6, %v1290_v36 }
 0xa62   :  { %v7788_v35 = vpop.eup %7787  ;;  %6741 = vmatpush3.msra.mxu0 %v8852_v40  ;;  %6718 = vmatprep.mubr.msk.f32.mxu0 %vm8023_vm2, %v8024_v19 }
 0xa63   :  { %v1569_v41 = vpop.xlane.xlu0 %1568  ;;  %v1291_v43 = vmul.f32 %v7788_v35, %v8820_v34  ;;  %7342 = vmatprep.subr.bf16.mxu0 %v8021_v3 }
 0xa64   :  { %7793 = vrcp.f32 %v1569_v41 }
 0xa65   :  { %6719 = vmatmul.mubr.msk.f32.gmra.mrb[28].mxu0 %vm535_vm6, %v1291_v43 }
 0xa66   :  { %v7790_v18 = vpop.eup %7789  ;;  %6742 = vmatprep.mubr.msk.f32.mxu0 %vm8023_vm2, %v8024_v19 }
 0xa67   :  { %v1573_v54 = vmul.f32 %v7790_v18, %v8825_v60  ;;  %v1804_v25 = vpop.xlane.xlu1 %1803  ;;  %v1822_v45 = vpop.permute.xlu0 %1821 }
 0xa68   :  { %7795 = vrcp.f32 %v1804_v25 }
 0xa69   :  { %6743 = vmatmul.mubr.msk.f32.vlgmr.msra.gmra.mrb[30].mxu0 %vm535_vm6, %v1573_v54 }
 0xa6a   :  { %v7792_v40 = vpop.eup %7791  ;;  %1393 = vrot.lane.b32.xlu0 %v8687_v44, %s8036_s22  ;;  %6745 = vmatprep.mubr.msk.f32.mxu0 %vm8023_vm2, %v8024_v19 }
 0xa6b   :  { %v7612_v34 = vpop.permute.xlu1 %7611  ;;  %v1574_v28 = vmul.f32 %v7792_v40, %v8829_v53  ;;  %v7617_v59 = vpop.permute.xlu0 %7616  ;;  %v2442_v40 = vld [vmem:[%s10162_s4] sm:$0xff] }
 0xa6c   :  { %v7614_v20 = vunpack.i.h.bf16 %v7612_v34  ;;  %v7613_v29 = vunpack.i.l.bf16 %v7612_v34  ;;  %v7619_v49 = vunpack.i.h.bf16 %v7617_v59  ;;  %v7618_v44 = vunpack.i.l.bf16 %v7617_v59  ;;  %v2443_v34 = vld [vmem:[%s10162_s4 + $0x8] sm:$0xff] }
 0xa6d   :  { %6746 = vmatmul.mubr.msk.f32.gmra.mrb[32].mxu0 %vm535_vm6, %v1574_v28  ;;  %v7359_v28 = vpack.c.bf16 %v2443_v34, %v2442_v40 }
 0xa6e   :  { %v7794_v60 = vpop.eup %7793  ;;  %v7343_v2 = vpack.c.bf16 %v7614_v20, %v7613_v29  ;;  %6748 = vmatprep.mubr.msk.f32.mxu0 %vm8023_vm2, %v8024_v19  ;;  %v7350_v63 = vpack.c.bf16 %v7619_v49, %v7618_v44  ;;  %v2444_v20 = vld [vmem:[%s10162_s4 + $0x10] sm:$0xff] }
 0xa6f   :  { %v1575_v55 = vmul.f32 %v7794_v60, %v8833_v7  ;;  %v2063_v7 = vpop.permute.xlu0 %2062  ;;  %7360 = vmatprep.subr.bf16.mxu1 %v7359_v28 }
 0xa70   :  { %7344 = vmatpush3.bf16.msra.mxu0 %v7343_v2  ;;  %7362 = vmatpush3.bf16.msra.mxu1 %v7359_v28 }
 0xa71   :  { %6749 = vmatmul.mubr.msk.f32.gmra.mrb[34].mxu0 %vm535_vm6, %v1575_v55  ;;  %6770 = vmatprep.subr.mxu0 %v8024_v19 }
 0xa72   :  { %v7796_v53 = vpop.eup %7795  ;;  %6772 = vmatprep.mubr.msk.f32.mxu0 %vm8023_vm2, %v8024_v19 }
 0xa73   :  { %v1814_v8 = vmul.f32 %v7796_v53, %v8837_v5 }
 0xa74   :  { %6771 = vmatpush3.msra.mxu0 %v1822_v45 }
 0xa75   :  { %6773 = vmatmul.mubr.msk.f32.vlgmr.msra.gmra.mrb[36].mxu0 %vm535_vm6, %v1814_v8  ;;  %7349 = vmatprep.subr.bf16.mxu0 %v8021_v3 }
 0xa76   :  { %7351 = vmatpush3.bf16.msra.mxu0 %v7350_v63  ;;  %6775 = vmatprep.mubr.msk.f32.mxu0 %vm8023_vm2, %v8024_v19 }
 0xa77   :  { %6800 = vmatprep.subr.mxu0 %v8024_v19 }
 0xa7a   :  { %6801 = vmatpush3.msra.mxu0 %v2063_v7 }
 0xa7b   :  { %7356 = vmatprep.subr.bf16.mxu0 %v8021_v3 }
 0xa9c   :  { %v1810_v13 = vpop.xlane.xlu1 %1809 }
 0xaa0   :  { %v1807_v51 = vpop.xlane.xlu0 %1806 }
 0xaa1   :  { %7797 = vrcp.f32 %v1807_v51 }
 0xaa2   :  { %7799 = vrcp.f32 %v1810_v13 }
 0xaa4   :  { %v2045_v5 = vpop.xlane.xlu0 %2044 }
 0xaa5   :  { %7801 = vrcp.f32 %v2045_v5 }
 0xaa8   :  { %v2048_v27 = vpop.xlane.xlu0 %2047  ;;  %v2286_v37 = vpop.xlane.xlu1 %2285 }
 0xaa9   :  { %7803 = vrcp.f32 %v2048_v27 }
 0xaab   :  { %v7798_v24 = vpop.eup %7797 }
 0xaac   :  { %v2051_v14 = vpop.xlane.xlu0 %2050  ;;  %v1815_v10 = vmul.f32 %v7798_v24, %v8861_v0  ;;  %v7800_v15 = vpop.eup %7799 }
 0xaad   :  { %7805 = vrcp.f32 %v2051_v14  ;;  %v1816_v33 = vmul.f32 %v7800_v15, %v8856_v11  ;;  %v2304_v41 = vpop.permute.xlu1 %2303 }
 0xaae   :  { %6776 = vmatmul.mubr.msk.f32.gmra.mrb[38].mxu0 %vm535_vm6, %v1815_v10  ;;  %7807 = vrcp.f32 %v2286_v37 }
 0xaaf   :  { %6778 = vmatprep.mubr.msk.f32.mxu0 %vm8023_vm2, %v8024_v19  ;;  %v7802_v22 = vpop.eup %7801 }
 0xab0   :  { %v7622_v61 = vpop.permute.xlu0 %7621  ;;  %v2055_v0 = vmul.f32 %v7802_v22, %v8865_v16 }
 0xab1   :  { %v7624_v39 = vunpack.i.h.bf16 %v7622_v61  ;;  %v7623_v6 = vunpack.i.l.bf16 %v7622_v61 }
 0xab2   :  { %6779 = vmatmul.mubr.msk.f32.gmra.mrb[40].mxu0 %vm535_vm6, %v1816_v33 }
 0xab3   :  { %v7357_v17 = vpack.c.bf16 %v7624_v39, %v7623_v6  ;;  %6802 = vmatprep.mubr.msk.f32.mxu0 %vm8023_vm2, %v8024_v19  ;;  %v7804_v36 = vpop.eup %7803 }
 0xab4   :  { %v2056_v11 = vmul.f32 %v7804_v36, %v8869_v58 }
 0xab6   :  { %6803 = vmatmul.mubr.msk.f32.vlgmr.msra.gmra.mrb[42].mxu0 %vm535_vm6, %v2055_v0 }
 0xab7   :  { %7358 = vmatpush3.bf16.msra.mxu0 %v7357_v17  ;;  %6805 = vmatprep.mubr.msk.f32.mxu0 %vm8023_vm2, %v8024_v19  ;;  %v7806_v35 = vpop.eup %7805 }
 0xab8   :  { %6830 = vmatprep.subr.mxu0 %v8024_v19  ;;  %v2057_v16 = vmul.f32 %v7806_v35, %v8877_v30  ;;  %v7808_v43 = vpop.eup %7807 }
 0xab9   :  { %v2296_v18 = vmul.f32 %v7808_v43, %v8871_v23 }
 0xaba   :  { %6806 = vmatmul.mubr.msk.f32.gmra.mrb[44].mxu0 %vm535_vm6, %v2056_v11 }
 0xabb   :  { %6831 = vmatpush3.msra.mxu0 %v2304_v41  ;;  %6808 = vmatprep.mubr.msk.f32.mxu0 %vm8023_vm2, %v8024_v19 }
 0xabe   :  { %6809 = vmatmul.mubr.msk.f32.gmra.mrb[46].mxu0 %vm535_vm6, %v2057_v16 }
 0xabf   :  { %6832 = vmatprep.mubr.msk.f32.mxu0 %vm8023_vm2, %v8024_v19 }
 0xac2   :  { %6833 = vmatmul.mubr.msk.f32.vlgmr.msra.gmra.mrb[48].mxu0 %vm535_vm6, %v2296_v18 }
 0xac3   :  { %6835 = vmatprep.mubr.msk.f32.mxu0 %vm8023_vm2, %v8024_v19 }
 0xadd   :  { %v2292_v58 = vpop.xlane.xlu1 %2291 }
 0xae1   :  { %v2289_v54 = vpop.xlane.xlu0 %2288 }
 0xae2   :  { %7809 = vrcp.f32 %v2289_v54  ;;  %v1396_v54 = vpop.permute.xlu1 %1395 }
 0xae3   :  { %7811 = vrcp.f32 %v2292_v58 }
 0xae5   :  { %v1394_v35 = vpop.permute.xlu0 %1393 }
 0xae6   :  { %v1426_v58 = vsel %vm436_vm3, %v8451_v1, %v1394_v35 }
 0xaec   :  { %v7810_v25 = vpop.eup %7809 }
 0xaed   :  { %v2297_v30 = vmul.f32 %v7810_v25, %v8894_v56  ;;  %v7812_v45 = vpop.eup %7811 }
 0xaee   :  { %v2298_v23 = vmul.f32 %v7812_v45, %v8887_v50  ;;  %v2445_v50 = vld [vmem:[%s10162_s4 + $0x18] sm:$0xff] }
 0xaef   :  { %6836 = vmatmul.mubr.msk.f32.gmra.mrb[50].mxu0 %vm535_vm6, %v2297_v30  ;;  %v7363_v59 = vpack.c.bf16 %v2445_v50, %v2444_v20 }
 0xaf0   :  { %6838 = vmatprep.mubr.msk.f32.mxu0 %vm8023_vm2, %v8024_v19 }
 0xaf1   :  { %7364 = vmatprep.subr.bf16.mxu1 %v7363_v59 }
 0xaf2   :  { %7366 = vmatpush3.bf16.msra.mxu1 %v7363_v59 }
 0xaf3   :  { %6839 = vmatmul.mubr.msk.f32.gmra.mrb[52].mxu0 %vm535_vm6, %v2298_v23  ;;  %v1427_v23 = vsel %vm436_vm3, %v8453_v4, %v1396_v54 }
 0xb24   :  { %v1135_v56 = vpop.f32.mrb[18].mxu0 }
 0xb25   :  { %1405 = vrot.lane.b32.xlu0 %v1135_v56, %s8037_s15  ;;  %v6684_v29 = vpop.f32.mrb[19].mxu0 }
 0xb28   :  { %v1140_v60 = vpop.f32.mrb[20].mxu0 }
 0xb29   :  { %1407 = vrot.lane.b32.xlu0 %v1140_v60, %s8037_s15  ;;  %v6687_v2 = vpop.f32.mrb[21].mxu0 }
 0xb2c   :  { %v1145_v55 = vpop.f32.mrb[22].mxu0 }
 0xb2d   :  { %1409 = vrot.lane.b32.xlu1 %v1145_v55, %s8037_s15  ;;  %v6690_v49 = vpop.f32.mrb[23].mxu0 }
 0xb30   :  { %v1376_v44 = vpop.f32.mrb[24].mxu0 }
 0xb31   :  { %1417 = vrot.lane.b32.xlu0 %v1376_v44, %s8038_s1  ;;  %v6714_v53 = vpop.f32.mrb[25].mxu0 }
 0xb34   :  { %v1381_v8 = vpop.f32.mrb[26].mxu0 }
 0xb35   :  { %1419 = vrot.lane.b32.xlu0 %v1381_v8, %s8038_s1  ;;  %v6717_v63 = vpop.f32.mrb[27].mxu0 }
 0xb38   :  { %v1386_v7 = vpop.f32.mrb[28].mxu0 }
 0xb39   :  { %1397 = vrot.lane.b32.xlu0 %v8691_v48, %s8036_s22  ;;  %1421 = vrot.lane.b32.xlu1 %v1386_v7, %s8038_s1  ;;  %v6720_v13 = vpop.f32.mrb[29].mxu0 }
 0xb3c   :  { %v1660_v51 = vpop.f32.mrb[30].mxu0 }
 0xb3d   :  { %v6744_v5 = vpop.f32.mrb[31].mxu0 }
 0xb40   :  { %v9004_v27 = vpop.f32.mrb[32].mxu0 }
 0xb41   :  { %v6747_v24 = vpop.f32.mrb[33].mxu0 }
 0xb44   :  { %v9006_v14 = vpop.f32.mrb[34].mxu0 }
 0xb45   :  { %v6750_v10 = vpop.f32.mrb[35].mxu0 }
 0xb48   :  { %v1901_v15 = vpop.f32.mrb[36].mxu0 }
 0xb49   :  { %2400 = vrot.lane.b32.xlu0 %v1901_v15, %s8036_s22  ;;  %v6774_v37 = vpop.f32.mrb[37].mxu0 }
 0xb81   :  { %v1906_v61 = vpop.f32.mrb[38].mxu0 }
 0xb82   :  { %v6777_v33 = vpop.f32.mrb[39].mxu0 }
 0xb85   :  { %v1911_v22 = vpop.f32.mrb[40].mxu0 }
 0xb86   :  { %v6780_v39 = vpop.f32.mrb[41].mxu0 }
 0xb89   :  { %v2142_v48 = vpop.f32.mrb[42].mxu0 }
 0xb8a   :  { %2412 = vrot.lane.b32.xlu0 %v2142_v48, %s8037_s15  ;;  %v6804_v6 = vpop.f32.mrb[43].mxu0  ;;  %v9050_v48 = vld [vmem:[%s10165_s7] sm:$0xff] }
 0xb8d   :  { %v2147_v17 = vpop.f32.mrb[44].mxu0 }
 0xb8e   :  { %2402 = vrot.lane.b32.xlu0 %v1906_v61, %s8036_s22  ;;  %v6807_v0 = vpop.f32.mrb[45].mxu0 }
 0xb91   :  { %v2152_v36 = vpop.f32.mrb[46].mxu0 }
 0xb92   :  { %2414 = vrot.lane.b32.xlu0 %v2147_v17, %s8037_s15  ;;  %v6810_v11 = vpop.f32.mrb[47].mxu0 }
 0xb95   :  { %v2383_v41 = vpop.f32.mrb[48].mxu0 }
 0xb96   :  { %2424 = vrot.lane.b32.xlu1 %v2383_v41, %s8038_s1  ;;  %v6834_v16 = vpop.f32.mrb[49].mxu0 }
 0xb97   :  { %v1406_v43 = vpop.permute.xlu0 %1405 }
 0xb98   :  { %v1430_v25 = vsel %vm1429_vm7, %v1426_v58, %v1406_v43 }
 0xb9a   :  { %2404 = vrot.lane.b32.xlu1 %v1911_v22, %s8036_s22 }
 0xb9b   :  { %v1408_v18 = vpop.permute.xlu0 %1407 }
 0xb9c   :  { %v1431_v40 = vsel %vm1429_vm7, %v1427_v23, %v1408_v18 }
 0xb9e   :  { %2416 = vrot.lane.b32.xlu1 %v2152_v36, %s8037_s15 }
 0xb9f   :  { %v1410_v56 = vpop.permute.xlu1 %1409 }
 0xba3   :  { %v1418_v30 = vpop.permute.xlu0 %1417 }
 0xba4   :  { %v1433_v45 = vsel %vm535_vm6, %v1430_v25, %v1418_v30 }
 0xba5   :  { %6849 = vmatprep.mubr.msk.f32.mxu1 %vm206_vm1, %v1433_v45 }
 0xba7   :  { %v1420_v34 = vpop.permute.xlu0 %1419 }
 0xba8   :  { %v1434_v28 = vsel %vm535_vm6, %v1431_v40, %v1420_v34 }
 0xba9   :  { %6850 = vmatmul.mubr.msk.f32.vlgmr.msra.gmra.mrb[60].mxu1 %vm206_vm1, %v1434_v28 }
 0xbab   :  { %v1398_v1 = vpop.permute.xlu0 %1397  ;;  %v1422_v50 = vpop.permute.xlu1 %1421 }
 0xbac   :  { %v1428_v20 = vsel %vm436_vm3, %v8459_v32, %v1398_v1 }
 0xbad   :  { %v1432_v29 = vsel %vm1429_vm7, %v1428_v20, %v1410_v56 }
 0xbae   :  { %v1435_v59 = vsel %vm535_vm6, %v1432_v29, %v1422_v50 }
 0xbaf   :  { %6852 = vmatprep.mubr.msk.f32.mxu1 %vm206_vm1, %v1435_v59 }
 0xbbb   :  { %v2401_v49 = vpop.permute.xlu0 %2400 }
 0xbbc   :  { %v2433_v53 = vsel %vm436_vm3, %v1660_v51, %v2401_v49  ;;  %v2674_v49 = vld [vmem:[%s10163_s5 + $0x8] sm:$0xff] }
 0xbc2   :  { %v2388_v4 = vpop.f32.mrb[50].mxu0 }
 0xbc3   :  { %2426 = vrot.lane.b32.xlu0 %v2388_v4, %s8038_s1  ;;  %v6837_v60 = vpop.f32.mrb[51].mxu0 }
 0xbc6   :  { %v2393_v2 = vpop.f32.mrb[52].mxu0 }
 0xbc7   :  { %2428 = vrot.lane.b32.xlu1 %v2393_v2, %s8038_s1  ;;  %v6840_v55 = vpop.f32.mrb[53].mxu0 }
 0xbc8   :  { %v2673_v55 = vld [vmem:[%s10163_s5] sm:$0xff] }
 0xbfc   :  { %v2413_v44 = vpop.permute.xlu0 %2412 }
 0xbfd   :  { %v2436_v32 = vsel %vm1429_vm7, %v2433_v53, %v2413_v44  ;;  %v7367_v44 = vpack.c.bf16 %v2674_v49, %v2673_v55  ;;  %v2675_v53 = vld [vmem:[%s10163_s5 + $0x10] sm:$0xff] }
 0xbff   :  { %7368 = vmatprep.subr.bf16.mxu0 %v7367_v44 }
 0xc00   :  { %v2403_v7 = vpop.permute.xlu0 %2402  ;;  %7370 = vmatpush3.bf16.msra.mxu0 %v7367_v44 }
 0xc01   :  { %v2434_v24 = vsel %vm436_vm3, %v9004_v27, %v2403_v7  ;;  %v2567_v27 = vsub.s32 5, %v8294_v38 }
 0xc03   :  { %v2568_v6 = vrot.slane %v9050_v48, %v2567_v27 }
 0xc04   :  { %v2415_v5 = vpop.permute.xlu0 %2414 }
 0xc05   :  { %v2437_v10 = vsel %vm1429_vm7, %v2434_v24, %v2415_v5 }
 0xc08   :  { %v2425_v8 = vpop.permute.xlu1 %2424 }
 0xc09   :  { %v2439_v63 = vsel %vm535_vm6, %v2436_v32, %v2425_v8  ;;  %v2676_v32 = vld [vmem:[%s10163_s5 + $0x18] sm:$0xff] }
 0xc0a   :  { %6853 = vmatmul.mubr.msk.f32.gmra.mrb[62].mxu1 %vm206_vm1, %v2439_v63  ;;  %v7371_v8 = vpack.c.bf16 %v2676_v32, %v2675_v53 }
 0xc0c   :  { %v2405_v13 = vpop.permute.xlu1 %2404  ;;  %7372 = vmatprep.subr.bf16.mxu0 %v7371_v8 }
 0xc0d   :  { %v2435_v51 = vsel %vm436_vm3, %v9006_v14, %v2405_v13  ;;  %7374 = vmatpush3.bf16.msra.mxu0 %v7371_v8 }
 0xc10   :  { %v2417_v15 = vpop.permute.xlu1 %2416 }
 0xc11   :  { %v2438_v33 = vsel %vm1429_vm7, %v2435_v51, %v2417_v15 }
 0xc35   :  { %v2427_v37 = vpop.permute.xlu0 %2426 }
 0xc36   :  { %v2440_v61 = vsel %vm535_vm6, %v2437_v10, %v2427_v37 }
 0xc37   :  { %6855 = vmatprep.mubr.msk.f32.mxu1 %vm206_vm1, %v2440_v61 }
 0xc39   :  { %v2429_v22 = vpop.permute.xlu1 %2428 }
 0xc3a   :  { %v2441_v39 = vsel %vm535_vm6, %v2438_v33, %v2429_v22 }
 0xc3b   :  { %6856 = vmatmul.mubr.msk.f32.gmra.mrb[64].mxu1 %vm206_vm1, %v2441_v39 }
 0xc7c   :  { %v6851_v17 = vpop.f32.mrb[60].mxu1 }
 0xc7d   :  { %v2560_v14 = vadd.f32 %v6851_v17, %v8224_v52  ;;  %v2530_v0 = vpop.f32.mrb[61].mxu1 }
 0xc7e   :  { %v2559_v36 = vadd.f32 %v2530_v0, %v8217_v47 }
 0xc7f   :  { %v9057_v11 = vadd.f32 %v2568_v6, %v2560_v14 }
 0xc80   :  { %v9059_v35 = vadd.f32 %v2568_v6, %v2559_v36 }
 0xc81   :  { %v2578_v41 = vsel %vm206_vm1, %v9057_v11, 0.0 }
 0xc82   :  { %2579 = vadd.xlane.f32.xlu1 %v2578_v41  ;;  %v2575_v16 = vsel %vm206_vm1, %v9059_v35, 0.0 }
 0xc83   :  { %2576 = vadd.xlane.f32.xlu0 %v2575_v16 }
 0xcdd   :  { %v6854_v43 = vpop.f32.mrb[62].mxu1 }
 0xcde   :  { %v2540_v18 = vpop.f32.mrb[63].mxu1  ;;  %v2562_v58 = vadd.f32 %v6854_v43, %v8238_v62 }
 0xcdf   :  { %v2561_v52 = vadd.f32 %v2540_v18, %v8231_v57 }
 0xce0   :  { %v9069_v47 = vadd.f32 %v2568_v6, %v2562_v58 }
 0xce1   :  { %v9067_v54 = vadd.f32 %v2568_v6, %v2561_v52 }
 0xce2   :  { %v2584_v30 = vsel %vm206_vm1, %v9069_v47, 0.0 }
 0xce3   :  { %v2581_v25 = vsel %vm206_vm1, %v9067_v54, 0.0 }
 0xce4   :  { %2582 = vadd.xlane.f32.xlu0 %v2581_v25 }
 0xce8   :  { %2585 = vadd.xlane.f32.xlu0 %v2584_v30 }
 0xd0e   :  { %v6857_v45 = vpop.f32.mrb[64].mxu1 }
 0xd0f   :  { %v2564_v23 = vadd.f32 %v6857_v45, %v8407_v9  ;;  %v2580_v40 = vpop.xlane.xlu1 %2579  ;;  %v2550_v34 = vpop.f32.mrb[65].mxu1  ;;  %v2655_v45 = vsub.s32 2, %v8294_v38 }
 0xd10   :  { %v2594_v62 = vmul.f32 0.03125, %v2580_v40  ;;  %v2563_v57 = vadd.f32 %v2550_v34, %v8418_v21  ;;  %v2577_v28 = vpop.xlane.xlu0 %2576 }
 0xd11   :  { %v9077_v56 = vadd.f32 %v2568_v6, %v2564_v23  ;;  %v2593_v1 = vmul.f32 0.03125, %v2577_v28  ;;  %v2665_v23 = vsub.s32 3, %v8294_v38  ;;  %v9122_v40 = vrot.slane %v9050_v48, %v2655_v45 }
 0xd12   :  { %v2600_v20 = vsub.f32 %v9057_v11, %v2594_v62  ;;  %v9080_v50 = vadd.f32 %v2568_v6, %v2563_v57 }
 0xd13   :  { %v2599_v29 = vsub.f32 %v9059_v35, %v2593_v1  ;;  %v2590_v59 = vsel %vm206_vm1, %v9077_v56, 0.0  ;;  %v9127_v1 = vrot.slane %v9050_v48, %v2665_v23 }
 0xd14   :  { %2591 = vadd.xlane.f32.xlu0 %v2590_v59  ;;  %v2587_v9 = vsel %vm206_vm1, %v9080_v50, 0.0  ;;  %v2606_v4 = vmul.f32 %v2600_v20, %v2600_v20 }
 0xd15   :  { %2588 = vadd.xlane.f32.xlu1 %v2587_v9  ;;  %v2605_v21 = vmul.f32 %v2599_v29, %v2599_v29 }
 0xd16   :  { %v2614_v60 = vsel %vm206_vm1, %v2606_v4, 0.0 }
 0xd17   :  { %v2611_v2 = vsel %vm206_vm1, %v2605_v21, 0.0 }
 0xd18   :  { %2615 = vadd.xlane.f32.xlu0 %v2614_v60 }
 0xd19   :  { %2612 = vadd.xlane.f32.xlu1 %v2611_v2 }
 0xd71   :  { %v2583_v63 = vpop.xlane.xlu0 %2582 }
 0xd72   :  { %v2595_v7 = vmul.f32 0.03125, %v2583_v63 }
 0xd74   :  { %v2601_v13 = vsub.f32 %v9067_v54, %v2595_v7 }
 0xd75   :  { %v2586_v5 = vpop.xlane.xlu0 %2585 }
 0xd76   :  { %v2596_v24 = vmul.f32 0.03125, %v2586_v5  ;;  %v2607_v10 = vmul.f32 %v2601_v13, %v2601_v13 }
 0xd78   :  { %v2602_v15 = vsub.f32 %v9069_v47, %v2596_v24  ;;  %v2617_v37 = vsel %vm206_vm1, %v2607_v10, 0.0  ;;  %v2950_v10 = vld [vmem:[%s10164_s6] sm:$0xff] }
 0xd79   :  { %2618 = vadd.xlane.f32.xlu1 %v2617_v37 }
 0xd7a   :  { %v2608_v61 = vmul.f32 %v2602_v15, %v2602_v15 }
 0xd7c   :  { %v2620_v51 = vsel %vm206_vm1, %v2608_v61, 0.0  ;;  %v2953_v61 = vld [vmem:[%s10164_s6 + $0x18] sm:$0xff] }
 0xd7d   :  { %2621 = vadd.xlane.f32.xlu0 %v2620_v51 }
 0xda1   :  { %v2592_v33 = vpop.xlane.xlu0 %2591 }
 0xda2   :  { %v2598_v22 = vmul.f32 0.03125, %v2592_v33  ;;  %v2589_v39 = vpop.xlane.xlu1 %2588  ;;  %v2954_v33 = vld [vmem:[%s10164_s6 + $0x20] sm:$0xff] }
 0xda3   :  { %v2597_v6 = vmul.f32 0.03125, %v2589_v39 }
 0xda4   :  { %v9106_v17 = vsub.f32 %v9077_v56, %v2598_v22  ;;  %v2955_v22 = vld [vmem:[%s10164_s6 + $0x28] sm:$0xff] }
 0xda5   :  { %v9109_v14 = vsub.f32 %v9080_v50, %v2597_v6  ;;  %v2616_v0 = vpop.xlane.xlu0 %2615  ;;  %v7383_v39 = vpack.c.bf16 %v2955_v22, %v2954_v33  ;;  %v2956_v6 = vld [vmem:[%s10164_s6 + $0x30] sm:$0xff] }
 0xda6   :  { %v2630_v36 = vmul.f32 0.03125, %v2616_v0  ;;  %v2613_v41 = vpop.xlane.xlu1 %2612  ;;  %v2610_v16 = vmul.f32 %v9106_v17, %v9106_v17  ;;  %v2957_v0 = vld [vmem:[%s10164_s6 + $0x38] sm:$0xff] }
 0xda7   :  { %v2629_v43 = vmul.f32 0.03125, %v2613_v41  ;;  %v2609_v18 = vmul.f32 %v9109_v14, %v9109_v14  ;;  %v2958_v41 = vld [vmem:[%s10164_s6 + $0x40] sm:$0xff] }
 0xda8   :  { %v2636_v58 = vadd.f32 1e-06, %v2630_v36  ;;  %v2626_v52 = vsel %vm206_vm1, %v2610_v16, 0.0  ;;  %v7387_v36 = vpack.c.bf16 %v2957_v0, %v2956_v6  ;;  %v2959_v16 = vld [vmem:[%s10164_s6 + $0x48] sm:$0xff] }
 0xda9   :  { %v2635_v25 = vadd.f32 1e-06, %v2629_v43  ;;  %2627 = vadd.xlane.f32.xlu0 %v2626_v52  ;;  %v2623_v30 = vsel %vm206_vm1, %v2609_v18, 0.0  ;;  %v7391_v43 = vpack.c.bf16 %v2959_v16, %v2958_v41 }
 0xdaa   :  { %7813 = vrsqrt.f32 %v2636_v58  ;;  %2624 = vadd.xlane.f32.xlu1 %v2623_v30  ;;  %v2961_v30 = vld [vmem:[%s10164_s6 + $0x58] sm:$0xff] }
 0xdab   :  { %7815 = vrsqrt.f32 %v2635_v25  ;;  %v2960_v25 = vld [vmem:[%s10164_s6 + $0x50] sm:$0xff] }
 0xdb4   :  { %v7814_v34 = vpop.eup %7813 }
 0xdb5   :  { %v7816_v62 = vpop.eup %7815  ;;  %v2648_v57 = vmul.f32 %v7814_v34, %v2600_v20 }
 0xdb6   :  { %v2647_v28 = vmul.f32 %v7816_v62, %v2599_v29  ;;  %v7395_v62 = vpack.c.bf16 %v2961_v30, %v2960_v25 }
 0xdb7   :  { %v2658_v59 = vmul.f32 %v9122_v40, %v2648_v57 }
 0xdb8   :  { %v2657_v9 = vmul.f32 %v9122_v40, %v2647_v28 }
 0xdb9   :  { %v2668_v21 = vadd.f32 %v9127_v1, %v2658_v59  ;;  %v2962_v59 = vld [vmem:[%s10164_s6 + $0x60] sm:$0xff] }
 0xdba   :  { %v2667_v4 = vadd.f32 %v9127_v1, %v2657_v9  ;;  %v2963_v9 = vld [vmem:[%s10164_s6 + $0x68] sm:$0xff] }
 0xdbc   :  { %6866 = vmatprep.mubr.msk.f32.mxu0 %vm206_vm1, %v2667_v4  ;;  %v7399_v4 = vpack.c.bf16 %v2963_v9, %v2962_v59 }
 0xdbd   :  { %6867 = vmatmul.mubr.msk.f32.vlgmr.msra.gmra.mrb[54].mxu0 %vm206_vm1, %v2668_v21  ;;  %v2964_v21 = vld [vmem:[%s10164_s6 + $0x70] sm:$0xff] }
 0xe06   :  { %v2619_v60 = vpop.xlane.xlu1 %2618 }
 0xe07   :  { %v2631_v20 = vmul.f32 0.03125, %v2619_v60  ;;  %v2965_v60 = vld [vmem:[%s10164_s6 + $0x78] sm:$0xff] }
 0xe09   :  { %v2637_v29 = vadd.f32 1e-06, %v2631_v20  ;;  %v7403_v20 = vpack.c.bf16 %v2965_v60, %v2964_v21 }
 0xe0a   :  { %v2622_v2 = vpop.xlane.xlu0 %2621 }
 0xe0b   :  { %7817 = vrsqrt.f32 %v2637_v29  ;;  %v2632_v55 = vmul.f32 0.03125, %v2622_v2 }
 0xe0d   :  { %v2638_v49 = vadd.f32 1e-06, %v2632_v55 }
 0xe0f   :  { %7819 = vrsqrt.f32 %v2638_v49 }
 0xe15   :  { %v7818_v44 = vpop.eup %7817 }
 0xe16   :  { %v2649_v53 = vmul.f32 %v7818_v44, %v2601_v13  ;;  %v2951_v13 = vld [vmem:[%s10164_s6 + $0x8] sm:$0xff] }
 0xe17   :  { %v7375_v37 = vpack.c.bf16 %v2951_v13, %v2950_v10 }
 0xe18   :  { %v2659_v32 = vmul.f32 %v9122_v40, %v2649_v53 }
 0xe19   :  { %v7820_v8 = vpop.eup %7819  ;;  %7376 = vmatprep.subr.bf16.mxu1 %v7375_v37 }
 0xe1a   :  { %v2669_v63 = vadd.f32 %v9127_v1, %v2659_v32  ;;  %v2650_v7 = vmul.f32 %v7820_v8, %v2602_v15  ;;  %7378 = vmatpush3.bf16.msra.mxu1 %v7375_v37  ;;  %v2952_v15 = vld [vmem:[%s10164_s6 + $0x10] sm:$0xff] }
 0xe1b   :  { %v7379_v51 = vpack.c.bf16 %v2953_v61, %v2952_v15 }
 0xe1c   :  { %6869 = vmatprep.mubr.msk.f32.mxu0 %vm206_vm1, %v2669_v63  ;;  %v2660_v5 = vmul.f32 %v9122_v40, %v2650_v7  ;;  %v2679_v63 = vsub.s32 6, %v8294_v38 }
 0xe1d   :  { %7380 = vmatprep.subr.bf16.mxu1 %v7379_v51 }
 0xe1e   :  { %v2670_v24 = vadd.f32 %v9127_v1, %v2660_v5  ;;  %7382 = vmatpush3.bf16.msra.mxu1 %v7379_v51 }
 0xe1f   :  { %7384 = vmatprep.subr.bf16.mxu1 %v7383_v39 }
 0xe20   :  { %6870 = vmatmul.mubr.msk.f32.gmra.mrb[56].mxu0 %vm206_vm1, %v2670_v24 }
 0xe22   :  { %7386 = vmatpush3.bf16.msra.mxu1 %v7383_v39 }
 0xe23   :  { %7388 = vmatprep.subr.bf16.mxu1 %v7387_v36 }
 0xe26   :  { %7390 = vmatpush3.bf16.msra.mxu1 %v7387_v36 }
 0xe27   :  { %7392 = vmatprep.subr.bf16.mxu1 %v7391_v43 }
 0xe2a   :  { %7394 = vmatpush3.bf16.msra.mxu1 %v7391_v43 }
 0xe2b   :  { %7396 = vmatprep.subr.bf16.mxu1 %v7395_v62 }
 0xe2e   :  { %7398 = vmatpush3.bf16.msra.mxu1 %v7395_v62 }
 0xe2f   :  { %7400 = vmatprep.subr.bf16.mxu1 %v7399_v4 }
 0xe32   :  { %7402 = vmatpush3.bf16.msra.mxu1 %v7399_v4 }
 0xe33   :  { %7404 = vmatprep.subr.bf16.mxu1 %v7403_v20 }
 0xe36   :  { %v2628_v18 = vpop.xlane.xlu0 %2627  ;;  %7406 = vmatpush3.bf16.msra.mxu1 %v7403_v20 }
 0xe37   :  { %v2634_v58 = vmul.f32 0.03125, %v2628_v18  ;;  %v2625_v52 = vpop.xlane.xlu1 %2624  ;;  %7422 = vmatprep.subr.bf16.mxu1 %v8021_v3 }
 0xe38   :  { %v2633_v34 = vmul.f32 0.03125, %v2625_v52 }
 0xe39   :  { %v2640_v57 = vadd.f32 1e-06, %v2634_v58 }
 0xe3a   :  { %v2639_v28 = vadd.f32 1e-06, %v2633_v34 }
 0xe3b   :  { %7821 = vrsqrt.f32 %v2640_v57 }
 0xe3c   :  { %7823 = vrsqrt.f32 %v2639_v28 }
 0xe45   :  { %v7822_v29 = vpop.eup %7821 }
 0xe46   :  { %v7824_v2 = vpop.eup %7823  ;;  %v2652_v55 = vmul.f32 %v7822_v29, %v9106_v17  ;;  %v9202_v17 = vrot.slane %v9050_v48, %v2679_v63 }
 0xe47   :  { %v2651_v49 = vmul.f32 %v7824_v2, %v9109_v14 }
 0xe48   :  { %v2662_v44 = vmul.f32 %v9122_v40, %v2652_v55 }
 0xe49   :  { %v2661_v53 = vmul.f32 %v9122_v40, %v2651_v49 }
 0xe4a   :  { %v2672_v8 = vadd.f32 %v9127_v1, %v2662_v44 }
 0xe4b   :  { %v2671_v32 = vadd.f32 %v9127_v1, %v2661_v53 }
 0xe4d   :  { %6872 = vmatprep.mubr.msk.f32.mxu0 %vm206_vm1, %v2671_v32 }
 0xe4e   :  { %6873 = vmatmul.mubr.msk.f32.gmra.mrb[58].mxu0 %vm206_vm1, %v2672_v8  ;;  %v10171_v8 = vmov 1.0  }
 0xe90   :  { %v6868_v14 = vpop.f32.mrb[54].mxu0 }
 0xe91   :  { %v2771_v7 = vadd.f32 %v6868_v14, %v9202_v17  ;;  %v2765_v5 = vpop.f32.mrb[55].mxu0 }
 0xe92   :  { %v2766_v40 = vadd.f32 %v2765_v5, %v9202_v17 }
 0xe93   :  { %v2801_v24 = vmul.f32 0.70710677, %v2771_v7 }
 0xe94   :  { %v2800_v10 = vmul.f32 0.70710677, %v2766_v40 }
 0xe95   :  { %v2819_v1 = vand.u32 2147483647, %v2801_v24  ;;  %vm2807_vm8 = vcmp.lt.f32.partialorder %v2801_v24, 0.0 }
 0xe96   :  { %v2818_v13 = vand.u32 2147483647, %v2800_v10  ;;  %vm2806_vm9 = vcmp.lt.f32.partialorder %v2800_v10, 0.0  ;;  %v2813_v14 = vsel %vm2807_vm8, -1.0, %v10171_v8 }
 0xe97   :  { %v2825_v37 = vmul.f32 0.3275911, %v2819_v1  ;;  %v2897_v33 = vsub.f32 0.0, %v2819_v1 }
 0xe98   :  { %v2824_v15 = vmul.f32 0.3275911, %v2818_v13  ;;  %v2896_v22 = vsub.f32 0.0, %v2818_v13 }
 0xe99   :  { %v2831_v61 = vadd.f32 1.0, %v2825_v37  ;;  %v2903_v6 = vmul.f32 %v2897_v33, %v2819_v1  ;;  %v2795_v33 = vmul.f32 0.5, %v2771_v7 }
 0xe9a   :  { %v2830_v51 = vadd.f32 1.0, %v2824_v15  ;;  %v2902_v41 = vmul.f32 %v2896_v22, %v2818_v13  ;;  %v2812_v13 = vsel %vm2806_vm9, -1.0, %v10171_v8 }
 0xe9b   :  { %7825 = vrcp.f32 %v2831_v61  ;;  %v2910_v18 = vmul.f32 1.442695, %v2903_v6  ;;  %v2794_v61 = vmul.f32 0.5, %v2766_v40 }
 0xe9c   :  { %7827 = vrcp.f32 %v2830_v51  ;;  %v2908_v25 = vmul.f32 1.442695, %v2902_v41 }
 0xe9d   :  { %7829 = vpow2.f32 %v2910_v18 }
 0xe9e   :  { %7831 = vpow2.f32 %v2908_v25 }
 0xea5   :  { %v7826_v39 = vpop.eup %7825 }
 0xea6   :  { %v7828_v0 = vpop.eup %7827  ;;  %v2843_v36 = vmul.f32 1.0614054, %v7826_v39 }
 0xea7   :  { %v2842_v16 = vmul.f32 1.0614054, %v7828_v0  ;;  %v7830_v2 = vpop.eup %7829 }
 0xea8   :  { %v2849_v43 = vadd.f32 -1.4531521, %v2843_v36  ;;  %v7832_v49 = vpop.eup %7831 }
 0xea9   :  { %v2848_v58 = vadd.f32 -1.4531521, %v2842_v16 }
 0xeaa   :  { %v2855_v52 = vmul.f32 %v7826_v39, %v2849_v43 }
 0xeab   :  { %v2854_v30 = vmul.f32 %v7828_v0, %v2848_v58 }
 0xeac   :  { %v2861_v34 = vadd.f32 1.4214138, %v2855_v52 }
 0xead   :  { %v2860_v62 = vadd.f32 1.4214138, %v2854_v30 }
 0xeae   :  { %v2867_v57 = vmul.f32 %v7826_v39, %v2861_v34 }
 0xeaf   :  { %v2866_v28 = vmul.f32 %v7828_v0, %v2860_v62 }
 0xeb0   :  { %v2873_v59 = vadd.f32 -0.28449672, %v2867_v57 }
 0xeb1   :  { %v2872_v9 = vadd.f32 -0.28449672, %v2866_v28 }
 0xeb2   :  { %v2879_v4 = vmul.f32 %v7826_v39, %v2873_v59 }
 0xeb3   :  { %v2878_v21 = vmul.f32 %v7828_v0, %v2872_v9 }
 0xeb4   :  { %v2885_v60 = vadd.f32 0.2548296, %v2879_v4 }
 0xeb5   :  { %v2884_v20 = vadd.f32 0.2548296, %v2878_v21 }
 0xeb6   :  { %v2891_v29 = vmul.f32 %v7826_v39, %v2885_v60 }
 0xeb7   :  { %v2890_v55 = vmul.f32 %v7828_v0, %v2884_v20 }
 0xeb8   :  { %v2921_v44 = vmul.f32 %v7830_v2, %v2891_v29 }
 0xeb9   :  { %v2920_v53 = vmul.f32 %v7832_v49, %v2890_v55 }
 0xeba   :  { %v2927_v32 = vsub.f32 1.0, %v2921_v44 }
 0xebb   :  { %v2926_v5 = vsub.f32 1.0, %v2920_v53 }
 0xebc   :  { %v2933_v1 = vmul.f32 %v2927_v32, %v2813_v14 }
 0xebd   :  { %v2932_v37 = vmul.f32 %v2926_v5, %v2812_v13 }
 0xebe   :  { %v2939_v15 = vadd.f32 1.0, %v2933_v1 }
 0xebf   :  { %v2938_v51 = vadd.f32 1.0, %v2932_v37 }
 0xec0   :  { %v2945_v39 = vmul.f32 %v2939_v15, %v2795_v33 }
 0xec1   :  { %v2944_v22 = vmul.f32 %v2938_v51, %v2794_v61 }
 0xec3   :  { %6907 = vmatprep.mubr.f32.mxu1 %v2944_v22 }
 0xec4   :  { %6908 = vmatmul.mubr.f32.vlgmr.msra.gmra.mrb[66].mxu1 %v2945_v39 }
 0xef3   :  { %v6871_v24 = vpop.f32.mrb[56].mxu0 }
 0xef4   :  { %v2781_v10 = vadd.f32 %v6871_v24, %v9202_v17  ;;  %v2775_v6 = vpop.f32.mrb[57].mxu0 }
 0xef5   :  { %v2776_v0 = vadd.f32 %v2775_v6, %v9202_v17 }
 0xef6   :  { %v2803_v36 = vmul.f32 0.70710677, %v2781_v10 }
 0xef7   :  { %v2802_v41 = vmul.f32 0.70710677, %v2776_v0 }
 0xef8   :  { %v2821_v16 = vand.u32 2147483647, %v2803_v36  ;;  %vm2809_vm10 = vcmp.lt.f32.partialorder %v2803_v36, 0.0 }
 0xef9   :  { %v2820_v43 = vand.u32 2147483647, %v2802_v41  ;;  %vm2808_vm11 = vcmp.lt.f32.partialorder %v2802_v41, 0.0  ;;  %v2815_v24 = vsel %vm2809_vm10, -1.0, %v10171_v8 }
 0xefa   :  { %v2827_v18 = vmul.f32 0.3275911, %v2821_v16  ;;  %v2899_v7 = vsub.f32 0.0, %v2821_v16 }
 0xefb   :  { %v2826_v58 = vmul.f32 0.3275911, %v2820_v43  ;;  %v2898_v25 = vsub.f32 0.0, %v2820_v43 }
 0xefc   :  { %v2833_v52 = vadd.f32 1.0, %v2827_v18  ;;  %v2905_v34 = vmul.f32 %v2899_v7, %v2821_v16  ;;  %v2814_v16 = vsel %vm2808_vm11, -1.0, %v10171_v8 }
 0xefd   :  { %v2832_v40 = vadd.f32 1.0, %v2826_v58  ;;  %v2904_v57 = vmul.f32 %v2898_v25, %v2820_v43 }
 0xefe   :  { %7833 = vrcp.f32 %v2833_v52  ;;  %v2914_v4 = vmul.f32 1.442695, %v2905_v34  ;;  %v2797_v34 = vmul.f32 0.5, %v2781_v10 }
 0xeff   :  { %7835 = vrcp.f32 %v2832_v40  ;;  %v2912_v60 = vmul.f32 1.442695, %v2904_v57  ;;  %v2796_v40 = vmul.f32 0.5, %v2776_v0 }
 0xf00   :  { %7837 = vpow2.f32 %v2914_v4 }
 0xf01   :  { %7839 = vpow2.f32 %v2912_v60 }
 0xf08   :  { %v7834_v30 = vpop.eup %7833 }
 0xf09   :  { %v7836_v62 = vpop.eup %7835  ;;  %v2845_v28 = vmul.f32 1.0614054, %v7834_v30 }
 0xf0a   :  { %v2844_v59 = vmul.f32 1.0614054, %v7836_v62  ;;  %v7838_v15 = vpop.eup %7837 }
 0xf0b   :  { %v2851_v9 = vadd.f32 -1.4531521, %v2845_v28  ;;  %v7840_v51 = vpop.eup %7839 }
 0xf0c   :  { %v2850_v21 = vadd.f32 -1.4531521, %v2844_v59 }
 0xf0d   :  { %v2857_v20 = vmul.f32 %v7834_v30, %v2851_v9 }
 0xf0e   :  { %v2856_v29 = vmul.f32 %v7836_v62, %v2850_v21 }
 0xf0f   :  { %v2863_v2 = vadd.f32 1.4214138, %v2857_v20 }
 0xf10   :  { %v2862_v55 = vadd.f32 1.4214138, %v2856_v29 }
 0xf11   :  { %v2869_v49 = vmul.f32 %v7834_v30, %v2863_v2 }
 0xf12   :  { %v2868_v44 = vmul.f32 %v7836_v62, %v2862_v55 }
 0xf13   :  { %v2875_v53 = vadd.f32 -0.28449672, %v2869_v49 }
 0xf14   :  { %v2874_v32 = vadd.f32 -0.28449672, %v2868_v44 }
 0xf15   :  { %v2881_v14 = vmul.f32 %v7834_v30, %v2875_v53 }
 0xf16   :  { %v2880_v5 = vmul.f32 %v7836_v62, %v2874_v32 }
 0xf17   :  { %v2887_v1 = vadd.f32 0.2548296, %v2881_v14 }
 0xf18   :  { %v2886_v13 = vadd.f32 0.2548296, %v2880_v5 }
 0xf19   :  { %v2893_v37 = vmul.f32 %v7834_v30, %v2887_v1 }
 0xf1a   :  { %v2892_v61 = vmul.f32 %v7836_v62, %v2886_v13 }
 0xf1b   :  { %v2923_v33 = vmul.f32 %v7838_v15, %v2893_v37 }
 0xf1c   :  { %v2922_v22 = vmul.f32 %v7840_v51, %v2892_v61 }
 0xf1d   :  { %v2929_v39 = vsub.f32 1.0, %v2923_v33 }
 0xf1e   :  { %v2928_v6 = vsub.f32 1.0, %v2922_v22 }
 0xf1f   :  { %v2935_v43 = vmul.f32 %v2929_v39, %v2815_v24 }
 0xf20   :  { %v2934_v18 = vmul.f32 %v2928_v6, %v2814_v16 }
 0xf21   :  { %v6874_v58 = vpop.f32.mrb[58].mxu0  ;;  %v2941_v52 = vadd.f32 1.0, %v2935_v43 }
 0xf22   :  { %v2791_v7 = vadd.f32 %v6874_v58, %v9202_v17  ;;  %v2785_v25 = vpop.f32.mrb[59].mxu0  ;;  %v2940_v30 = vadd.f32 1.0, %v2934_v18 }
 0xf23   :  { %v2786_v36 = vadd.f32 %v2785_v25, %v9202_v17  ;;  %v2947_v28 = vmul.f32 %v2941_v52, %v2797_v34 }
 0xf24   :  { %v2805_v41 = vmul.f32 0.70710677, %v2791_v7  ;;  %v2946_v62 = vmul.f32 %v2940_v30, %v2796_v40 }
 0xf25   :  { %v2804_v57 = vmul.f32 0.70710677, %v2786_v36 }
 0xf26   :  { %v2823_v59 = vand.u32 2147483647, %v2805_v41  ;;  %6910 = vmatprep.mubr.f32.mxu1 %v2946_v62  ;;  %vm2811_vm12 = vcmp.lt.f32.partialorder %v2805_v41, 0.0  ;;  %v10170_v41 = vsub.s32 7, %v8294_v38 }
 0xf27   :  { %v2822_v9 = vand.u32 2147483647, %v2804_v57  ;;  %6911 = vmatmul.mubr.f32.gmra.mrb[68].mxu1 %v2947_v28  ;;  %vm2810_vm13 = vcmp.lt.f32.partialorder %v2804_v57, 0.0  ;;  %v2817_v34 = vsel %vm2811_vm12, -1.0, %v10171_v8 }
 0xf28   :  { %v2829_v4 = vmul.f32 0.3275911, %v2823_v59  ;;  %v2901_v0 = vsub.f32 0.0, %v2823_v59  ;;  %v2816_v28 = vsel %vm2810_vm13, -1.0, %v10171_v8  ;;  %v3070_v57 = vrot.slane %v9050_v48, %v10170_v41 }
 0xf29   :  { %v2828_v21 = vmul.f32 0.3275911, %v2822_v9  ;;  %v2900_v29 = vsub.f32 0.0, %v2822_v9 }
 0xf2a   :  { %v2835_v60 = vadd.f32 1.0, %v2829_v4  ;;  %v2907_v10 = vmul.f32 %v2901_v0, %v2823_v59 }
 0xf2b   :  { %v2834_v20 = vadd.f32 1.0, %v2828_v21  ;;  %v2906_v17 = vmul.f32 %v2900_v29, %v2822_v9  ;;  %v2798_v21 = vmul.f32 0.5, %v2786_v36 }
 0xf2c   :  { %7841 = vrcp.f32 %v2835_v60  ;;  %v2918_v32 = vmul.f32 1.442695, %v2907_v10 }
 0xf2d   :  { %7843 = vrcp.f32 %v2834_v20  ;;  %v2916_v5 = vmul.f32 1.442695, %v2906_v17  ;;  %v2799_v20 = vmul.f32 0.5, %v2791_v7 }
 0xf2e   :  { %7845 = vpow2.f32 %v2918_v32 }
 0xf2f   :  { %7847 = vpow2.f32 %v2916_v5 }
 0xf36   :  { %v7842_v2 = vpop.eup %7841 }
 0xf37   :  { %v7844_v55 = vpop.eup %7843  ;;  %v2847_v49 = vmul.f32 1.0614054, %v7842_v2 }
 0xf38   :  { %v2846_v44 = vmul.f32 1.0614054, %v7844_v55  ;;  %v7846_v18 = vpop.eup %7845 }
 0xf39   :  { %v2853_v53 = vadd.f32 -1.4531521, %v2847_v49  ;;  %v7848_v52 = vpop.eup %7847 }
 0xf3a   :  { %v2852_v14 = vadd.f32 -1.4531521, %v2846_v44 }
 0xf3b   :  { %v2859_v1 = vmul.f32 %v7842_v2, %v2853_v53 }
 0xf3c   :  { %v2858_v13 = vmul.f32 %v7844_v55, %v2852_v14 }
 0xf3d   :  { %v2865_v37 = vadd.f32 1.4214138, %v2859_v1 }
 0xf3e   :  { %v2864_v15 = vadd.f32 1.4214138, %v2858_v13 }
 0xf3f   :  { %v2871_v61 = vmul.f32 %v7842_v2, %v2865_v37 }
 0xf40   :  { %v2870_v51 = vmul.f32 %v7844_v55, %v2864_v15 }
 0xf41   :  { %v2877_v33 = vadd.f32 -0.28449672, %v2871_v61 }
 0xf42   :  { %v2876_v22 = vadd.f32 -0.28449672, %v2870_v51 }
 0xf43   :  { %v2883_v39 = vmul.f32 %v7842_v2, %v2877_v33 }
 0xf44   :  { %v2882_v24 = vmul.f32 %v7844_v55, %v2876_v22 }
 0xf45   :  { %v2889_v6 = vadd.f32 0.2548296, %v2883_v39 }
 0xf46   :  { %v2888_v16 = vadd.f32 0.2548296, %v2882_v24 }
 0xf47   :  { %v2895_v43 = vmul.f32 %v7842_v2, %v2889_v6 }
 0xf48   :  { %v2894_v58 = vmul.f32 %v7844_v55, %v2888_v16 }
 0xf49   :  { %v2925_v40 = vmul.f32 %v7846_v18, %v2895_v43 }
 0xf4a   :  { %v2924_v25 = vmul.f32 %v7848_v52, %v2894_v58  ;;  %v6163_v52 = vld [vmem:[%s10161_s3 + $0x20] sm:$0xff] }
 0xf4b   :  { %v2931_v30 = vsub.f32 1.0, %v2925_v40  ;;  %v6164_v40 = vld [vmem:[%s10161_s3 + $0x28] sm:$0xff] }
 0xf4c   :  { %v2930_v62 = vsub.f32 1.0, %v2924_v25  ;;  %v7407_v25 = vpack.c.bf16 %v6164_v40, %v6163_v52 }
 0xf4d   :  { %v2937_v59 = vmul.f32 %v2931_v30, %v2817_v34  ;;  %v6165_v30 = vld [vmem:[%s10161_s3 + $0x30] sm:$0xff]  ;;  %v6166_v34 = vld [vmem:[%s10161_s3 + $0x38] sm:$0xff] }
 0xf4e   :  { %v2936_v9 = vmul.f32 %v2930_v62, %v2816_v28  ;;  %7408 = vmatprep.subr.bf16.mxu0 %v7407_v25  ;;  %v7411_v62 = vpack.c.bf16 %v6166_v34, %v6165_v30 }
 0xf4f   :  { %v2943_v4 = vadd.f32 1.0, %v2937_v59  ;;  %7410 = vmatpush3.bf16.msra.mxu0 %v7407_v25 }
 0xf50   :  { %v2942_v60 = vadd.f32 1.0, %v2936_v9  ;;  %7412 = vmatprep.subr.bf16.mxu0 %v7411_v62 }
 0xf51   :  { %v2949_v29 = vmul.f32 %v2943_v4, %v2799_v20 }
 0xf52   :  { %v2948_v0 = vmul.f32 %v2942_v60, %v2798_v21 }
 0xf53   :  { %7414 = vmatpush3.bf16.msra.mxu0 %v7411_v62 }
 0xf54   :  { %6913 = vmatprep.mubr.f32.mxu1 %v2948_v0  ;;  %7415 = vmatprep.subr.bf16.mxu0 %v8021_v3 }
 0xf55   :  { %6914 = vmatmul.mubr.f32.gmra.mrb[70].mxu1 %v2949_v29 }
 0xf56   :  { %6969 = vmatprep.mubr.msk.f32.mxu1 %vm8023_vm2, %v8024_v19 }
 0xf97   :  { %v6909_v2 = vpop.f32.mrb[66].mxu1 }
 0xf98   :  { %v3062_v10 = vadd.f32 %v6909_v2, %v9057_v11  ;;  %v3032_v55 = vpop.f32.mrb[67].mxu1 }
 0xf99   :  { %v3061_v36 = vadd.f32 %v3032_v55, %v9059_v35 }
 0xf9a   :  { %v9224_v7 = vadd.f32 %v3070_v57, %v3062_v10 }
 0xf9b   :  { %v9226_v17 = vadd.f32 %v3070_v57, %v3061_v36 }
 0xf9c   :  { %v3082_v49 = vsel %vm206_vm1, %v9224_v7, 0.0 }
 0xf9d   :  { %3083 = vadd.xlane.f32.xlu0 %v3082_v49  ;;  %v3079_v44 = vsel %vm206_vm1, %v9226_v17, 0.0 }
 0xf9e   :  { %3080 = vadd.xlane.f32.xlu1 %v3079_v44 }
 0xffa   :  { %v6912_v53 = vpop.f32.mrb[68].mxu1 }
 0xffb   :  { %v3064_v48 = vadd.f32 %v6912_v53, %v9069_v47  ;;  %v3042_v32 = vpop.f32.mrb[69].mxu1 }
 0xffc   :  { %v3063_v11 = vadd.f32 %v3042_v32, %v9067_v54 }
 0xffd   :  { %v9234_v14 = vadd.f32 %v3070_v57, %v3064_v48 }
 0xffe   :  { %v9236_v35 = vadd.f32 %v3070_v57, %v3063_v11 }
 0xfff   :  { %v3088_v5 = vsel %vm206_vm1, %v9234_v14, 0.0 }
0x1000   :  { %3089 = vadd.xlane.f32.xlu0 %v3088_v5  ;;  %v3085_v1 = vsel %vm206_vm1, %v9236_v35, 0.0 }
0x1001   :  { %3086 = vadd.xlane.f32.xlu1 %v3085_v1 }
0x1028   :  { %v6915_v13 = vpop.f32.mrb[70].mxu1 }
0x1029   :  { %v3066_v37 = vadd.f32 %v6915_v13, %v9077_v56  ;;  %v3052_v15 = vpop.f32.mrb[71].mxu1 }
0x102a   :  { %v3065_v47 = vadd.f32 %v3052_v15, %v9080_v50  ;;  %v3084_v61 = vpop.xlane.xlu0 %3083 }
0x102b   :  { %v9244_v54 = vadd.f32 %v3070_v57, %v3066_v37  ;;  %v3098_v51 = vmul.f32 0.03125, %v3084_v61  ;;  %v3081_v33 = vpop.xlane.xlu1 %3080  ;;  %v6162_v61 = vld [vmem:[%s10165_s7 + $0x8] sm:$0xff] }
0x102c   :  { %v9246_v22 = vadd.f32 %v3070_v57, %v3065_v47  ;;  %v3097_v39 = vmul.f32 0.03125, %v3081_v33 }
0x102d   :  { %v3104_v24 = vsub.f32 %v9224_v7, %v3098_v51  ;;  %v3094_v6 = vsel %vm206_vm1, %v9244_v54, 0.0  ;;  %v3160_v51 = vrot.slane %v6162_v61, %v8297_v42 }
0x102e   :  { %v3103_v16 = vsub.f32 %v9226_v17, %v3097_v39  ;;  %3095 = vadd.xlane.f32.xlu0 %v3094_v6  ;;  %v3091_v56 = vsel %vm206_vm1, %v9246_v22, 0.0 }
0x102f   :  { %3092 = vadd.xlane.f32.xlu1 %v3091_v56  ;;  %v3110_v50 = vmul.f32 %v3104_v24, %v3104_v24 }
0x1030   :  { %v3109_v43 = vmul.f32 %v3103_v16, %v3103_v16 }
0x1031   :  { %v3118_v18 = vsel %vm206_vm1, %v3110_v50, 0.0  ;;  %v3170_v50 = vrot.slane %v6162_v61, %v8303_v46 }
0x1032   :  { %3119 = vadd.xlane.f32.xlu0 %v3118_v18  ;;  %v3115_v58 = vsel %vm206_vm1, %v3109_v43, 0.0 }
0x1033   :  { %3116 = vadd.xlane.f32.xlu1 %v3115_v58 }
0x108d   :  { %v3090_v28 = vpop.xlane.xlu0 %3089 }
0x108e   :  { %v3100_v59 = vmul.f32 0.03125, %v3090_v28  ;;  %v3087_v9 = vpop.xlane.xlu1 %3086 }
0x108f   :  { %v3099_v4 = vmul.f32 0.03125, %v3087_v9 }
0x1090   :  { %v3106_v21 = vsub.f32 %v9234_v14, %v3100_v59 }
0x1091   :  { %v3105_v60 = vsub.f32 %v9236_v35, %v3099_v4 }
0x1092   :  { %v3112_v20 = vmul.f32 %v3106_v21, %v3106_v21 }
0x1093   :  { %v3111_v0 = vmul.f32 %v3105_v60, %v3105_v60 }
0x1094   :  { %v3124_v29 = vsel %vm206_vm1, %v3112_v20, 0.0 }
0x1095   :  { %3125 = vadd.xlane.f32.xlu0 %v3124_v29  ;;  %v3121_v57 = vsel %vm206_vm1, %v3111_v0, 0.0 }
0x1096   :  { %3122 = vadd.xlane.f32.xlu1 %v3121_v57 }
0x10bb   :  { %v3096_v2 = vpop.xlane.xlu0 %3095 }
0x10bc   :  { %v3102_v10 = vmul.f32 0.03125, %v3096_v2  ;;  %v3093_v55 = vpop.xlane.xlu1 %3092 }
0x10bd   :  { %v3101_v36 = vmul.f32 0.03125, %v3093_v55 }
0x10be   :  { %v3108_v49 = vsub.f32 %v9244_v54, %v3102_v10 }
0x10bf   :  { %v3107_v44 = vsub.f32 %v9246_v22, %v3101_v36  ;;  %v3120_v53 = vpop.xlane.xlu0 %3119 }
0x10c0   :  { %v3134_v48 = vmul.f32 0.03125, %v3120_v53  ;;  %v3117_v32 = vpop.xlane.xlu1 %3116  ;;  %v3114_v11 = vmul.f32 %v3108_v49, %v3108_v49 }
0x10c1   :  { %v3133_v5 = vmul.f32 0.03125, %v3117_v32  ;;  %v3113_v1 = vmul.f32 %v3107_v44, %v3107_v44 }
0x10c2   :  { %v3140_v13 = vadd.f32 1e-06, %v3134_v48  ;;  %v3130_v37 = vsel %vm206_vm1, %v3114_v11, 0.0 }
0x10c3   :  { %v3139_v15 = vadd.f32 1e-06, %v3133_v5  ;;  %3131 = vadd.xlane.f32.xlu0 %v3130_v37  ;;  %v3127_v47 = vsel %vm206_vm1, %v3113_v1, 0.0  ;;  %v3185_v37 = vrot.slane %v6162_v61, %v312_v12 }
0x10c4   :  { %7849 = vrsqrt.f32 %v3140_v13  ;;  %3128 = vadd.xlane.f32.xlu1 %v3127_v47 }
0x10c5   :  { %7851 = vrsqrt.f32 %v3139_v15 }
0x10ce   :  { %v7850_v33 = vpop.eup %7849 }
0x10cf   :  { %v7852_v39 = vpop.eup %7851  ;;  %v3152_v6 = vmul.f32 %v7850_v33, %v3104_v24 }
0x10d0   :  { %v3151_v56 = vmul.f32 %v7852_v39, %v3103_v16 }
0x10d1   :  { %v3162_v43 = vmul.f32 %v3160_v51, %v3152_v6 }
0x10d2   :  { %v3161_v18 = vmul.f32 %v3160_v51, %v3151_v56 }
0x10d3   :  { %v3172_v52 = vadd.f32 %v3170_v50, %v3162_v43 }
0x10d4   :  { %v3171_v58 = vadd.f32 %v3170_v50, %v3161_v18 }
0x10d6   :  { %6924 = vmatprep.mubr.msk.f32.mxu0 %vm206_vm1, %v3171_v58 }
0x10d7   :  { %6925 = vmatmul.mubr.msk.f32.vlgmr.msra.gmra.mrb[60].mxu0 %vm206_vm1, %v3172_v52 }
0x1122   :  { %v3126_v40 = vpop.xlane.xlu0 %3125 }
0x1123   :  { %v3136_v25 = vmul.f32 0.03125, %v3126_v40  ;;  %v3123_v30 = vpop.xlane.xlu1 %3122 }
0x1124   :  { %v3135_v34 = vmul.f32 0.03125, %v3123_v30 }
0x1125   :  { %v3142_v62 = vadd.f32 1e-06, %v3136_v25 }
0x1126   :  { %v3141_v28 = vadd.f32 1e-06, %v3135_v34 }
0x1127   :  { %7853 = vrsqrt.f32 %v3142_v62 }
0x1128   :  { %7855 = vrsqrt.f32 %v3141_v28 }
0x1131   :  { %v7854_v24 = vpop.eup %7853 }
0x1132   :  { %v7856_v16 = vpop.eup %7855  ;;  %v3154_v59 = vmul.f32 %v7854_v24, %v3106_v21 }
0x1133   :  { %v3153_v9 = vmul.f32 %v7856_v16, %v3105_v60 }
0x1134   :  { %v3164_v4 = vmul.f32 %v3160_v51, %v3154_v59 }
0x1135   :  { %v3163_v20 = vmul.f32 %v3160_v51, %v3153_v9 }
0x1136   :  { %v3174_v29 = vadd.f32 %v3170_v50, %v3164_v4 }
0x1137   :  { %v3173_v0 = vadd.f32 %v3170_v50, %v3163_v20 }
0x1139   :  { %6927 = vmatprep.mubr.msk.f32.mxu0 %vm206_vm1, %v3173_v0 }
0x113a   :  { %6928 = vmatmul.mubr.msk.f32.gmra.mrb[62].mxu0 %vm206_vm1, %v3174_v29 }
0x1150   :  { %v3132_v57 = vpop.xlane.xlu0 %3131 }
0x1151   :  { %v3138_v2 = vmul.f32 0.03125, %v3132_v57  ;;  %v3129_v10 = vpop.xlane.xlu1 %3128 }
0x1152   :  { %v3137_v55 = vmul.f32 0.03125, %v3129_v10 }
0x1153   :  { %v3144_v36 = vadd.f32 1e-06, %v3138_v2 }
0x1154   :  { %v3143_v53 = vadd.f32 1e-06, %v3137_v55 }
0x1155   :  { %7857 = vrsqrt.f32 %v3144_v36 }
0x1156   :  { %7859 = vrsqrt.f32 %v3143_v53 }
0x115f   :  { %v7858_v48 = vpop.eup %7857 }
0x1160   :  { %v7860_v32 = vpop.eup %7859  ;;  %v3156_v21 = vmul.f32 %v7858_v48, %v3108_v49 }
0x1161   :  { %v3155_v60 = vmul.f32 %v7860_v32, %v3107_v44 }
0x1162   :  { %v3166_v11 = vmul.f32 %v3160_v51, %v3156_v21 }
0x1163   :  { %v3165_v5 = vmul.f32 %v3160_v51, %v3155_v60 }
0x1164   :  { %v3176_v13 = vadd.f32 %v3170_v50, %v3166_v11 }
0x1165   :  { %v3175_v1 = vadd.f32 %v3170_v50, %v3165_v5 }
0x1167   :  { %6930 = vmatprep.mubr.msk.f32.mxu0 %vm206_vm1, %v3175_v1 }
0x1168   :  { %6931 = vmatmul.mubr.msk.f32.gmra.mrb[64].mxu0 %vm206_vm1, %v3176_v13 }
0x1169   :  { %6939 = vmatprep.mubr.msk.f32.mxu0 %vm8023_vm2, %v8024_v19 }
0x11aa   :  { %v6926_v15 = vpop.f32.mrb[60].mxu0 }
0x11ab   :  { %v9292_v47 = vadd.f32 %v6926_v15, %v3185_v37  ;;  %v3270_v33 = vpop.f32.mrb[61].mxu0 }
0x11ac   :  { %v9294_v49 = vadd.f32 %v3270_v33, %v3185_v37 }
0x11ae   :  { %v7625_v44 = vpack.i.bf16 %v9292_v47, %v9294_v49 }
0x11b0   :  { %7626 = vrot.lane.b32.xlu1 %v7625_v44, %s8022_s28 }
0x11b4   :  { %7631 = vrot.lane.b32.xlu1 %v7625_v44, %s8027_s30 }
0x120d   :  { %v6929_v51 = vpop.f32.mrb[62].mxu0 }
0x120e   :  { %v3280_v39 = vpop.f32.mrb[63].mxu0  ;;  %v9334_v30 = vadd.f32 %v6929_v51, %v3185_v37 }
0x120f   :  { %v9300_v6 = vadd.f32 %v3280_v39, %v3185_v37 }
0x1211   :  { %3547 = vrot.lane.b32.xlu1 %v9300_v6, %s8027_s30  ;;  %3306 = vrot.lane.b32.xlu0 %v9300_v6, %s8022_s28 }
0x1215   :  { %3537 = vrot.lane.b32.xlu1 %v9294_v49, %s8028_s12  ;;  %7636 = vrot.lane.b32.xlu0 %v7625_v44, %s8030_s16 }
0x1219   :  { %3541 = vrot.lane.b32.xlu1 %v9300_v6, %s8028_s12  ;;  %3539 = vrot.lane.b32.xlu0 %v9292_v47, %s8028_s12 }
0x121d   :  { %7641 = vrot.lane.b32.xlu1 %v7625_v44, %s8031_s17  ;;  %3788 = vrot.lane.b32.xlu0 %v9300_v6, %s8030_s16 }
0x1221   :  { %3780 = vrot.lane.b32.xlu1 %v9292_v47, %s8032_s18  ;;  %3778 = vrot.lane.b32.xlu0 %v9294_v49, %s8032_s18 }
0x1222   :  { %v7627_v12 = vpop.permute.xlu1 %7626 }
0x1223   :  { %v7629_v61 = vunpack.i.h.bf16 %v7627_v12  ;;  %v7628_v56 = vunpack.i.l.bf16 %v7627_v12 }
0x1225   :  { %v7416_v50 = vpack.c.bf16 %v7629_v61, %v7628_v56  ;;  %4029 = vrot.lane.b32.xlu1 %v9300_v6, %s8031_s17  ;;  %3782 = vrot.lane.b32.xlu0 %v9300_v6, %s8032_s18 }
0x1226   :  { %v7632_v43 = vpop.permute.xlu1 %7631 }
0x1227   :  { %v7634_v18 = vunpack.i.h.bf16 %v7632_v43  ;;  %v7633_v58 = vunpack.i.l.bf16 %v7632_v43  ;;  %7418 = vmatpush3.bf16.xpose.msk.msra.mxu0 %vm8359_vm4, %v7416_v50 }
0x1228   :  { %6937 = vmatprep.subr.mxu0 %v8024_v19 }
0x1229   :  { %v7423_v52 = vpack.c.bf16 %v7634_v18, %v7633_v58  ;;  %4019 = vrot.lane.b32.xlu1 %v9294_v49, %s8033_s19 }
0x122b   :  { %7425 = vmatpush3.bf16.xpose.msk.msra.mxu1 %vm8359_vm4, %v7423_v52 }
0x122c   :  { %6967 = vmatprep.subr.mxu1 %v8024_v19 }
0x122d   :  { %4023 = vrot.lane.b32.xlu1 %v9300_v6, %s8033_s19 }
0x123b   :  { %v6932_v40 = vpop.f32.mrb[64].mxu0 }
0x123c   :  { %v3290_v25 = vpop.f32.mrb[65].mxu0  ;;  %v9350_v28 = vadd.f32 %v6932_v40, %v3185_v37 }
0x123d   :  { %v9336_v34 = vadd.f32 %v3290_v25, %v3185_v37 }
0x123f   :  { %v9340_v62 = vpack.i.bf16 %v9336_v34, %v9334_v30 }
0x1241   :  { %7651 = vrot.lane.b32.xlu1 %v9340_v62, %s8027_s30  ;;  %7646 = vrot.lane.b32.xlu0 %v9340_v62, %s8022_s28 }
0x1245   :  { %7656 = vrot.lane.b32.xlu1 %v9340_v62, %s8030_s16  ;;  %4021 = vrot.lane.b32.xlu0 %v9292_v47, %s8033_s19 }
0x1249   :  { %4545 = vrot.lane.b32.xlu1 %v9336_v34, %s8028_s12  ;;  %4312 = vrot.lane.b32.xlu0 %v9350_v28, %s8022_s28 }
0x124d   :  { %4794 = vrot.lane.b32.xlu1 %v9350_v28, %s8030_s16  ;;  %4553 = vrot.lane.b32.xlu0 %v9350_v28, %s8027_s30 }
0x1251   :  { %4784 = vrot.lane.b32.xlu1 %v9334_v30, %s8032_s18  ;;  %4543 = vrot.lane.b32.xlu0 %v9334_v30, %s8028_s12 }
0x1255   :  { %4788 = vrot.lane.b32.xlu1 %v9350_v28, %s8032_s18  ;;  %4547 = vrot.lane.b32.xlu0 %v9350_v28, %s8028_s12 }
0x1259   :  { %5025 = vrot.lane.b32.xlu1 %v9334_v30, %s8033_s19  ;;  %7661 = vrot.lane.b32.xlu0 %v9340_v62, %s8031_s17 }
0x125d   :  { %3443 = vrot.lane.b32.xlu1 %v9300_v6, %s8026_s29  ;;  %4786 = vrot.lane.b32.xlu0 %v9336_v34, %s8032_s18  ;;  %s8040_s18 = smov [#allocation2]  }
0x1261   :  { %7671 = vrot.lane.b32.xlu1 %v7625_v44, %s8029_s2  ;;  %5035 = vrot.lane.b32.xlu0 %v9350_v28, %s8031_s17 }
0x1265   :  { %7676 = vrot.lane.b32.xlu1 %v7625_v44, %s8034_s20  ;;  %7666 = vrot.lane.b32.xlu0 %v7625_v44, %s8026_s29 }
0x1269   :  { %7681 = vrot.lane.b32.xlu1 %v7625_v44, %s8035_s21  ;;  %3684 = vrot.lane.b32.xlu0 %v9300_v6, %s8029_s2 }
0x126d   :  { %3925 = vrot.lane.b32.xlu0 %v9300_v6, %s8034_s20 }
0x1271   :  { %4166 = vrot.lane.b32.xlu0 %v9300_v6, %s8035_s21 }
0x1283   :  { %v3307_v24 = vpop.permute.xlu0 %3306  ;;  %v3548_v16 = vpop.permute.xlu1 %3547 }
0x1284   :  { %6938 = vmatpush3.xpose.msk.msra.mxu0 %vm436_vm3, %v3307_v24  ;;  %6968 = vmatpush3.xpose.msk.msra.mxu1 %vm436_vm3, %v3548_v16 }
0x1285   :  { %7429 = vmatprep.subr.bf16.mxu1 %v8021_v3  ;;  %7419 = vmatprep.subr.bf16.mxu0 %v8021_v3 }
0x1287   :  { %v7637_v59 = vpop.permute.xlu0 %7636  ;;  %v3538_v9 = vpop.permute.xlu1 %3537  ;;  %6940 = vmatmul.mubr.msk.f32.vlgmr.msra.gmra.mrb[66].mxu0 %vm436_vm3, %v9294_v49 }
0x1288   :  { %v7639_v4 = vunpack.i.h.bf16 %v7637_v59  ;;  %v7638_v20 = vunpack.i.l.bf16 %v7637_v59  ;;  %6970 = vmatmul.mubr.msk.f32.vlgmr.msra.gmra.mrb[72].mxu1 %vm436_vm3, %v3538_v9  ;;  %6942 = vmatprep.mubr.msk.f32.mxu0 %vm8023_vm2, %v8024_v19 }
0x1289   :  { %6972 = vmatprep.mubr.msk.f32.mxu1 %vm8023_vm2, %v8024_v19 }
0x128a   :  { %v7430_v0 = vpack.c.bf16 %v7639_v4, %v7638_v20 }
0x128b   :  { %v3540_v29 = vpop.permute.xlu0 %3539  ;;  %v3542_v57 = vpop.permute.xlu1 %3541  ;;  %6943 = vmatmul.mubr.msk.f32.gmra.mrb[68].mxu0 %vm436_vm3, %v9292_v47 }
0x128c   :  { %6973 = vmatmul.mubr.msk.f32.gmra.mrb[74].mxu1 %vm436_vm3, %v3540_v29  ;;  %6945 = vmatprep.mubr.msk.f32.mxu0 %vm8023_vm2, %v8024_v19 }
0x128d   :  { %7432 = vmatpush3.bf16.xpose.msk.msra.mxu1 %vm8359_vm4, %v7430_v0  ;;  %6975 = vmatprep.mubr.msk.f32.mxu1 %vm8023_vm2, %v8024_v19 }
0x128e   :  { %6997 = vmatprep.subr.mxu1 %v8024_v19 }
0x128f   :  { %6946 = vmatmul.mubr.msk.f32.gmra.mrb[70].mxu0 %vm436_vm3, %v9300_v6  ;;  %v7642_v2 = vpop.permute.xlu1 %7641  ;;  %v3789_v10 = vpop.permute.xlu0 %3788 }
0x1290   :  { %6976 = vmatmul.mubr.msk.f32.gmra.mrb[76].mxu1 %vm436_vm3, %v3542_v57  ;;  %6954 = vmatprep.mubr.msk.f32.mxu0 %vm8023_vm2, %v8024_v19  ;;  %v7644_v55 = vunpack.i.h.bf16 %v7642_v2  ;;  %v7643_v36 = vunpack.i.l.bf16 %v7642_v2 }
0x1291   :  { %6999 = vmatprep.mubr.msk.f32.mxu1 %vm8023_vm2, %v8024_v19 }
0x1292   :  { %v7437_v53 = vpack.c.bf16 %v7644_v55, %v7643_v36 }
0x1293   :  { %v3779_v48 = vpop.permute.xlu0 %3778  ;;  %v3781_v32 = vpop.permute.xlu1 %3780 }
0x1295   :  { %6998 = vmatpush3.xpose.msk.msra.mxu1 %vm436_vm3, %v3789_v10 }
0x1296   :  { %7436 = vmatprep.subr.bf16.mxu1 %v8021_v3 }
0x1297   :  { %v4030_v21 = vpop.permute.xlu1 %4029  ;;  %v3783_v60 = vpop.permute.xlu0 %3782 }
0x1298   :  { %7000 = vmatmul.mubr.msk.f32.vlgmr.msra.gmra.mrb[78].mxu1 %vm436_vm3, %v3779_v48 }
0x1299   :  { %7439 = vmatpush3.bf16.xpose.msk.msra.mxu1 %vm8359_vm4, %v7437_v53  ;;  %7002 = vmatprep.mubr.msk.f32.mxu1 %vm8023_vm2, %v8024_v19 }
0x129a   :  { %7027 = vmatprep.subr.mxu1 %v8024_v19 }
0x129b   :  { %v4020_v11 = vpop.permute.xlu1 %4019 }
0x129c   :  { %7003 = vmatmul.mubr.msk.f32.gmra.mrb[80].mxu1 %vm436_vm3, %v3781_v32 }
0x129d   :  { %7005 = vmatprep.mubr.msk.f32.mxu1 %vm8023_vm2, %v8024_v19 }
0x129f   :  { %v4024_v5 = vpop.permute.xlu1 %4023 }
0x12a0   :  { %7006 = vmatmul.mubr.msk.f32.gmra.mrb[82].mxu1 %vm436_vm3, %v3783_v60 }
0x12a1   :  { %7028 = vmatpush3.xpose.msk.msra.mxu1 %vm436_vm3, %v4030_v21  ;;  %7029 = vmatprep.mubr.msk.f32.mxu1 %vm8023_vm2, %v8024_v19 }
0x12a2   :  { %7443 = vmatprep.subr.bf16.mxu1 %v8021_v3 }
0x12a4   :  { %7030 = vmatmul.mubr.msk.f32.vlgmr.msra.gmra.mrb[84].mxu1 %vm436_vm3, %v4020_v11 }
0x12a5   :  { %7032 = vmatprep.mubr.msk.f32.mxu1 %vm8023_vm2, %v8024_v19 }
0x12b3   :  { %v7647_v1 = vpop.permute.xlu0 %7646  ;;  %v7652_v15 = vpop.permute.xlu1 %7651 }
0x12b4   :  { %v7649_v13 = vunpack.i.h.bf16 %v7647_v1  ;;  %v7648_v37 = vunpack.i.l.bf16 %v7647_v1  ;;  %v7654_v51 = vunpack.i.h.bf16 %v7652_v15  ;;  %v7653_v39 = vunpack.i.l.bf16 %v7652_v15 }
0x12b6   :  { %v7444_v47 = vpack.c.bf16 %v7649_v13, %v7648_v37  ;;  %v7451_v61 = vpack.c.bf16 %v7654_v51, %v7653_v39 }
0x12b7   :  { %v4022_v33 = vpop.permute.xlu0 %4021  ;;  %v7657_v49 = vpop.permute.xlu1 %7656 }
0x12b8   :  { %7033 = vmatmul.mubr.msk.f32.gmra.mrb[86].mxu1 %vm436_vm3, %v4022_v33  ;;  %v7659_v18 = vunpack.i.h.bf16 %v7657_v49  ;;  %v7658_v58 = vunpack.i.l.bf16 %v7657_v49 }
0x12b9   :  { %7446 = vmatpush3.bf16.xpose.msk.msra.mxu1 %vm8359_vm4, %v7444_v47  ;;  %7035 = vmatprep.mubr.msk.f32.mxu1 %vm8023_vm2, %v8024_v19 }
0x12ba   :  { %7057 = vmatprep.subr.mxu1 %v8024_v19  ;;  %v7458_v25 = vpack.c.bf16 %v7659_v18, %v7658_v58 }
0x12bb   :  { %v4313_v44 = vpop.permute.xlu0 %4312  ;;  %v4546_v12 = vpop.permute.xlu1 %4545 }
0x12bc   :  { %7036 = vmatmul.mubr.msk.f32.gmra.mrb[88].mxu1 %vm436_vm3, %v4024_v5 }
0x12bd   :  { %7059 = vmatprep.mubr.msk.f32.mxu1 %vm8023_vm2, %v8024_v19 }
0x12bf   :  { %v4554_v6 = vpop.permute.xlu0 %4553  ;;  %v4795_v50 = vpop.permute.xlu1 %4794 }
0x12c1   :  { %7058 = vmatpush3.xpose.msk.msra.mxu1 %vm436_vm3, %v4313_v44 }
0x12c2   :  { %7450 = vmatprep.subr.bf16.mxu1 %v8021_v3 }
0x12c3   :  { %v4544_v56 = vpop.permute.xlu0 %4543  ;;  %v4785_v40 = vpop.permute.xlu1 %4784 }
0x12c4   :  { %7060 = vmatmul.mubr.msk.f32.vlgmr.msra.gmra.mrb[90].mxu1 %vm436_vm3, %v9334_v30 }
0x12c5   :  { %7453 = vmatpush3.bf16.xpose.msk.msra.mxu1 %vm8359_vm4, %v7451_v61  ;;  %7062 = vmatprep.mubr.msk.f32.mxu1 %vm8023_vm2, %v8024_v19 }
0x12c6   :  { %7087 = vmatprep.subr.mxu1 %v8024_v19 }
0x12c7   :  { %v4548_v43 = vpop.permute.xlu0 %4547  ;;  %v4789_v24 = vpop.permute.xlu1 %4788 }
0x12c8   :  { %7063 = vmatmul.mubr.msk.f32.gmra.mrb[92].mxu1 %vm436_vm3, %v9336_v34 }
0x12c9   :  { %7065 = vmatprep.mubr.msk.f32.mxu1 %vm8023_vm2, %v8024_v19 }
0x12cb   :  { %v7662_v52 = vpop.permute.xlu0 %7661  ;;  %v5026_v29 = vpop.permute.xlu1 %5025 }
0x12cc   :  { %7066 = vmatmul.mubr.msk.f32.gmra.mrb[94].mxu1 %vm436_vm3, %v9350_v28  ;;  %v7664_v59 = vunpack.i.h.bf16 %v7662_v52  ;;  %v7663_v9 = vunpack.i.l.bf16 %v7662_v52 }
0x12cd   :  { %7088 = vmatpush3.xpose.msk.msra.mxu1 %vm436_vm3, %v4554_v6  ;;  %7089 = vmatprep.mubr.msk.f32.mxu1 %vm8023_vm2, %v8024_v19 }
0x12ce   :  { %7457 = vmatprep.subr.bf16.mxu1 %v8021_v3  ;;  %v7465_v2 = vpack.c.bf16 %v7664_v59, %v7663_v9 }
0x12cf   :  { %v4787_v30 = vpop.permute.xlu0 %4786  ;;  %v3444_v10 = vpop.permute.xlu1 %3443 }
0x12d0   :  { %7090 = vmatmul.mubr.msk.f32.vlgmr.msra.gmra.mrb[96].mxu1 %vm436_vm3, %v4544_v56 }
0x12d1   :  { %7460 = vmatpush3.bf16.xpose.msk.msra.mxu1 %vm8359_vm4, %v7458_v25  ;;  %7092 = vmatprep.mubr.msk.f32.mxu1 %vm8023_vm2, %v8024_v19 }
0x12d2   :  { %7117 = vmatprep.subr.mxu1 %v8024_v19 }
0x12d3   :  { %v5036_v16 = vpop.permute.xlu0 %5035 }
0x12d4   :  { %7093 = vmatmul.mubr.msk.f32.gmra.mrb[98].mxu1 %vm436_vm3, %v4546_v12 }
0x12d5   :  { %7095 = vmatprep.mubr.msk.f32.mxu1 %vm8023_vm2, %v8024_v19 }
0x12d7   :  { %v7667_v4 = vpop.permute.xlu0 %7666 }
0x12d8   :  { %v7669_v20 = vunpack.i.h.bf16 %v7667_v4  ;;  %v7668_v0 = vunpack.i.l.bf16 %v7667_v4  ;;  %7096 = vmatmul.mubr.msk.f32.gmra.mrb[100].mxu1 %vm436_vm3, %v4548_v43 }
0x12d9   :  { %7118 = vmatpush3.xpose.msk.msra.mxu1 %vm436_vm3, %v4795_v50  ;;  %7119 = vmatprep.mubr.msk.f32.mxu1 %vm8023_vm2, %v8024_v19 }
0x12da   :  { %v7420_v57 = vpack.c.bf16 %v7669_v20, %v7668_v0  ;;  %7464 = vmatprep.subr.bf16.mxu1 %v8021_v3 }
0x12dc   :  { %7120 = vmatmul.mubr.msk.f32.vlgmr.msra.gmra.mrb[102].mxu1 %vm436_vm3, %v4785_v40  ;;  %7421 = vmatpush3.bf16.msra.mxu0 %v7420_v57 }
0x12dd   :  { %7467 = vmatpush3.bf16.xpose.msk.msra.mxu1 %vm8359_vm4, %v7465_v2  ;;  %7122 = vmatprep.mubr.msk.f32.mxu1 %vm8023_vm2, %v8024_v19  ;;  %vm5941_vm4 = vcmask 1040384  }
0x12de   :  { %6952 = vmatprep.subr.mxu0 %v8024_v19  ;;  %7147 = vmatprep.subr.mxu1 %v8024_v19 }
0x12e0   :  { %7123 = vmatmul.mubr.msk.f32.gmra.mrb[104].mxu1 %vm436_vm3, %v4787_v30  ;;  %6953 = vmatpush3.msra.mxu0 %v3444_v10 }
0x12e1   :  { %7125 = vmatprep.mubr.msk.f32.mxu1 %vm8023_vm2, %v8024_v19  ;;  %7426 = vmatprep.subr.bf16.mxu0 %v8021_v3 }
0x12e4   :  { %7126 = vmatmul.mubr.msk.f32.gmra.mrb[106].mxu1 %vm436_vm3, %v4789_v24 }
0x12e5   :  { %7148 = vmatpush3.xpose.msk.msra.mxu1 %vm436_vm3, %v5036_v16  ;;  %7149 = vmatprep.mubr.msk.f32.mxu1 %vm8023_vm2, %v8024_v19 }
0x12e8   :  { %7150 = vmatmul.mubr.msk.f32.vlgmr.msra.gmra.mrb[108].mxu1 %vm436_vm3, %v5026_v29 }
0x12e9   :  { %7152 = vmatprep.mubr.msk.f32.mxu1 %vm8023_vm2, %v8024_v19 }
0x135a   :  { %v3386_v26 = vpop.f32.mrb[66].mxu0 }
0x135b   :  { %v3400_v55 = vmul.f32 0.35355338, %v3386_v26  ;;  %v6941_v36 = vpop.f32.mrb[67].mxu0  ;;  %v3627_v53 = vpop.f32.mrb[72].mxu1 }
0x135c   :  { %v3641_v48 = vmul.f32 0.35355338, %v3627_v53  ;;  %v6971_v32 = vpop.f32.mrb[73].mxu1 }
0x135d   :  { %v9496_v21 = vadd.f32 %v3400_v55, %v8381_v31 }
0x135e   :  { %v3391_v60 = vpop.f32.mrb[68].mxu0  ;;  %v9499_v11 = vadd.f32 %v3641_v48, %v8381_v31 }
0x135f   :  { %v3401_v5 = vmul.f32 0.35355338, %v3391_v60  ;;  %v6944_v1 = vpop.f32.mrb[69].mxu0  ;;  %v3632_v13 = vpop.f32.mrb[74].mxu1  ;;  %v3406_v37 = vsel %vm535_vm6, %v9496_v21, -inf }
0x1360   :  { %v6974_v15 = vpop.f32.mrb[75].mxu1  ;;  %3407 = vmax.xlane.f32.xlu0 %v3406_v37  ;;  %v3647_v39 = vsel %vm535_vm6, %v9499_v11, -inf  ;;  %v3642_v55 = vmul.f32 0.35355338, %v3632_v13 }
0x1361   :  { %v9504_v47 = vadd.f32 %v3401_v5, %v8381_v31 }
0x1362   :  { %v3396_v33 = vpop.f32.mrb[70].mxu0  ;;  %v9536_v32 = vadd.f32 %v3642_v55, %v8381_v31 }
0x1363   :  { %v3402_v49 = vmul.f32 0.35355338, %v3396_v33  ;;  %v6947_v44 = vpop.f32.mrb[71].mxu0  ;;  %v3637_v51 = vpop.f32.mrb[76].mxu1  ;;  %v3409_v6 = vsel %vm535_vm6, %v9504_v47, -inf }
0x1364   :  { %v3643_v12 = vmul.f32 0.35355338, %v3637_v51  ;;  %v6977_v61 = vpop.f32.mrb[77].mxu1  ;;  %3648 = vmax.xlane.f32.xlu0 %v3647_v39  ;;  %3410 = vmax.xlane.f32.xlu1 %v3409_v6  ;;  %v3650_v13 = vsel %vm535_vm6, %v9536_v32, -inf }
0x1365   :  { %v9511_v56 = vadd.f32 %v3402_v49, %v8381_v31 }
0x1366   :  { %v9514_v50 = vadd.f32 %v3643_v12, %v8381_v31 }
0x1367   :  { %v3412_v43 = vsel %vm535_vm6, %v9511_v56, -inf }
0x1368   :  { %3413 = vmax.xlane.f32.xlu0 %v3412_v43  ;;  %v3653_v58 = vsel %vm535_vm6, %v9514_v50, -inf }
0x136b   :  { %v3868_v18 = vpop.f32.mrb[78].mxu1 }
0x136c   :  { %v7001_v52 = vpop.f32.mrb[79].mxu1  ;;  %3654 = vmax.xlane.f32.xlu0 %v3653_v58  ;;  %v3882_v60 = vmul.f32 0.35355338, %v3868_v18 }
0x136e   :  { %v9541_v37 = vadd.f32 %v3882_v60, %v8381_v31 }
0x136f   :  { %v3873_v40 = vpop.f32.mrb[80].mxu1 }
0x1370   :  { %v3883_v25 = vmul.f32 0.35355338, %v3873_v40  ;;  %v7004_v30 = vpop.f32.mrb[81].mxu1  ;;  %v3888_v12 = vsel %vm535_vm6, %v9541_v37, -inf }
0x1372   :  { %v9521_v24 = vadd.f32 %v3883_v25, %v8381_v31 }
0x1373   :  { %v3878_v16 = vpop.f32.mrb[82].mxu1 }
0x1374   :  { %v7007_v59 = vpop.f32.mrb[83].mxu1  ;;  %v3891_v9 = vsel %vm535_vm6, %v9521_v24, -inf  ;;  %v3884_v15 = vmul.f32 0.35355338, %v3878_v16 }
0x1375   :  { %3892 = vmax.xlane.f32.xlu0 %v3891_v9  ;;  %7686 = vrot.lane.b32.xlu1 %v9340_v62, %s8026_s29 }
0x1376   :  { %v9546_v44 = vadd.f32 %v3884_v15, %v8381_v31 }
0x1377   :  { %v4109_v4 = vpop.f32.mrb[84].mxu1 }
0x1378   :  { %v4123_v20 = vmul.f32 0.35355338, %v4109_v4  ;;  %v7031_v0 = vpop.f32.mrb[85].mxu1  ;;  %v3894_v25 = vsel %vm535_vm6, %v9546_v44, -inf }
0x137a   :  { %v9528_v29 = vadd.f32 %v4123_v20, %v8381_v31 }
0x137c   :  { %v4129_v57 = vsel %vm535_vm6, %v9528_v29, -inf }
0x137d   :  { %4130 = vmax.xlane.f32.xlu0 %v4129_v57 }
0x138b   :  { %v4114_v2 = vpop.f32.mrb[86].mxu1 }
0x138c   :  { %v7034_v10 = vpop.f32.mrb[87].mxu1  ;;  %v4124_v51 = vmul.f32 0.35355338, %v4114_v2 }
0x138e   :  { %v9554_v18 = vadd.f32 %v4124_v51, %v8381_v31 }
0x138f   :  { %v4119_v26 = vpop.f32.mrb[88].mxu1 }
0x1390   :  { %v4125_v36 = vmul.f32 0.35355338, %v4119_v26  ;;  %v7037_v53 = vpop.f32.mrb[89].mxu1  ;;  %v4132_v20 = vsel %vm535_vm6, %v9554_v18, -inf }
0x1392   :  { %v9533_v48 = vadd.f32 %v4125_v36, %v8381_v31 }
0x1394   :  { %v4135_v5 = vsel %vm535_vm6, %v9533_v48, -inf }
0x1395   :  { %4136 = vmax.xlane.f32.xlu0 %v4135_v5 }
0x1397   :  { %v4392_v1 = vpop.f32.mrb[90].mxu1 }
0x1398   :  { %v7061_v33 = vpop.f32.mrb[91].mxu1  ;;  %v4406_v58 = vmul.f32 0.35355338, %v4392_v1 }
0x1399   :  { %3651 = vmax.xlane.f32.xlu1 %v3650_v13 }
0x139a   :  { %v9561_v16 = vadd.f32 %v4406_v58, %v8381_v31 }
0x139b   :  { %v4397_v49 = vpop.f32.mrb[92].mxu1 }
0x139c   :  { %v4407_v39 = vmul.f32 0.35355338, %v4397_v49  ;;  %v7064_v6 = vpop.f32.mrb[93].mxu1  ;;  %v4412_v36 = vsel %vm535_vm6, %v9561_v16, -inf }
0x139d   :  { %3889 = vmax.xlane.f32.xlu1 %v3888_v12 }
0x139e   :  { %v9551_v61 = vadd.f32 %v4407_v39, %v8381_v31 }
0x139f   :  { %v4402_v43 = vpop.f32.mrb[94].mxu1 }
0x13a0   :  { %v7067_v52 = vpop.f32.mrb[95].mxu1  ;;  %v4415_v40 = vsel %vm535_vm6, %v9551_v61, -inf  ;;  %v4408_v59 = vmul.f32 0.35355338, %v4402_v43 }
0x13a1   :  { %4416 = vmax.xlane.f32.xlu0 %v4415_v40  ;;  %3895 = vmax.xlane.f32.xlu1 %v3894_v25 }
0x13a2   :  { %v9569_v2 = vadd.f32 %v4408_v59, %v8381_v31 }
0x13a3   :  { %v4633_v30 = vpop.f32.mrb[96].mxu1 }
0x13a4   :  { %v4647_v9 = vmul.f32 0.35355338, %v4633_v30  ;;  %v7091_v4 = vpop.f32.mrb[97].mxu1  ;;  %v4418_v15 = vsel %vm535_vm6, %v9569_v2, -inf }
0x13a5   :  { %4133 = vmax.xlane.f32.xlu1 %v4132_v20 }
0x13a6   :  { %v9566_v0 = vadd.f32 %v4647_v9, %v8381_v31 }
0x13a7   :  { %v4638_v57 = vpop.f32.mrb[98].mxu1 }
0x13a8   :  { %v4648_v10 = vmul.f32 0.35355338, %v4638_v57  ;;  %v7094_v26 = vpop.f32.mrb[99].mxu1  ;;  %v4653_v55 = vsel %vm535_vm6, %v9566_v0, -inf }
0x13a9   :  { %4654 = vmax.xlane.f32.xlu0 %v4653_v55  ;;  %4413 = vmax.xlane.f32.xlu1 %v4412_v36 }
0x13aa   :  { %v9576_v60 = vadd.f32 %v4648_v10, %v8381_v31 }
0x13ab   :  { %v4643_v53 = vpop.f32.mrb[100].mxu1 }
0x13ac   :  { %v4649_v5 = vmul.f32 0.35355338, %v4643_v53  ;;  %v7097_v1 = vpop.f32.mrb[101].mxu1  ;;  %v4656_v6 = vsel %vm535_vm6, %v9576_v60, -inf }
0x13ad   :  { %4419 = vmax.xlane.f32.xlu1 %v4418_v15  ;;  %v9609_v1 = vpop.permute.xlu1 %7671 }
0x13ae   :  { %v9581_v33 = vadd.f32 %v4649_v5, %v8381_v31  ;;  %v9607_v5 = vpop.permute.xlu0 %3684 }
0x13af   :  { %v4874_v13 = vpop.f32.mrb[102].mxu1 }
0x13b0   :  { %v4888_v49 = vmul.f32 0.35355338, %v4874_v13  ;;  %v7121_v51 = vpop.f32.mrb[103].mxu1  ;;  %v4659_v39 = vsel %vm535_vm6, %v9581_v33, -inf }
0x13b1   :  { %4660 = vmax.xlane.f32.xlu0 %v4659_v39  ;;  %4657 = vmax.xlane.f32.xlu1 %v4656_v6  ;;  %v9613_v13 = vpop.permute.xlu1 %7676 }
0x13b2   :  { %v9588_v12 = vadd.f32 %v4888_v49, %v8381_v31  ;;  %v9611_v15 = vpop.permute.xlu0 %3925 }
0x13b3   :  { %v4879_v43 = vpop.f32.mrb[104].mxu1 }
0x13b4   :  { %v4889_v58 = vmul.f32 0.35355338, %v4879_v43  ;;  %v7124_v52 = vpop.f32.mrb[105].mxu1  ;;  %v4894_v40 = vsel %vm535_vm6, %v9588_v12, -inf }
0x13b5   :  { %4895 = vmax.xlane.f32.xlu1 %v4894_v40  ;;  %v9617_v51 = vpop.permute.xlu1 %7681 }
0x13b6   :  { %v9593_v25 = vadd.f32 %v4889_v58, %v8381_v31  ;;  %v9615_v49 = vpop.permute.xlu0 %4166 }
0x13b7   :  { %v4884_v30 = vpop.f32.mrb[106].mxu1 }
0x13b8   :  { %v4890_v59 = vmul.f32 0.35355338, %v4884_v30  ;;  %v7127_v9 = vpop.f32.mrb[107].mxu1  ;;  %v4897_v4 = vsel %vm535_vm6, %v9593_v25, -inf }
0x13b9   :  { %4898 = vmax.xlane.f32.xlu0 %v4897_v4 }
0x13ba   :  { %v9598_v20 = vadd.f32 %v4890_v59, %v8381_v31 }
0x13bb   :  { %v5115_v57 = vpop.f32.mrb[108].mxu1 }
0x13bc   :  { %v5129_v10 = vmul.f32 0.35355338, %v5115_v57  ;;  %v7151_v26 = vpop.f32.mrb[109].mxu1  ;;  %v4900_v55 = vsel %vm535_vm6, %v9598_v20, -inf }
0x13bd   :  { %4901 = vmax.xlane.f32.xlu1 %v4900_v55 }
0x13be   :  { %v9603_v36 = vadd.f32 %v5129_v10, %v8381_v31 }
0x13c0   :  { %v5135_v53 = vsel %vm535_vm6, %v9603_v36, -inf }
0x13c1   :  { %5136 = vmax.xlane.f32.xlu0 %v5135_v53 }
0x13ed   :  { %v3408_v39 = vpop.xlane.xlu0 %3407 }
0x13ee   :  { %v3415_v6 = vsub.f32 %v9496_v21, %v3408_v39 }
0x13f0   :  { %v3418_v43 = vmul.f32 1.442695, %v3415_v6 }
0x13f1   :  { %v3649_v58 = vpop.xlane.xlu0 %3648  ;;  %v3411_v52 = vpop.xlane.xlu1 %3410 }
0x13f2   :  { %7861 = vpow2.f32 %v3418_v43  ;;  %v3656_v40 = vsub.f32 %v9499_v11, %v3649_v58  ;;  %v3416_v30 = vsub.f32 %v9504_v47, %v3411_v52 }
0x13f4   :  { %v3659_v59 = vmul.f32 1.442695, %v3656_v40  ;;  %v3420_v9 = vmul.f32 1.442695, %v3416_v30 }
0x13f5   :  { %v3414_v47 = vpop.xlane.xlu0 %3413  ;;  %v9636_v39 = vpop.permute.xlu1 %7686 }
0x13f6   :  { %7863 = vpow2.f32 %v3659_v59  ;;  %v3417_v6 = vsub.f32 %v9511_v56, %v3414_v47 }
0x13f7   :  { %7865 = vpow2.f32 %v3420_v9 }
0x13f8   :  { %v3422_v30 = vmul.f32 1.442695, %v3417_v6 }
0x13f9   :  { %v3655_v55 = vpop.xlane.xlu0 %3654 }
0x13fa   :  { %v3658_v59 = vsub.f32 %v9514_v50, %v3655_v55 }
0x13fc   :  { %v9622_v4 = vpop.eup %7861  ;;  %v3663_v8 = vmul.f32 1.442695, %v3658_v59 }
0x13fd   :  { %v3424_v57 = vsel %vm535_vm6, %v9622_v4, 0.0 }
0x13fe   :  { %3425 = vadd.xlane.f32.xlu1 %v3424_v57 }
0x1400   :  { %v9626_v10 = vpop.eup %7863 }
0x1401   :  { %v3665_v21 = vsel %vm535_vm6, %v9626_v10, 0.0  ;;  %v9630_v26 = vpop.eup %7865 }
0x1402   :  { %3666 = vadd.xlane.f32.xlu0 %v3665_v21  ;;  %v3427_v11 = vsel %vm535_vm6, %v9630_v26, 0.0  ;;  %v3893_v53 = vpop.xlane.xlu0 %3892 }
0x1403   :  { %v3898_v43 = vsub.f32 %v9521_v24, %v3893_v53 }
0x1405   :  { %v3902_v9 = vmul.f32 1.442695, %v3898_v43 }
0x1406   :  { %3428 = vadd.xlane.f32.xlu0 %v3427_v11 }
0x140a   :  { %v4131_v58 = vpop.xlane.xlu0 %4130 }
0x140b   :  { %v4138_v57 = vsub.f32 %v9528_v29, %v4131_v58 }
0x140d   :  { %v4141_v24 = vmul.f32 1.442695, %v4138_v57 }
0x141c   :  { %4449 = vrot.lane.b32.xlu0 %v9350_v28, %s8026_s29 }
0x1422   :  { %v4137_v21 = vpop.xlane.xlu0 %4136 }
0x1423   :  { %v4140_v56 = vsub.f32 %v9533_v48, %v4137_v21 }
0x1426   :  { %v3652_v52 = vpop.xlane.xlu1 %3651 }
0x1427   :  { %v3657_v40 = vsub.f32 %v9536_v32, %v3652_v52  ;;  %v4145_v32 = vmul.f32 1.442695, %v4140_v56 }
0x1429   :  { %v3661_v11 = vmul.f32 1.442695, %v3657_v40 }
0x142a   :  { %v3890_v41 = vpop.xlane.xlu1 %3889 }
0x142b   :  { %7867 = vpow2.f32 %v3661_v11  ;;  %v3897_v47 = vsub.f32 %v9541_v37, %v3890_v41 }
0x142c   :  { %7869 = vpow2.f32 %v3422_v30 }
0x142d   :  { %7871 = vpow2.f32 %v3902_v9  ;;  %v3900_v50 = vmul.f32 1.442695, %v3897_v47 }
0x142e   :  { %v3896_v53 = vpop.xlane.xlu1 %3895  ;;  %7873 = vpow2.f32 %v3663_v8  ;;  %v4417_v52 = vpop.xlane.xlu0 %4416 }
0x142f   :  { %7875 = vpow2.f32 %v4141_v24  ;;  %v3899_v55 = vsub.f32 %v9546_v44, %v3896_v53  ;;  %v4422_v56 = vsub.f32 %v9551_v61, %v4417_v52 }
0x1430   :  { %7877 = vpow2.f32 %v4145_v32 }
0x1431   :  { %7879 = vpow2.f32 %v3900_v50  ;;  %v3904_v43 = vmul.f32 1.442695, %v3899_v55  ;;  %v4426_v61 = vmul.f32 1.442695, %v4422_v56 }
0x1432   :  { %v4134_v29 = vpop.xlane.xlu1 %4133 }
0x1433   :  { %v4139_v58 = vsub.f32 %v9554_v18, %v4134_v29  ;;  %7881 = vpow2.f32 %v3904_v43 }
0x1435   :  { %v9646_v6 = vpop.eup %7867  ;;  %v4143_v37 = vmul.f32 1.442695, %v4139_v58 }
0x1436   :  { %v9649_v48 = vpop.eup %7869  ;;  %v4414_v40 = vpop.xlane.xlu1 %4413  ;;  %v3668_v8 = vsel %vm535_vm6, %v9646_v6, 0.0 }
0x1437   :  { %v9653_v41 = vpop.eup %7871  ;;  %3669 = vadd.xlane.f32.xlu1 %v3668_v8  ;;  %v4421_v44 = vsub.f32 %v9561_v16, %v4414_v40  ;;  %v4655_v59 = vpop.xlane.xlu0 %4654  ;;  %v3430_v18 = vsel %vm535_vm6, %v9649_v48, 0.0  ;;  %7883 = vpow2.f32 %v4143_v37 }
0x1438   :  { %v9656_v30 = vpop.eup %7873  ;;  %v3909_v57 = vsel %vm535_vm6, %v9653_v41, 0.0  ;;  %v4662_v29 = vsub.f32 %v9566_v0, %v4655_v59 }
0x1439   :  { %v9662_v21 = vpop.eup %7875  ;;  %v4424_v16 = vmul.f32 1.442695, %v4421_v44  ;;  %v3671_v32 = vsel %vm535_vm6, %v9656_v30, 0.0 }
0x143a   :  { %v4420_v9 = vpop.xlane.xlu1 %4419  ;;  %v9666_v47 = vpop.eup %7877  ;;  %v4147_v50 = vsel %vm535_vm6, %v9662_v21, 0.0 }
0x143b   :  { %v4423_v11 = vsub.f32 %v9569_v2, %v4420_v9  ;;  %3431 = vadd.xlane.f32.xlu1 %v3430_v18  ;;  %3910 = vadd.xlane.f32.xlu0 %v3909_v57  ;;  %v9672_v55 = vpop.eup %7879  ;;  %v4153_v40 = vsel %vm535_vm6, %v9666_v47, 0.0 }
0x143c   :  { %v3906_v52 = vsel %vm535_vm6, %v9672_v55, 0.0 }
0x143d   :  { %v4428_v24 = vmul.f32 1.442695, %v4423_v11  ;;  %v9680_v8 = vpop.eup %7881 }
0x143e   :  { %v4661_v53 = vpop.xlane.xlu0 %4660  ;;  %v4658_v58 = vpop.xlane.xlu1 %4657  ;;  %v3912_v0 = vsel %vm535_vm6, %v9680_v8, 0.0 }
0x143f   :  { %7885 = vpow2.f32 %v4428_v24  ;;  %v4664_v2 = vsub.f32 %v9581_v33, %v4661_v53  ;;  %3672 = vadd.xlane.f32.xlu1 %v3671_v32  ;;  %4148 = vadd.xlane.f32.xlu0 %v4147_v50  ;;  %v4665_v33 = vmul.f32 1.442695, %v4662_v29  ;;  %v4663_v37 = vsub.f32 %v9576_v60, %v4658_v58 }
0x1440   :  { %7887 = vpow2.f32 %v4424_v16 }
0x1441   :  { %v4669_v43 = vmul.f32 1.442695, %v4664_v2  ;;  %v9685_v44 = vpop.eup %7883  ;;  %v4667_v9 = vmul.f32 1.442695, %v4663_v37 }
0x1442   :  { %v4150_v18 = vsel %vm535_vm6, %v9685_v44, 0.0 }
0x1443   :  { %7889 = vpow2.f32 %v4669_v43  ;;  %3907 = vadd.xlane.f32.xlu1 %v3906_v52  ;;  %4154 = vadd.xlane.f32.xlu0 %v4153_v40 }
0x1444   :  { %7891 = vpow2.f32 %v4426_v61 }
0x1445   :  { %7893 = vpow2.f32 %v4665_v33  ;;  %v4896_v33 = vpop.xlane.xlu1 %4895 }
0x1446   :  { %7895 = vpow2.f32 %v4667_v9  ;;  %v4899_v29 = vpop.xlane.xlu0 %4898 }
0x1447   :  { %3913 = vadd.xlane.f32.xlu1 %v3912_v0 }
0x1449   :  { %v9687_v59 = vpop.eup %7885 }
0x144a   :  { %v4436_v57 = vsel %vm535_vm6, %v9687_v59, 0.0  ;;  %v9693_v11 = vpop.eup %7887  ;;  %v4902_v0 = vpop.xlane.xlu1 %4901 }
0x144b   :  { %4151 = vadd.xlane.f32.xlu1 %v4150_v18  ;;  %4437 = vadd.xlane.f32.xlu0 %v4436_v57  ;;  %v4430_v56 = vsel %vm535_vm6, %v9693_v11, 0.0  ;;  %v4904_v18 = vsub.f32 %v9593_v25, %v4899_v29 }
0x144d   :  { %v9695_v60 = vpop.eup %7889 }
0x144e   :  { %v4677_v16 = vsel %vm535_vm6, %v9695_v60, 0.0  ;;  %v9701_v24 = vpop.eup %7891  ;;  %v5137_v43 = vpop.xlane.xlu0 %5136 }
0x144f   :  { %4431 = vadd.xlane.f32.xlu1 %v4430_v56  ;;  %4678 = vadd.xlane.f32.xlu0 %v4677_v16  ;;  %v4433_v53 = vsel %vm535_vm6, %v9701_v24, 0.0  ;;  %v9705_v32 = vpop.eup %7893  ;;  %v5144_v58 = vsub.f32 %v9603_v36, %v5137_v43  ;;  %v4903_v36 = vsub.f32 %v9588_v12, %v4896_v33  ;;  %v4908_v56 = vmul.f32 1.442695, %v4904_v18 }
0x1450   :  { %v4671_v50 = vsel %vm535_vm6, %v9705_v32, 0.0  ;;  %v9709_v2 = vpop.eup %7895  ;;  %v4905_v16 = vsub.f32 %v9598_v20, %v4902_v0  ;;  %v7673_v43 = vunpack.i.l.bf16 %v9609_v1 }
0x1451   :  { %v4674_v61 = vsel %vm535_vm6, %v9709_v2, 0.0  ;;  %v5147_v52 = vmul.f32 1.442695, %v5144_v58  ;;  %v4906_v9 = vmul.f32 1.442695, %v4903_v36 }
0x1453   :  { %4434 = vadd.xlane.f32.xlu1 %v4433_v53  ;;  %7897 = vpow2.f32 %v5147_v52  ;;  %v4910_v53 = vmul.f32 1.442695, %v4905_v16 }
0x1457   :  { %4672 = vadd.xlane.f32.xlu1 %v4671_v50 }
0x145b   :  { %4675 = vadd.xlane.f32.xlu1 %v4674_v61  ;;  %v7674_v61 = vunpack.i.h.bf16 %v9609_v1 }
0x145d   :  { %v9724_v40 = vpop.eup %7897  ;;  %v7427_v29 = vpack.c.bf16 %v7674_v61, %v7673_v43 }
0x145e   :  { %v5153_v37 = vsel %vm535_vm6, %v9724_v40, 0.0 }
0x1465   :  { %7691 = vrot.lane.b32.xlu0 %v9340_v62, %s8029_s2 }
0x146c   :  { %4690 = vrot.lane.b32.xlu1 %v9350_v28, %s8029_s2 }
0x1470   :  { %7696 = vrot.lane.b32.xlu1 %v9340_v62, %s8034_s20 }
0x1474   :  { %4931 = vrot.lane.b32.xlu1 %v9350_v28, %s8034_s20 }
0x1478   :  { %7701 = vrot.lane.b32.xlu1 %v9340_v62, %s8035_s21 }
0x1484   :  { %5154 = vadd.xlane.f32.xlu0 %v5153_v37 }
0x148b   :  { %v3426_v57 = vpop.xlane.xlu1 %3425 }
0x148c   :  { %7899 = vrcp.f32 %v3426_v57 }
0x148d   :  { %7901 = vpow2.f32 %v4906_v9 }
0x148e   :  { %7903 = vpow2.f32 %v4908_v56 }
0x148f   :  { %v3667_v62 = vpop.xlane.xlu0 %3666 }
0x1493   :  { %v3429_v50 = vpop.xlane.xlu0 %3428 }
0x1494   :  { %7905 = vrcp.f32 %v3429_v50 }
0x1495   :  { %7907 = vpow2.f32 %v4910_v53  ;;  %v7679_v53 = vunpack.i.h.bf16 %v9613_v13 }
0x1496   :  { %v7900_v12 = vpop.eup %7899 }
0x1497   :  { %v3436_v58 = vmul.f32 %v7900_v12, %v9622_v4  ;;  %v9734_v25 = vpop.eup %7901  ;;  %v9762_v57 = vpop.permute.xlu0 %4449 }
0x1498   :  { %v4912_v20 = vsel %vm535_vm6, %v9734_v25, 0.0  ;;  %v9744_v1 = vpop.eup %7903 }
0x1499   :  { %6955 = vmatmul.mubr.msk.f32.vlgmr.msra.gmra.mrb[72].mxu0 %vm535_vm6, %v3436_v58  ;;  %v4915_v52 = vsel %vm535_vm6, %v9744_v1, 0.0 }
0x149a   :  { %7428 = vmatpush3.bf16.msra.mxu0 %v7427_v29  ;;  %5172 = vrot.lane.b32.xlu0 %v9350_v28, %s8035_s21 }
0x149b   :  { %6982 = vmatprep.subr.mxu0 %v8024_v19  ;;  %6957 = vmatprep.mubr.msk.f32.mxu0 %vm8023_vm2, %v8024_v19 }
0x149c   :  { %4913 = vadd.xlane.f32.xlu1 %v4912_v20  ;;  %v7684_v20 = vunpack.i.h.bf16 %v9617_v51 }
0x149e   :  { %v7906_v4 = vpop.eup %7905  ;;  %6983 = vmatpush3.msra.mxu0 %v9607_v5 }
0x149f   :  { %v3437_v33 = vmul.f32 %v7906_v4, %v9630_v26  ;;  %7433 = vmatprep.subr.bf16.mxu0 %v8021_v3  ;;  %v9751_v37 = vpop.eup %7907 }
0x14a0   :  { %4916 = vadd.xlane.f32.xlu1 %v4915_v52  ;;  %v4918_v36 = vsel %vm535_vm6, %v9751_v37, 0.0 }
0x14a1   :  { %6958 = vmatmul.mubr.msk.f32.gmra.mrb[74].mxu0 %vm535_vm6, %v3437_v33 }
0x14a2   :  { %6960 = vmatprep.mubr.msk.f32.mxu0 %vm8023_vm2, %v8024_v19 }
0x14a4   :  { %4919 = vadd.xlane.f32.xlu1 %v4918_v36 }
0x14b5   :  { %5027 = vrot.lane.b32.xlu1 %v9336_v34, %s8033_s19  ;;  %v7678_v34 = vunpack.i.l.bf16 %v9613_v13 }
0x14b7   :  { %v7434_v43 = vpack.c.bf16 %v7679_v53, %v7678_v34 }
0x14b9   :  { %5029 = vrot.lane.b32.xlu1 %v9350_v28, %s8033_s19 }
0x14c4   :  { %v3670_v5 = vpop.xlane.xlu1 %3669 }
0x14c8   :  { %v3432_v26 = vpop.xlane.xlu1 %3431 }
0x14c9   :  { %7909 = vrcp.f32 %v3432_v26 }
0x14ca   :  { %7911 = vrcp.f32 %v3667_v62  ;;  %v3911_v62 = vpop.xlane.xlu0 %3910 }
0x14cb   :  { %7913 = vrcp.f32 %v3670_v5 }
0x14cc   :  { %v3673_v0 = vpop.xlane.xlu1 %3672 }
0x14cd   :  { %7915 = vrcp.f32 %v3673_v0 }
0x14d0   :  { %v3908_v9 = vpop.xlane.xlu1 %3907 }
0x14d1   :  { %7917 = vrcp.f32 %v3908_v9  ;;  %v7689_v9 = vunpack.i.h.bf16 %v9636_v39 }
0x14d2   :  { %7919 = vrcp.f32 %v3911_v62 }
0x14d3   :  { %v7910_v18 = vpop.eup %7909 }
0x14d4   :  { %v3438_v56 = vmul.f32 %v7910_v18, %v9649_v48  ;;  %v7912_v16 = vpop.eup %7911  ;;  %v3914_v50 = vpop.xlane.xlu1 %3913 }
0x14d5   :  { %v3677_v28 = vmul.f32 %v7912_v16, %v9626_v10  ;;  %v7914_v61 = vpop.eup %7913  ;;  %7921 = vrcp.f32 %v3914_v50  ;;  %v4149_v10 = vpop.xlane.xlu0 %4148 }
0x14d6   :  { %6961 = vmatmul.mubr.msk.f32.gmra.mrb[76].mxu0 %vm535_vm6, %v3438_v56  ;;  %v3678_v13 = vmul.f32 %v7914_v61, %v9646_v6  ;;  %v7683_v6 = vunpack.i.l.bf16 %v9617_v51  ;;  %7923 = vrcp.f32 %v4149_v10 }
0x14d7   :  { %6984 = vmatprep.mubr.msk.f32.mxu0 %vm8023_vm2, %v8024_v19  ;;  %v7916_v48 = vpop.eup %7915 }
0x14d8   :  { %v4152_v12 = vpop.xlane.xlu1 %4151  ;;  %v3679_v58 = vmul.f32 %v7916_v48, %v9656_v30  ;;  %v7441_v33 = vpack.c.bf16 %v7684_v20, %v7683_v6 }
0x14d9   :  { %v4155_v36 = vpop.xlane.xlu0 %4154  ;;  %7925 = vrcp.f32 %v4152_v12 }
0x14da   :  { %6985 = vmatmul.mubr.msk.f32.vlgmr.msra.gmra.mrb[78].mxu0 %vm535_vm6, %v3677_v28  ;;  %7927 = vrcp.f32 %v4155_v36 }
0x14db   :  { %7435 = vmatpush3.bf16.msra.mxu0 %v7434_v43  ;;  %6987 = vmatprep.mubr.msk.f32.mxu0 %vm8023_vm2, %v8024_v19  ;;  %v7918_v29 = vpop.eup %7917 }
0x14dc   :  { %7012 = vmatprep.subr.mxu0 %v8024_v19  ;;  %v4432_v4 = vpop.xlane.xlu1 %4431  ;;  %v7920_v52 = vpop.eup %7919 }
0x14dd   :  { %v3919_v51 = vmul.f32 %v7920_v52, %v9653_v41  ;;  %v4438_v5 = vpop.xlane.xlu0 %4437  ;;  %v7688_v41 = vunpack.i.l.bf16 %v9636_v39  ;;  %7929 = vrcp.f32 %v4432_v4 }
0x14de   :  { %6988 = vmatmul.mubr.msk.f32.gmra.mrb[80].mxu0 %vm535_vm6, %v3678_v13 }
0x14df   :  { %7013 = vmatpush3.msra.mxu0 %v9611_v15  ;;  %6990 = vmatprep.mubr.msk.f32.mxu0 %vm8023_vm2, %v8024_v19  ;;  %v3918_v15 = vmul.f32 %v7918_v29, %v9672_v55  ;;  %v7922_v30 = vpop.eup %7921  ;;  %v7448_v53 = vpack.c.bf16 %v7689_v9, %v7688_v41 }
0x14e0   :  { %7440 = vmatprep.subr.bf16.mxu0 %v8021_v3  ;;  %v4435_v26 = vpop.xlane.xlu1 %4434  ;;  %v3920_v55 = vmul.f32 %v7922_v30, %v9680_v8  ;;  %v7924_v0 = vpop.eup %7923 }
0x14e1   :  { %v4679_v18 = vpop.xlane.xlu0 %4678  ;;  %7931 = vrcp.f32 %v4435_v26 }
0x14e2   :  { %6991 = vmatmul.mubr.msk.f32.gmra.mrb[82].mxu0 %vm535_vm6, %v3679_v58  ;;  %7933 = vrcp.f32 %v4438_v5 }
0x14e3   :  { %7014 = vmatprep.mubr.msk.f32.mxu0 %vm8023_vm2, %v8024_v19  ;;  %v7926_v16 = vpop.eup %7925 }
0x14e4   :  { %v4673_v56 = vpop.xlane.xlu1 %4672  ;;  %v4160_v39 = vmul.f32 %v7926_v16, %v9685_v44  ;;  %v7928_v8 = vpop.eup %7927 }
0x14e5   :  { %v7692_v34 = vpop.permute.xlu0 %7691  ;;  %7935 = vrcp.f32 %v4673_v56 }
0x14e6   :  { %7015 = vmatmul.mubr.msk.f32.vlgmr.msra.gmra.mrb[84].mxu0 %vm535_vm6, %v3918_v15  ;;  %v7694_v50 = vunpack.i.h.bf16 %v7692_v34  ;;  %v7693_v61 = vunpack.i.l.bf16 %v7692_v34 }
0x14e7   :  { %7442 = vmatpush3.bf16.msra.mxu0 %v7441_v33  ;;  %7017 = vmatprep.mubr.msk.f32.mxu0 %vm8023_vm2, %v8024_v19  ;;  %v7930_v62 = vpop.eup %7929 }
0x14e8   :  { %7042 = vmatprep.subr.mxu0 %v8024_v19  ;;  %v4676_v28 = vpop.xlane.xlu1 %4675  ;;  %v4442_v44 = vmul.f32 %v7930_v62, %v9693_v11  ;;  %v7455_v13 = vpack.c.bf16 %v7694_v50, %v7693_v61 }
0x14e9   :  { %7937 = vrcp.f32 %v4676_v28 }
0x14ea   :  { %7018 = vmatmul.mubr.msk.f32.gmra.mrb[86].mxu0 %vm535_vm6, %v3919_v51  ;;  %7939 = vrcp.f32 %v4679_v18 }
0x14eb   :  { %7043 = vmatpush3.msra.mxu0 %v9615_v49  ;;  %7020 = vmatprep.mubr.msk.f32.mxu0 %vm8023_vm2, %v8024_v19  ;;  %v4159_v49 = vmul.f32 %v7924_v0, %v9662_v21  ;;  %v4161_v21 = vmul.f32 %v7928_v8, %v9666_v47 }
0x14ec   :  { %7447 = vmatprep.subr.bf16.mxu0 %v8021_v3  ;;  %v4691_v43 = vpop.permute.xlu1 %4690 }
0x14ee   :  { %7021 = vmatmul.mubr.msk.f32.gmra.mrb[88].mxu0 %vm535_vm6, %v3920_v55 }
0x14ef   :  { %7044 = vmatprep.mubr.msk.f32.mxu0 %vm8023_vm2, %v8024_v19 }
0x14f0   :  { %v7697_v12 = vpop.permute.xlu1 %7696 }
0x14f1   :  { %v7699_v58 = vunpack.i.h.bf16 %v7697_v12  ;;  %v7698_v29 = vunpack.i.l.bf16 %v7697_v12  ;;  %v6248_v12 = vld [vmem:[%s10162_s4 + $0x38] sm:$0xff] }
0x14f2   :  { %7045 = vmatmul.mubr.msk.f32.vlgmr.msra.gmra.mrb[90].mxu0 %vm535_vm6, %v4159_v49 }
0x14f3   :  { %7449 = vmatpush3.bf16.msra.mxu0 %v7448_v53  ;;  %7047 = vmatprep.mubr.msk.f32.mxu0 %vm8023_vm2, %v8024_v19  ;;  %v7462_v6 = vpack.c.bf16 %v7699_v58, %v7698_v29 }
0x14f4   :  { %7072 = vmatprep.subr.mxu0 %v8024_v19  ;;  %v4932_v4 = vpop.permute.xlu1 %4931 }
0x14f6   :  { %7048 = vmatmul.mubr.msk.f32.gmra.mrb[92].mxu0 %vm535_vm6, %v4160_v39 }
0x14f7   :  { %7073 = vmatpush3.msra.mxu0 %v9762_v57  ;;  %7050 = vmatprep.mubr.msk.f32.mxu0 %vm8023_vm2, %v8024_v19  ;;  %v7932_v57 = vpop.eup %7931 }
0x14f8   :  { %7454 = vmatprep.subr.bf16.mxu0 %v8021_v3  ;;  %v4443_v47 = vmul.f32 %v7932_v57, %v9701_v24  ;;  %v7934_v48 = vpop.eup %7933  ;;  %v7702_v52 = vpop.permute.xlu1 %7701 }
0x14f9   :  { %v4444_v11 = vmul.f32 %v7934_v48, %v9687_v59  ;;  %v7936_v10 = vpop.eup %7935  ;;  %v7704_v30 = vunpack.i.h.bf16 %v7702_v52  ;;  %v7703_v5 = vunpack.i.l.bf16 %v7702_v52  ;;  %v6247_v48 = vld [vmem:[%s10162_s4 + $0x30] sm:$0xff] }
0x14fa   :  { %7051 = vmatmul.mubr.msk.f32.gmra.mrb[94].mxu0 %vm535_vm6, %v4161_v21  ;;  %v4683_v24 = vmul.f32 %v7936_v10, %v9705_v32  ;;  %v7938_v20 = vpop.eup %7937  ;;  %v7475_v10 = vpack.c.bf16 %v6248_v12, %v6247_v48 }
0x14fb   :  { %7074 = vmatprep.mubr.msk.f32.mxu0 %vm8023_vm2, %v8024_v19  ;;  %v4684_v59 = vmul.f32 %v7938_v20, %v9709_v2  ;;  %v7940_v15 = vpop.eup %7939  ;;  %v7469_v0 = vpack.c.bf16 %v7704_v30, %v7703_v5 }
0x14fc   :  { %v4685_v32 = vmul.f32 %v7940_v15, %v9695_v60 }
0x14fe   :  { %7075 = vmatmul.mubr.msk.f32.vlgmr.msra.gmra.mrb[96].mxu0 %vm535_vm6, %v4442_v44  ;;  %v6245_v44 = vld [vmem:[%s10162_s4 + $0x20] sm:$0xff] }
0x14ff   :  { %7456 = vmatpush3.bf16.msra.mxu0 %v7455_v13  ;;  %7077 = vmatprep.mubr.msk.f32.mxu0 %vm8023_vm2, %v8024_v19 }
0x1500   :  { %7102 = vmatprep.subr.mxu0 %v8024_v19 }
0x1502   :  { %7078 = vmatmul.mubr.msk.f32.gmra.mrb[98].mxu0 %vm535_vm6, %v4443_v47 }
0x1503   :  { %7103 = vmatpush3.msra.mxu0 %v4691_v43  ;;  %7080 = vmatprep.mubr.msk.f32.mxu0 %vm8023_vm2, %v8024_v19  ;;  %v6246_v43 = vld [vmem:[%s10162_s4 + $0x28] sm:$0xff]  ;;  %s6058_s4 = sshll.u32 %s8040_s18, 4  ;;  %s6059_s4 = int_to_ptr.vmem [resolvable:$true] %s6058_s4 }
0x1504   :  { %7461 = vmatprep.subr.bf16.mxu0 %v8021_v3  ;;  %v7471_v13 = vpack.c.bf16 %v6246_v43, %v6245_v44  ;;  %s7997_s19 = scalar_lea.vmem %s6059_s4, 32  ;;  %p8002_p1 = scmp.lt.s32.totalorder %s6059_s4, %s6059_s4 }
0x1505   :  { %p7998_p0 = scmp.ne.s32.totalorder %s6059_s4, %s7997_s19  ;;  %p8003_p2 = scmp.lt.s32.totalorder %s7997_s19, %s7997_s19 }
0x1506   :  { %7081 = vmatmul.mubr.msk.f32.gmra.mrb[100].mxu0 %vm535_vm6, %v4444_v11  ;;  %7472 = vmatprep.subr.bf16.mxu1 %v7471_v13 }
0x1507   :  { %7104 = vmatprep.mubr.msk.f32.mxu0 %vm8023_vm2, %v8024_v19  ;;  %7474 = vmatpush3.bf16.msra.mxu1 %v7471_v13  ;;  %p8004_p3 = por %p8003_p2, %p8002_p1 }
0x1508   :  { %7476 = vmatprep.subr.bf16.mxu1 %v7475_v10 }
0x1509   :  { %p8005_p4 = pnand %p8004_p3, %p7998_p0 }
0x150a   :  { %7105 = vmatmul.mubr.msk.f32.vlgmr.msra.gmra.mrb[102].mxu0 %vm535_vm6, %v4683_v24 }
0x150b   :  { %7463 = vmatpush3.bf16.msra.mxu0 %v7462_v6  ;;  %7107 = vmatprep.mubr.msk.f32.mxu0 %vm8023_vm2, %v8024_v19 }
0x150c   :  { %7132 = vmatprep.subr.mxu0 %v8024_v19  ;;  %7478 = vmatpush3.bf16.msra.mxu1 %v7475_v10 }
0x150e   :  { %7108 = vmatmul.mubr.msk.f32.gmra.mrb[104].mxu0 %vm535_vm6, %v4684_v59 }
0x150f   :  { %7133 = vmatpush3.msra.mxu0 %v4932_v4  ;;  %7110 = vmatprep.mubr.msk.f32.mxu0 %vm8023_vm2, %v8024_v19 }
0x1510   :  { %7468 = vmatprep.subr.bf16.mxu0 %v8021_v3 }
0x1511   :  { %v5155_v36 = vpop.xlane.xlu0 %5154 }
0x1512   :  { %7111 = vmatmul.mubr.msk.f32.gmra.mrb[106].mxu0 %vm535_vm6, %v4685_v32 }
0x1513   :  { %7134 = vmatprep.mubr.msk.f32.mxu0 %vm8023_vm2, %v8024_v19 }
0x1529   :  { %v4914_v33 = vpop.xlane.xlu1 %4913 }
0x152a   :  { %7941 = vrcp.f32 %v4914_v33 }
0x152d   :  { %v4917_v2 = vpop.xlane.xlu1 %4916 }
0x152e   :  { %7943 = vrcp.f32 %v4917_v2 }
0x1531   :  { %v4920_v51 = vpop.xlane.xlu1 %4919 }
0x1532   :  { %7945 = vrcp.f32 %v4920_v51 }
0x1533   :  { %7947 = vrcp.f32 %v5155_v36 }
0x1534   :  { %v7942_v26 = vpop.eup %7941 }
0x1535   :  { %v4924_v60 = vmul.f32 %v7942_v26, %v9734_v25  ;;  %v5028_v55 = vpop.permute.xlu1 %5027  ;;  %v5173_v25 = vpop.permute.xlu0 %5172 }
0x1536   :  { %7153 = vmatmul.mubr.msk.f32.gmra.mrb[110].mxu1 %vm436_vm3, %v5028_v55 }
0x1537   :  { %7135 = vmatmul.mubr.msk.f32.vlgmr.msra.gmra.mrb[108].mxu0 %vm535_vm6, %v4924_v60  ;;  %7155 = vmatprep.mubr.msk.f32.mxu1 %vm8023_vm2, %v8024_v19 }
0x1538   :  { %v7944_v9 = vpop.eup %7943  ;;  %7470 = vmatpush3.bf16.msra.mxu0 %v7469_v0  ;;  %7137 = vmatprep.mubr.msk.f32.mxu0 %vm8023_vm2, %v8024_v19 }
0x1539   :  { %v5030_v41 = vpop.permute.xlu1 %5029  ;;  %7162 = vmatprep.subr.mxu0 %v8024_v19  ;;  %v4925_v49 = vmul.f32 %v7944_v9, %v9744_v1 }
0x153a   :  { %7156 = vmatmul.mubr.msk.f32.gmra.mrb[112].mxu1 %vm436_vm3, %v5030_v41 }
0x153b   :  { %7138 = vmatmul.mubr.msk.f32.gmra.mrb[110].mxu0 %vm535_vm6, %v4925_v49 }
0x153c   :  { %v7946_v18 = vpop.eup %7945  ;;  %7163 = vmatpush3.msra.mxu0 %v5173_v25  ;;  %7140 = vmatprep.mubr.msk.f32.mxu0 %vm8023_vm2, %v8024_v19 }
0x153d   :  { %v4926_v56 = vmul.f32 %v7946_v18, %v9751_v37  ;;  %v7948_v16 = vpop.eup %7947 }
0x153e   :  { %v5165_v1 = vmul.f32 %v7948_v16, %v9724_v40 }
0x153f   :  { %7141 = vmatmul.mubr.msk.f32.gmra.mrb[112].mxu0 %vm535_vm6, %v4926_v56 }
0x1540   :  { %7164 = vmatprep.mubr.msk.f32.mxu0 %vm8023_vm2, %v8024_v19 }
0x1543   :  { %7165 = vmatmul.mubr.msk.f32.vlgmr.msra.gmra.mrb[114].mxu0 %vm535_vm6, %v5165_v1 }
0x1544   :  { %7167 = vmatprep.mubr.msk.f32.mxu0 %vm8023_vm2, %v8024_v19 }
0x156c   :  { %v9868_v53 = vpop.f32.mrb[72].mxu0 }
0x156d   :  { %v6956_v39 = vpop.f32.mrb[73].mxu0 }
0x1574   :  { %v9870_v8 = vpop.f32.mrb[74].mxu0 }
0x1575   :  { %v6959_v34 = vpop.f32.mrb[75].mxu0 }
0x15a9   :  { %v9872_v37 = vpop.f32.mrb[76].mxu0 }
0x15aa   :  { %v6962_v28 = vpop.f32.mrb[77].mxu0 }
0x15ad   :  { %v3764_v21 = vpop.f32.mrb[78].mxu0 }
0x15ae   :  { %4263 = vrot.lane.b32.xlu1 %v3764_v21, %s8036_s22  ;;  %v6986_v62 = vpop.f32.mrb[79].mxu0 }
0x15b1   :  { %v3769_v50 = vpop.f32.mrb[80].mxu0 }
0x15b2   :  { %4265 = vrot.lane.b32.xlu1 %v3769_v50, %s8036_s22  ;;  %v6989_v40 = vpop.f32.mrb[81].mxu0 }
0x15b5   :  { %v3774_v61 = vpop.f32.mrb[82].mxu0 }
0x15b6   :  { %4267 = vrot.lane.b32.xlu0 %v3774_v61, %s8036_s22  ;;  %v6992_v57 = vpop.f32.mrb[83].mxu0 }
0x15b9   :  { %v4005_v47 = vpop.f32.mrb[84].mxu0 }
0x15ba   :  { %4275 = vrot.lane.b32.xlu1 %v4005_v47, %s8037_s15  ;;  %v7016_v11 = vpop.f32.mrb[85].mxu0 }
0x15bd   :  { %v4010_v58 = vpop.f32.mrb[86].mxu0 }
0x15be   :  { %4277 = vrot.lane.b32.xlu1 %v4010_v58, %s8037_s15  ;;  %v7019_v29 = vpop.f32.mrb[87].mxu0 }
0x15c1   :  { %v4015_v24 = vpop.f32.mrb[88].mxu0 }
0x15c2   :  { %4279 = vrot.lane.b32.xlu1 %v4015_v24, %s8037_s15  ;;  %v7022_v20 = vpop.f32.mrb[89].mxu0 }
0x15c5   :  { %v4246_v6 = vpop.f32.mrb[90].mxu0 }
0x15c6   :  { %4287 = vrot.lane.b32.xlu0 %v4246_v6, %s8038_s1  ;;  %v7046_v59 = vpop.f32.mrb[91].mxu0 }
0x15c9   :  { %v4251_v15 = vpop.f32.mrb[92].mxu0 }
0x15ca   :  { %4289 = vrot.lane.b32.xlu1 %v4251_v15, %s8038_s1  ;;  %v7049_v4 = vpop.f32.mrb[93].mxu0 }
0x15cd   :  { %v4256_v32 = vpop.f32.mrb[94].mxu0 }
0x15ce   :  { %4291 = vrot.lane.b32.xlu1 %v4256_v32, %s8038_s1  ;;  %v7052_v52 = vpop.f32.mrb[95].mxu0 }
0x15d1   :  { %v4529_v33 = vpop.f32.mrb[96].mxu0 }
0x15d2   :  { %v7076_v2 = vpop.f32.mrb[97].mxu0 }
0x15d5   :  { %v9895_v36 = vpop.f32.mrb[98].mxu0 }
0x15d6   :  { %v7079_v51 = vpop.f32.mrb[99].mxu0 }
0x15d9   :  { %v9897_v30 = vpop.f32.mrb[100].mxu0 }
0x15da   :  { %v7082_v5 = vpop.f32.mrb[101].mxu0 }
0x15dd   :  { %v4770_v26 = vpop.f32.mrb[102].mxu0 }
0x15de   :  { %5269 = vrot.lane.b32.xlu0 %v4770_v26, %s8036_s22  ;;  %v7106_v60 = vpop.f32.mrb[103].mxu0 }
0x15e1   :  { %v9900_v55 = vpop.f32.mrb[104].mxu0 }
0x15e2   :  { %v7109_v0 = vpop.f32.mrb[105].mxu0 }
0x15e5   :  { %v9902_v9 = vpop.f32.mrb[106].mxu0 }
0x15e6   :  { %v7112_v41 = vpop.f32.mrb[107].mxu0 }
0x1609   :  { %v5120_v49 = vpop.f32.mrb[110].mxu1 }
0x160a   :  { %v5011_v25 = vpop.f32.mrb[108].mxu0  ;;  %v7154_v18 = vpop.f32.mrb[111].mxu1  ;;  %v5130_v40 = vmul.f32 0.35355338, %v5120_v49 }
0x160b   :  { %5281 = vrot.lane.b32.xlu0 %v5011_v25, %s8037_s15  ;;  %v7136_v56 = vpop.f32.mrb[109].mxu0 }
0x160c   :  { %v5133_v44 = vadd.f32 %v5130_v40, %v8381_v31 }
0x160d   :  { %v5125_v16 = vpop.f32.mrb[112].mxu1 }
0x160e   :  { %v9905_v1 = vpop.f32.mrb[110].mxu0  ;;  %v7157_v39 = vpop.f32.mrb[113].mxu1  ;;  %v5138_v57 = vsel %vm535_vm6, %v5133_v44, -inf  ;;  %v5131_v47 = vmul.f32 0.35355338, %v5125_v16 }
0x160f   :  { %v7139_v34 = vpop.f32.mrb[111].mxu0 }
0x1610   :  { %v5134_v11 = vadd.f32 %v5131_v47, %v8381_v31 }
0x1612   :  { %v9907_v28 = vpop.f32.mrb[112].mxu0  ;;  %v5141_v6 = vsel %vm535_vm6, %v5134_v11, -inf }
0x1613   :  { %v7142_v21 = vpop.f32.mrb[113].mxu0 }
0x1614   :  { %v9938_v21 = vld [vmem:[%s10165_s7 + $0x8] sm:$0xff] }
0x1616   :  { %v5252_v62 = vpop.f32.mrb[114].mxu0 }
0x1617   :  { %5293 = vrot.lane.b32.xlu1 %v5252_v62, %s8038_s1  ;;  %v7166_v50 = vpop.f32.mrb[115].mxu0  ;;  %v9943_v62 = vrot.slane %v9938_v21, %v2567_v27 }
0x1620   :  { %v4264_v61 = vpop.permute.xlu1 %4263 }
0x1621   :  { %v4296_v10 = vsel %vm436_vm3, %v9868_v53, %v4264_v61 }
0x1624   :  { %v4266_v43 = vpop.permute.xlu1 %4265 }
0x1625   :  { %v4297_v59 = vsel %vm436_vm3, %v9870_v8, %v4266_v43 }
0x1628   :  { %v4268_v12 = vpop.permute.xlu0 %4267 }
0x1629   :  { %v4298_v53 = vsel %vm436_vm3, %v9872_v37, %v4268_v12 }
0x162a   :  { %5139 = vmax.xlane.f32.xlu0 %v5138_v57 }
0x162c   :  { %v4276_v13 = vpop.permute.xlu1 %4275 }
0x162d   :  { %v4299_v58 = vsel %vm1429_vm7, %v4296_v10, %v4276_v13 }
0x1630   :  { %v4278_v48 = vpop.permute.xlu1 %4277 }
0x1631   :  { %v4300_v15 = vsel %vm1429_vm7, %v4297_v59, %v4278_v48 }
0x1634   :  { %v4280_v29 = vpop.permute.xlu1 %4279 }
0x1635   :  { %v4301_v32 = vsel %vm1429_vm7, %v4298_v53, %v4280_v29 }
0x1638   :  { %v4288_v24 = vpop.permute.xlu0 %4287 }
0x1639   :  { %v4302_v20 = vsel %vm535_vm6, %v4299_v58, %v4288_v24 }
0x163a   :  { %7181 = vmatprep.mubr.msk.f32.mxu1 %vm206_vm1, %v4302_v20 }
0x163b   :  { %5142 = vmax.xlane.f32.xlu1 %v5141_v6 }
0x163c   :  { %v4290_v31 = vpop.permute.xlu1 %4289 }
0x163d   :  { %v4303_v4 = vsel %vm535_vm6, %v4300_v15, %v4290_v31 }
0x163e   :  { %7182 = vmatmul.mubr.msk.f32.vlgmr.msra.gmra.mrb[114].mxu1 %vm206_vm1, %v4303_v4 }
0x1640   :  { %v4292_v52 = vpop.permute.xlu1 %4291 }
0x1641   :  { %v4304_v2 = vsel %vm535_vm6, %v4301_v32, %v4292_v52 }
0x1642   :  { %7184 = vmatprep.mubr.msk.f32.mxu1 %vm206_vm1, %v4304_v2 }
0x1650   :  { %v5270_v51 = vpop.permute.xlu0 %5269 }
0x1651   :  { %v5302_v5 = vsel %vm436_vm3, %v4529_v33, %v5270_v51 }
0x167d   :  { %v5282_v8 = vpop.permute.xlu0 %5281 }
0x167e   :  { %v5305_v26 = vsel %vm1429_vm7, %v5302_v5, %v5282_v8  ;;  %v6255_v5 = vld [vmem:[%s10163_s5 + $0x20] sm:$0xff] }
0x1689   :  { %v5294_v60 = vpop.permute.xlu1 %5293 }
0x168a   :  { %v5308_v0 = vsel %vm535_vm6, %v5305_v26, %v5294_v60  ;;  %v6256_v26 = vld [vmem:[%s10163_s5 + $0x28] sm:$0xff] }
0x168b   :  { %7185 = vmatmul.mubr.msk.f32.gmra.mrb[116].mxu1 %vm206_vm1, %v5308_v0  ;;  %v7479_v60 = vpack.c.bf16 %v6256_v26, %v6255_v5  ;;  %v6257_v0 = vld [vmem:[%s10163_s5 + $0x30] sm:$0xff] }
0x168d   :  { %7480 = vmatprep.subr.bf16.mxu0 %v7479_v60 }
0x168e   :  { %7482 = vmatpush3.bf16.msra.mxu0 %v7479_v60 }
0x16b7   :  { %v5140_v41 = vpop.xlane.xlu0 %5139 }
0x16b8   :  { %v5145_v37 = vsub.f32 %v5133_v44, %v5140_v41  ;;  %v6258_v41 = vld [vmem:[%s10163_s5 + $0x38] sm:$0xff] }
0x16ba   :  { %v5149_v49 = vmul.f32 1.442695, %v5145_v37  ;;  %v7483_v37 = vpack.c.bf16 %v6258_v41, %v6257_v0 }
0x16bc   :  { %7949 = vpow2.f32 %v5149_v49  ;;  %7484 = vmatprep.subr.bf16.mxu0 %v7483_v37 }
0x16bd   :  { %7486 = vmatpush3.bf16.msra.mxu0 %v7483_v37 }
0x16be   :  { %7519 = vmatprep.subr.bf16.mxu0 %v8021_v3 }
0x16c6   :  { %v7950_v25 = vpop.eup %7949 }
0x16c7   :  { %v5156_v18 = vsel %vm535_vm6, %v7950_v25, 0.0 }
0x16c8   :  { %5157 = vadd.xlane.f32.xlu0 %v5156_v18  ;;  %v5143_v56 = vpop.xlane.xlu1 %5142 }
0x16c9   :  { %v5146_v16 = vsub.f32 %v5134_v11, %v5143_v56 }
0x16cb   :  { %v5151_v39 = vmul.f32 1.442695, %v5146_v16 }
0x16cd   :  { %7951 = vpow2.f32 %v5151_v39 }
0x16d7   :  { %v7952_v33 = vpop.eup %7951 }
0x16d8   :  { %v5159_v34 = vsel %vm535_vm6, %v7952_v33, 0.0 }
0x16d9   :  { %5160 = vadd.xlane.f32.xlu0 %v5159_v34 }
0x1711   :  { %v7183_v50 = vpop.f32.mrb[114].mxu1 }
0x1712   :  { %v5430_v40 = vadd.f32 %v7183_v50, %v9224_v7  ;;  %v5400_v61 = vpop.f32.mrb[115].mxu1 }
0x1713   :  { %v5429_v44 = vadd.f32 %v5400_v61, %v9226_v17 }
0x1714   :  { %v5440_v43 = vadd.f32 %v9943_v62, %v5430_v40 }
0x1715   :  { %v9949_v57 = vadd.f32 %v9943_v62, %v5429_v44 }
0x1716   :  { %v5448_v13 = vsel %vm206_vm1, %v5440_v43, 0.0 }
0x1717   :  { %5449 = vadd.xlane.f32.xlu1 %v5448_v13  ;;  %v5445_v47 = vsel %vm206_vm1, %v9949_v57, 0.0 }
0x1718   :  { %5446 = vadd.xlane.f32.xlu0 %v5445_v47 }
0x1755   :  { %v5158_v27 = vpop.xlane.xlu0 %5157 }
0x1756   :  { %7953 = vrcp.f32 %v5158_v27 }
0x175e   :  { %v7186_v48 = vpop.f32.mrb[116].mxu1 }
0x175f   :  { %v5432_v7 = vadd.f32 %v7186_v48, %v9234_v14  ;;  %v5410_v12 = vpop.f32.mrb[117].mxu1 }
0x1760   :  { %v7954_v11 = vpop.eup %7953  ;;  %v5431_v17 = vadd.f32 %v5410_v12, %v9236_v35 }
0x1761   :  { %v9957_v10 = vadd.f32 %v9943_v62, %v5432_v7  ;;  %v5166_v58 = vmul.f32 %v7954_v11, %v7950_v25 }
0x1762   :  { %v5441_v29 = vadd.f32 %v9943_v62, %v5431_v17  ;;  %v10004_v17 = vrot.slane %v9938_v21, %v2665_v23 }
0x1763   :  { %7168 = vmatmul.mubr.msk.f32.gmra.mrb[116].mxu0 %vm535_vm6, %v5166_v58  ;;  %v5454_v24 = vsel %vm206_vm1, %v9957_v10, 0.0 }
0x1764   :  { %5455 = vadd.xlane.f32.xlu1 %v5454_v24  ;;  %v5451_v20 = vsel %vm206_vm1, %v5441_v29, 0.0  ;;  %7170 = vmatprep.mubr.msk.f32.mxu0 %vm8023_vm2, %v8024_v19 }
0x1765   :  { %5452 = vadd.xlane.f32.xlu0 %v5451_v20 }
0x1766   :  { %v5161_v14 = vpop.xlane.xlu0 %5160 }
0x1767   :  { %7955 = vrcp.f32 %v5161_v14 }
0x1771   :  { %v7956_v35 = vpop.eup %7955 }
0x1772   :  { %v5167_v6 = vmul.f32 %v7956_v35, %v7952_v33 }
0x1774   :  { %7171 = vmatmul.mubr.msk.f32.gmra.mrb[118].mxu0 %vm535_vm6, %v5167_v6 }
0x17a4   :  { %v5450_v59 = vpop.xlane.xlu1 %5449 }
0x17a5   :  { %v5464_v15 = vmul.f32 0.03125, %v5450_v59  ;;  %v5447_v31 = vpop.xlane.xlu0 %5446 }
0x17a6   :  { %v5463_v4 = vmul.f32 0.03125, %v5447_v31 }
0x17a7   :  { %v5470_v53 = vsub.f32 %v5440_v43, %v5464_v15 }
0x17a8   :  { %v5469_v32 = vsub.f32 %v9949_v57, %v5463_v4 }
0x17a9   :  { %v5476_v52 = vmul.f32 %v5470_v53, %v5470_v53 }
0x17aa   :  { %v5475_v2 = vmul.f32 %v5469_v32, %v5469_v32 }
0x17ab   :  { %v5484_v51 = vsel %vm206_vm1, %v5476_v52, 0.0 }
0x17ac   :  { %5485 = vadd.xlane.f32.xlu1 %v5484_v51  ;;  %v5481_v8 = vsel %vm206_vm1, %v5475_v2, 0.0 }
0x17ad   :  { %5482 = vadd.xlane.f32.xlu0 %v5481_v8 }
0x17f1   :  { %v5456_v49 = vpop.xlane.xlu1 %5455 }
0x17f2   :  { %v5466_v25 = vmul.f32 0.03125, %v5456_v49  ;;  %v5453_v18 = vpop.xlane.xlu0 %5452 }
0x17f3   :  { %v5465_v56 = vmul.f32 0.03125, %v5453_v18  ;;  %v6265_v18 = vld [vmem:[%s10164_s6 + $0x80] sm:$0xff] }
0x17f4   :  { %v5472_v16 = vsub.f32 %v9957_v10, %v5466_v25 }
0x17f5   :  { %v5471_v39 = vsub.f32 %v5441_v29, %v5465_v56  ;;  %v6266_v56 = vld [vmem:[%s10164_s6 + $0x88] sm:$0xff] }
0x17f6   :  { %v5478_v33 = vmul.f32 %v5472_v16, %v5472_v16 }
0x17f7   :  { %v5477_v34 = vmul.f32 %v5471_v39, %v5471_v39 }
0x17f8   :  { %v5490_v50 = vsel %vm206_vm1, %v5478_v33, 0.0 }
0x17f9   :  { %5491 = vadd.xlane.f32.xlu1 %v5490_v50  ;;  %v5487_v40 = vsel %vm206_vm1, %v5477_v34, 0.0  ;;  %v6267_v50 = vld [vmem:[%s10164_s6 + $0x90] sm:$0xff] }
0x17fa   :  { %5488 = vadd.xlane.f32.xlu0 %v5487_v40  ;;  %v6268_v40 = vld [vmem:[%s10164_s6 + $0x98] sm:$0xff] }
0x180a   :  { %5273 = vrot.lane.b32.xlu1 %v9902_v9, %s8036_s22  ;;  %v9998_v9 = vrot.slane %v9938_v21, %v2655_v45 }
0x180e   :  { %5283 = vrot.lane.b32.xlu1 %v9905_v1, %s8037_s15 }
0x1810   :  { %5271 = vrot.lane.b32.xlu0 %v9900_v55, %s8036_s22 }
0x1812   :  { %5285 = vrot.lane.b32.xlu1 %v9907_v28, %s8037_s15 }
0x1836   :  { %v5257_v61 = vpop.f32.mrb[116].mxu0 }
0x1837   :  { %5295 = vrot.lane.b32.xlu0 %v5257_v61, %s8038_s1  ;;  %v7169_v44 = vpop.f32.mrb[117].mxu0  ;;  %v7491_v61 = vpack.c.bf16 %v6268_v40, %v6267_v50 }
0x1838   :  { %v6270_v44 = vld [vmem:[%s10164_s6 + $0xa8] sm:$0xff] }
0x1839   :  { %v5486_v43 = vpop.xlane.xlu1 %5485 }
0x183a   :  { %v5500_v13 = vmul.f32 0.03125, %v5486_v43  ;;  %v5483_v47 = vpop.xlane.xlu0 %5482 }
0x183b   :  { %v5499_v27 = vmul.f32 0.03125, %v5483_v47  ;;  %v6272_v47 = vld [vmem:[%s10164_s6 + $0xb8] sm:$0xff] }
0x183c   :  { %v5506_v48 = vadd.f32 1e-06, %v5500_v13  ;;  %v6271_v13 = vld [vmem:[%s10164_s6 + $0xb0] sm:$0xff] }
0x183d   :  { %v5505_v7 = vadd.f32 1e-06, %v5499_v27  ;;  %v7499_v27 = vpack.c.bf16 %v6272_v47, %v6271_v13 }
0x183e   :  { %7957 = vrsqrt.f32 %v5506_v48  ;;  %v6273_v48 = vld [vmem:[%s10164_s6 + $0xc0] sm:$0xff] }
0x183f   :  { %7959 = vrsqrt.f32 %v5505_v7  ;;  %v6274_v7 = vld [vmem:[%s10164_s6 + $0xc8] sm:$0xff] }
0x1847   :  { %v5262_v55 = vpop.f32.mrb[118].mxu0 }
0x1848   :  { %v7958_v1 = vpop.eup %7957  ;;  %5297 = vrot.lane.b32.xlu1 %v5262_v55, %s8038_s1  ;;  %v7172_v28 = vpop.f32.mrb[119].mxu0  ;;  %v7503_v55 = vpack.c.bf16 %v6274_v7, %v6273_v48 }
0x1849   :  { %v7960_v12 = vpop.eup %7959  ;;  %v5518_v11 = vmul.f32 %v7958_v1, %v5470_v53  ;;  %v6275_v1 = vld [vmem:[%s10164_s6 + $0xd0] sm:$0xff]  ;;  %v6276_v28 = vld [vmem:[%s10164_s6 + $0xd8] sm:$0xff] }
0x184a   :  { %v5517_v58 = vmul.f32 %v7960_v12, %v5469_v32  ;;  %v7507_v12 = vpack.c.bf16 %v6276_v28, %v6275_v1 }
0x184b   :  { %v5528_v29 = vmul.f32 %v9998_v9, %v5518_v11  ;;  %v6277_v11 = vld [vmem:[%s10164_s6 + $0xe0] sm:$0xff] }
0x184c   :  { %v5527_v24 = vmul.f32 %v9998_v9, %v5517_v58  ;;  %v6278_v58 = vld [vmem:[%s10164_s6 + $0xe8] sm:$0xff] }
0x184d   :  { %v5538_v20 = vadd.f32 %v10004_v17, %v5528_v29  ;;  %v7511_v29 = vpack.c.bf16 %v6278_v58, %v6277_v11 }
0x184e   :  { %v5537_v45 = vadd.f32 %v10004_v17, %v5527_v24  ;;  %v6279_v24 = vld [vmem:[%s10164_s6 + $0xf0] sm:$0xff] }
0x1850   :  { %7198 = vmatprep.mubr.msk.f32.mxu0 %vm206_vm1, %v5537_v45  ;;  %v6280_v45 = vld [vmem:[%s10164_s6 + $0xf8] sm:$0xff] }
0x1851   :  { %7199 = vmatmul.mubr.msk.f32.vlgmr.msra.gmra.mrb[120].mxu0 %vm206_vm1, %v5538_v20  ;;  %v7515_v20 = vpack.c.bf16 %v6280_v45, %v6279_v24 }
0x1886   :  { %v5492_v14 = vpop.xlane.xlu1 %5491 }
0x1887   :  { %v5502_v35 = vmul.f32 0.03125, %v5492_v14  ;;  %v5489_v6 = vpop.xlane.xlu0 %5488  ;;  %v10079_v14 = vrot.slane %v9938_v21, %v2679_v63 }
0x1888   :  { %v5501_v59 = vmul.f32 0.03125, %v5489_v6 }
0x1889   :  { %v5508_v15 = vadd.f32 1e-06, %v5502_v35 }
0x188a   :  { %v5507_v23 = vadd.f32 1e-06, %v5501_v59  ;;  %v5274_v5 = vpop.permute.xlu1 %5273 }
0x188b   :  { %7961 = vrsqrt.f32 %v5508_v15  ;;  %v5272_v26 = vpop.permute.xlu0 %5271 }
0x188c   :  { %7963 = vrsqrt.f32 %v5507_v23  ;;  %v5303_v0 = vsel %vm436_vm3, %v9895_v36, %v5272_v26  ;;  %v5304_v36 = vsel %vm436_vm3, %v9897_v30, %v5274_v5  ;;  %v6269_v30 = vld [vmem:[%s10164_s6 + $0xa0] sm:$0xff] }
0x188d   :  { %v7495_v43 = vpack.c.bf16 %v6270_v44, %v6269_v30 }
0x188e   :  { %v5284_v60 = vpop.permute.xlu1 %5283 }
0x188f   :  { %v5306_v41 = vsel %vm1429_vm7, %v5303_v0, %v5284_v60 }
0x1892   :  { %v5286_v25 = vpop.permute.xlu1 %5285 }
0x1895   :  { %v7962_v31 = vpop.eup %7961 }
0x1896   :  { %v7964_v4 = vpop.eup %7963  ;;  %v5520_v53 = vmul.f32 %v7962_v31, %v5472_v16  ;;  %v7487_v16 = vpack.c.bf16 %v6266_v56, %v6265_v18 }
0x1897   :  { %v5519_v32 = vmul.f32 %v7964_v4, %v5471_v39  ;;  %v5307_v39 = vsel %vm1429_vm7, %v5304_v36, %v5286_v25 }
0x1898   :  { %v5530_v52 = vmul.f32 %v9998_v9, %v5520_v53  ;;  %7488 = vmatprep.subr.bf16.mxu1 %v7487_v16 }
0x1899   :  { %v5529_v2 = vmul.f32 %v9998_v9, %v5519_v32  ;;  %7490 = vmatpush3.bf16.msra.mxu1 %v7487_v16 }
0x189a   :  { %v5540_v8 = vadd.f32 %v10004_v17, %v5530_v52  ;;  %7492 = vmatprep.subr.bf16.mxu1 %v7491_v61 }
0x189b   :  { %v5539_v51 = vadd.f32 %v10004_v17, %v5529_v2 }
0x189d   :  { %7201 = vmatprep.mubr.msk.f32.mxu0 %vm206_vm1, %v5539_v51  ;;  %7494 = vmatpush3.bf16.msra.mxu1 %v7491_v61 }
0x189e   :  { %7202 = vmatmul.mubr.msk.f32.gmra.mrb[122].mxu0 %vm206_vm1, %v5540_v8  ;;  %7496 = vmatprep.subr.bf16.mxu1 %v7495_v43 }
0x18a1   :  { %7498 = vmatpush3.bf16.msra.mxu1 %v7495_v43 }
0x18a2   :  { %7500 = vmatprep.subr.bf16.mxu1 %v7499_v27 }
0x18a5   :  { %7502 = vmatpush3.bf16.msra.mxu1 %v7499_v27 }
0x18a6   :  { %7504 = vmatprep.subr.bf16.mxu1 %v7503_v55 }
0x18a9   :  { %v5296_v37 = vpop.permute.xlu0 %5295  ;;  %7506 = vmatpush3.bf16.msra.mxu1 %v7503_v55 }
0x18aa   :  { %v5309_v49 = vsel %vm535_vm6, %v5306_v41, %v5296_v37  ;;  %7508 = vmatprep.subr.bf16.mxu1 %v7507_v12 }
0x18ab   :  { %7187 = vmatprep.mubr.msk.f32.mxu1 %vm206_vm1, %v5309_v49 }
0x18ad   :  { %7510 = vmatpush3.bf16.msra.mxu1 %v7507_v12  ;;  %v10175_v12 = vmov 1.0  }
0x18ae   :  { %7512 = vmatprep.subr.bf16.mxu1 %v7511_v29 }
0x18b1   :  { %7514 = vmatpush3.bf16.msra.mxu1 %v7511_v29 }
0x18b2   :  { %7516 = vmatprep.subr.bf16.mxu1 %v7515_v20 }
0x18b5   :  { %7518 = vmatpush3.bf16.msra.mxu1 %v7515_v20 }
0x18ba   :  { %v5298_v33 = vpop.permute.xlu1 %5297 }
0x18bb   :  { %v5310_v34 = vsel %vm535_vm6, %v5307_v39, %v5298_v33 }
0x18bc   :  { %7188 = vmatmul.mubr.msk.f32.gmra.mrb[118].mxu1 %vm206_vm1, %v5310_v34 }
0x1924   :  { %v7200_v35 = vpop.f32.mrb[120].mxu0 }
0x1925   :  { %v5642_v6 = vadd.f32 %v7200_v35, %v10079_v14  ;;  %v5636_v59 = vpop.f32.mrb[121].mxu0 }
0x1926   :  { %v5637_v15 = vadd.f32 %v5636_v59, %v10079_v14 }
0x1927   :  { %v5672_v23 = vmul.f32 0.70710677, %v5642_v6 }
0x1928   :  { %v5671_v31 = vmul.f32 0.70710677, %v5637_v15  ;;  %v5665_v35 = vmul.f32 0.5, %v5637_v15 }
0x1929   :  { %v5690_v4 = vand.u32 2147483647, %v5672_v23  ;;  %vm5678_vm14 = vcmp.lt.f32.partialorder %v5672_v23, 0.0 }
0x192a   :  { %v5689_v53 = vand.u32 2147483647, %v5671_v31  ;;  %vm5677_vm15 = vcmp.lt.f32.partialorder %v5671_v31, 0.0  ;;  %v5684_v11 = vsel %vm5678_vm14, -1.0, %v10175_v12 }
0x192b   :  { %v5696_v32 = vmul.f32 0.3275911, %v5690_v4  ;;  %v5768_v8 = vsub.f32 0.0, %v5690_v4  ;;  %v5683_v24 = vsel %vm5677_vm15, -1.0, %v10175_v12 }
0x192c   :  { %v5695_v52 = vmul.f32 0.3275911, %v5689_v53  ;;  %v5767_v5 = vsub.f32 0.0, %v5689_v53 }
0x192d   :  { %v5702_v2 = vadd.f32 1.0, %v5696_v32  ;;  %v5774_v26 = vmul.f32 %v5768_v8, %v5690_v4  ;;  %v5666_v4 = vmul.f32 0.5, %v5642_v6 }
0x192e   :  { %v5701_v51 = vadd.f32 1.0, %v5695_v52  ;;  %v5773_v41 = vmul.f32 %v5767_v5, %v5689_v53 }
0x192f   :  { %7965 = vrcp.f32 %v5702_v2  ;;  %v5781_v25 = vmul.f32 1.442695, %v5774_v26 }
0x1930   :  { %7967 = vrcp.f32 %v5701_v51  ;;  %v5779_v16 = vmul.f32 1.442695, %v5773_v41 }
0x1931   :  { %7969 = vpow2.f32 %v5781_v25 }
0x1932   :  { %7971 = vpow2.f32 %v5779_v16 }
0x1939   :  { %v7966_v63 = vpop.eup %7965 }
0x193a   :  { %v7968_v60 = vpop.eup %7967  ;;  %v5714_v0 = vmul.f32 1.0614054, %v7966_v63 }
0x193b   :  { %v5713_v37 = vmul.f32 1.0614054, %v7968_v60  ;;  %v7970_v27 = vpop.eup %7969 }
0x193c   :  { %v5720_v49 = vadd.f32 -1.4531521, %v5714_v0  ;;  %v7972_v7 = vpop.eup %7971 }
0x193d   :  { %v5719_v18 = vadd.f32 -1.4531521, %v5713_v37 }
0x193e   :  { %v5726_v56 = vmul.f32 %v7966_v63, %v5720_v49 }
0x193f   :  { %v5725_v36 = vmul.f32 %v7968_v60, %v5719_v18 }
0x1940   :  { %v5732_v39 = vadd.f32 1.4214138, %v5726_v56 }
0x1941   :  { %v5731_v33 = vadd.f32 1.4214138, %v5725_v36 }
0x1942   :  { %v5738_v34 = vmul.f32 %v7966_v63, %v5732_v39 }
0x1943   :  { %v5737_v50 = vmul.f32 %v7968_v60, %v5731_v33 }
0x1944   :  { %v5744_v40 = vadd.f32 -0.28449672, %v5738_v34 }
0x1945   :  { %v5743_v61 = vadd.f32 -0.28449672, %v5737_v50 }
0x1946   :  { %v5750_v30 = vmul.f32 %v7966_v63, %v5744_v40 }
0x1947   :  { %v5749_v44 = vmul.f32 %v7968_v60, %v5743_v61 }
0x1948   :  { %v5756_v43 = vadd.f32 0.2548296, %v5750_v30 }
0x1949   :  { %v5755_v13 = vadd.f32 0.2548296, %v5749_v44 }
0x194a   :  { %v5762_v47 = vmul.f32 %v7966_v63, %v5756_v43 }
0x194b   :  { %v5761_v48 = vmul.f32 %v7968_v60, %v5755_v13 }
0x194c   :  { %v5792_v55 = vmul.f32 %v7970_v27, %v5762_v47 }
0x194d   :  { %v5791_v1 = vmul.f32 %v7972_v7, %v5761_v48 }
0x194e   :  { %v5798_v28 = vsub.f32 1.0, %v5792_v55 }
0x194f   :  { %v5797_v58 = vsub.f32 1.0, %v5791_v1 }
0x1950   :  { %v5804_v29 = vmul.f32 %v5798_v28, %v5684_v11 }
0x1951   :  { %v5803_v45 = vmul.f32 %v5797_v58, %v5683_v24 }
0x1952   :  { %v5810_v20 = vadd.f32 1.0, %v5804_v29 }
0x1953   :  { %v5809_v59 = vadd.f32 1.0, %v5803_v45 }
0x1954   :  { %v5816_v32 = vmul.f32 %v5810_v20, %v5666_v4 }
0x1955   :  { %v5815_v53 = vmul.f32 %v5809_v59, %v5665_v35 }
0x1957   :  { %7239 = vmatprep.mubr.f32.mxu1 %v5815_v53 }
0x1958   :  { %7240 = vmatmul.mubr.f32.vlgmr.msra.gmra.mrb[120].mxu1 %v5816_v32 }
0x1971   :  { %v7203_v23 = vpop.f32.mrb[122].mxu0 }
0x1972   :  { %v10086_v31 = vadd.f32 %v7203_v23, %v10079_v14  ;;  %v5646_v52 = vpop.f32.mrb[123].mxu0 }
0x1973   :  { %v5647_v2 = vadd.f32 %v5646_v52, %v10079_v14 }
0x1974   :  { %v5674_v51 = vmul.f32 0.70710677, %v10086_v31 }
0x1975   :  { %v5673_v8 = vmul.f32 0.70710677, %v5647_v2 }
0x1976   :  { %v5692_v5 = vand.u32 2147483647, %v5674_v51  ;;  %vm5680_vm0 = vcmp.lt.f32.partialorder %v5674_v51, 0.0 }
0x1977   :  { %v5691_v63 = vand.u32 2147483647, %v5673_v8  ;;  %vm5679_vm3 = vcmp.lt.f32.partialorder %v5673_v8, 0.0 }
0x1978   :  { %v5698_v26 = vmul.f32 0.3275911, %v5692_v5  ;;  %v5770_v0 = vsub.f32 0.0, %v5692_v5  ;;  %v5685_v52 = vsel %vm5679_vm3, -1.0, %v10175_v12 }
0x1979   :  { %v5697_v15 = vmul.f32 0.3275911, %v5691_v63  ;;  %v5769_v41 = vsub.f32 0.0, %v5691_v63 }
0x197a   :  { %v5704_v60 = vadd.f32 1.0, %v5698_v26  ;;  %v5776_v49 = vmul.f32 %v5770_v0, %v5692_v5 }
0x197b   :  { %v5703_v6 = vadd.f32 1.0, %v5697_v15  ;;  %v5775_v18 = vmul.f32 %v5769_v41, %v5691_v63  ;;  %v5667_v15 = vmul.f32 0.5, %v5647_v2 }
0x197c   :  { %7973 = vrcp.f32 %v5704_v60  ;;  %v5785_v39 = vmul.f32 1.442695, %v5776_v49 }
0x197d   :  { %7975 = vrcp.f32 %v5703_v6  ;;  %v5783_v34 = vmul.f32 1.442695, %v5775_v18  ;;  %v5668_v6 = vmul.f32 0.5, %v10086_v31 }
0x197e   :  { %7977 = vpow2.f32 %v5785_v39 }
0x197f   :  { %7979 = vpow2.f32 %v5783_v34 }
0x1986   :  { %v7974_v37 = vpop.eup %7973 }
0x1987   :  { %v7976_v25 = vpop.eup %7975  ;;  %v5716_v56 = vmul.f32 1.0614054, %v7974_v37 }
0x1988   :  { %v5715_v16 = vmul.f32 1.0614054, %v7976_v25  ;;  %v7978_v35 = vpop.eup %7977 }
0x1989   :  { %v5722_v36 = vadd.f32 -1.4531521, %v5716_v56 }
0x198a   :  { %v5721_v33 = vadd.f32 -1.4531521, %v5715_v16 }
0x198b   :  { %v5728_v50 = vmul.f32 %v7974_v37, %v5722_v36 }
0x198c   :  { %v5727_v40 = vmul.f32 %v7976_v25, %v5721_v33 }
0x198d   :  { %v5734_v61 = vadd.f32 1.4214138, %v5728_v50  ;;  %v10176_v50 = vsub.s32 7, %v8294_v38 }
0x198e   :  { %v5733_v30 = vadd.f32 1.4214138, %v5727_v40 }
0x198f   :  { %v7189_v44 = vpop.f32.mrb[118].mxu1  ;;  %v5740_v43 = vmul.f32 %v7974_v37, %v5734_v61  ;;  %v5934_v40 = vrot.slane %v9938_v21, %v10176_v50 }
0x1990   :  { %v5434_v13 = vadd.f32 %v7189_v44, %v9244_v54  ;;  %v5420_v47 = vpop.f32.mrb[119].mxu1  ;;  %v5739_v27 = vmul.f32 %v7976_v25, %v5733_v30 }
0x1991   :  { %v5433_v48 = vadd.f32 %v5420_v47, %v9246_v22  ;;  %v5746_v7 = vadd.f32 -0.28449672, %v5740_v43  ;;  %v7980_v22 = vpop.eup %7979 }
0x1992   :  { %v5444_v55 = vadd.f32 %v9943_v62, %v5434_v13  ;;  %v5745_v1 = vadd.f32 -0.28449672, %v5739_v27 }
0x1993   :  { %v5443_v28 = vadd.f32 %v9943_v62, %v5433_v48  ;;  %v5752_v11 = vmul.f32 %v7974_v37, %v5746_v7  ;;  %v5686_v62 = vsel %vm5680_vm0, -1.0, %v10175_v12 }
0x1994   :  { %v5460_v58 = vsel %vm206_vm1, %v5444_v55, 0.0  ;;  %v5751_v29 = vmul.f32 %v7976_v25, %v5745_v1 }
0x1995   :  { %5461 = vadd.xlane.f32.xlu1 %v5460_v58  ;;  %v5457_v24 = vsel %vm206_vm1, %v5443_v28, 0.0  ;;  %v5758_v45 = vadd.f32 0.2548296, %v5752_v11 }
0x1996   :  { %5458 = vadd.xlane.f32.xlu0 %v5457_v24  ;;  %v5757_v54 = vadd.f32 0.2548296, %v5751_v29 }
0x1997   :  { %v5764_v20 = vmul.f32 %v7974_v37, %v5758_v45 }
0x1998   :  { %v5763_v59 = vmul.f32 %v7976_v25, %v5757_v54 }
0x1999   :  { %v5794_v4 = vmul.f32 %v7978_v35, %v5764_v20 }
0x199a   :  { %v5793_v53 = vmul.f32 %v7980_v22, %v5763_v59 }
0x199b   :  { %v5800_v32 = vsub.f32 1.0, %v5794_v4  ;;  %v5967_v4 = vld [vmem:[%s10167_s9] sm:$0xff] }
0x199c   :  { %v5799_v23 = vsub.f32 1.0, %v5793_v53  ;;  %v5970_v53 = vld [vmem:[%s10167_s9 + $0x18] sm:$0xff] }
0x199d   :  { %v5806_v5 = vmul.f32 %v5800_v32, %v5686_v62 }
0x199e   :  { %v5805_v63 = vmul.f32 %v5799_v23, %v5685_v52 }
0x199f   :  { %v5812_v26 = vadd.f32 1.0, %v5806_v5 }
0x19a0   :  { %v5811_v60 = vadd.f32 1.0, %v5805_v63 }
0x19a1   :  { %v5818_v41 = vmul.f32 %v5812_v26, %v5668_v6 }
0x19a2   :  { %v5817_v0 = vmul.f32 %v5811_v60, %v5667_v15 }
0x19a4   :  { %7242 = vmatprep.mubr.f32.mxu1 %v5817_v0 }
0x19a5   :  { %7243 = vmatmul.mubr.f32.gmra.mrb[122].mxu1 %v5818_v41 }
0x1a22   :  { %v5462_v51 = vpop.xlane.xlu1 %5461 }
0x1a23   :  { %v5468_v8 = vmul.f32 0.03125, %v5462_v51  ;;  %v5459_v37 = vpop.xlane.xlu0 %5458 }
0x1a24   :  { %v5467_v49 = vmul.f32 0.03125, %v5459_v37 }
0x1a25   :  { %v5474_v25 = vsub.f32 %v5444_v55, %v5468_v8  ;;  %v5937_v8 = vld [vmem:[%s10166_s8] sm:$0x3] }
0x1a26   :  { %v5473_v18 = vsub.f32 %v5443_v28, %v5467_v49 }
0x1a27   :  { %v5480_v36 = vmul.f32 %v5474_v25, %v5474_v25 }
0x1a28   :  { %v5479_v56 = vmul.f32 %v5473_v18, %v5473_v18 }
0x1a29   :  { %v5496_v33 = vsel %vm206_vm1, %v5480_v36, 0.0 }
0x1a2a   :  { %v5493_v16 = vsel %vm206_vm1, %v5479_v56, 0.0 }
0x1a2b   :  { %5494 = vadd.xlane.f32.xlu0 %v5493_v16  ;;  %v7241_v39 = vpop.f32.mrb[120].mxu1 }
0x1a2c   :  { %v5904_v2 = vpop.f32.mrb[121].mxu1 }
0x1a2d   :  { %v5929_v34 = vadd.f32 %v5904_v2, %v9949_v57 }
0x1a2f   :  { %5497 = vadd.xlane.f32.xlu0 %v5496_v33  ;;  %v5935_v43 = vadd.f32 %v5934_v40, %v5929_v34 }
0x1a78   :  { %v7244_v31 = vpop.f32.mrb[122].mxu1 }
0x1a79   :  { %v5930_v61 = vadd.f32 %v7244_v31, %v9957_v10  ;;  %v5913_v30 = vpop.f32.mrb[123].mxu1 }
0x1a7b   :  { %v5936_v44 = vadd.f32 %v5934_v40, %v5930_v61 }
0x1a7d   :  { %v5939_v13 = vrot.slane %v5936_v44, 7 }
0x1a7f   :  { %v5942_v47 = vsel %vm5941_vm4, %v5935_v43, %v5939_v13 }
0x1a80   :  { %v5944_v27 = vsel %vm5943_vm5, %v5942_v47, 0.0 }
0x1a81   :  { %5945 = vadd.xlane.f32.xlu0 %v5944_v27 }
0x1ab8   :  { %v5495_v48 = vpop.xlane.xlu0 %5494 }
0x1ab9   :  { %v5503_v7 = vmul.f32 0.03125, %v5495_v48 }
0x1abb   :  { %v5509_v55 = vadd.f32 1e-06, %v5503_v7 }
0x1abc   :  { %v5498_v57 = vpop.xlane.xlu0 %5497 }
0x1abd   :  { %7981 = vrsqrt.f32 %v5509_v55  ;;  %v5504_v38 = vmul.f32 0.03125, %v5498_v57 }
0x1abf   :  { %v5510_v1 = vadd.f32 1e-06, %v5504_v38 }
0x1ac1   :  { %7983 = vrsqrt.f32 %v5510_v1 }
0x1ac7   :  { %v7982_v21 = vpop.eup %7981 }
0x1ac8   :  { %v5521_v10 = vmul.f32 %v7982_v21, %v5473_v18 }
0x1aca   :  { %v5531_v28 = vmul.f32 %v9998_v9, %v5521_v10 }
0x1acb   :  { %v7984_v11 = vpop.eup %7983 }
0x1acc   :  { %v5541_v58 = vadd.f32 %v10004_v17, %v5531_v28  ;;  %v5522_v29 = vmul.f32 %v7984_v11, %v5474_v25  ;;  %v5960_v25 = vrot.slane %v5937_v8, %v8297_v42 }
0x1ace   :  { %7204 = vmatprep.mubr.msk.f32.mxu0 %vm206_vm1, %v5541_v58  ;;  %v5532_v24 = vmul.f32 %v9998_v9, %v5522_v29  ;;  %v5968_v9 = vld [vmem:[%s10167_s9 + $0x8] sm:$0xff] }
0x1ad0   :  { %v5542_v45 = vadd.f32 %v10004_v17, %v5532_v24  ;;  %v7520_v17 = vpack.c.bf16 %v5968_v9, %v5967_v4 }
0x1ad2   :  { %7205 = vmatmul.mubr.msk.f32.gmra.mrb[124].mxu0 %vm206_vm1, %v5542_v45 }
0x1ad3   :  { %7256 = vmatprep.mubr.msk.f32.mxu0 %vm8023_vm2, %v8024_v19  ;;  %7521 = vmatpush3.bf16.msra.mxu0 %v7520_v17  ;;  %v5969_v19 = vld [vmem:[%s10167_s9 + $0x10] sm:$0xff] }
0x1ad4   :  { %7522 = vmatprep.subr.bf16.mxu0 %v8021_v3  ;;  %v7523_v32 = vpack.c.bf16 %v5970_v53, %v5969_v19 }
0x1ad7   :  { %7524 = vmatpush3.bf16.msra.mxu0 %v7523_v32 }
0x1b0e   :  { %v5946_v54 = vpop.xlane.xlu0 %5945 }
0x1b0f   :  { %v5947_v20 = vmul.f32 0.03125, %v5946_v54 }
0x1b11   :  { %v5948_v35 = vsub.f32 %v5942_v47, %v5947_v20 }
0x1b13   :  { %v5949_v59 = vmul.f32 %v5948_v35, %v5948_v35 }
0x1b15   :  { %v5950_v22 = vsel %vm5943_vm5, %v5949_v59, 0.0 }
0x1b16   :  { %5951 = vadd.xlane.f32.xlu1 %v5950_v22 }
0x1ba3   :  { %v5952_v62 = vpop.xlane.xlu1 %5951 }
0x1ba4   :  { %v5953_v23 = vmul.f32 0.03125, %v5952_v62 }
0x1ba5   :  { %v7206_v52 = vpop.f32.mrb[124].mxu0 }
0x1ba6   :  { %v5954_v5 = vadd.f32 1e-06, %v5953_v23  ;;  %v10130_v63 = vadd.f32 %v7206_v52, %v10079_v14  ;;  %v5656_v26 = vpop.f32.mrb[125].mxu0  ;;  %v6281_v23 = vld [vmem:[%s10168_s10] ss:$0 sm:$0xff] }
0x1ba7   :  { %v5657_v3 = vadd.f32 %v5656_v26, %v10079_v14  ;;  %v5965_v14 = vrot.slane %v5937_v8, %v8303_v46 }
0x1ba8   :  { %7985 = vrsqrt.f32 %v5954_v5  ;;  %v5676_v15 = vmul.f32 0.70710677, %v10130_v63  ;;  %v5670_v53 = vmul.f32 0.5, %v10130_v63 }
0x1ba9   :  { %v5675_v60 = vmul.f32 0.70710677, %v5657_v3  ;;  %v5669_v17 = vmul.f32 0.5, %v5657_v3 }
0x1baa   :  { %v5694_v6 = vand.u32 2147483647, %v5676_v15 }
0x1bab   :  { %v5693_v0 = vand.u32 2147483647, %v5675_v60  ;;  %vm5681_vm2 = vcmp.lt.f32.partialorder %v5675_v60, 0.0 }
0x1bac   :  { %v5700_v41 = vmul.f32 0.3275911, %v5694_v6  ;;  %v5772_v36 = vsub.f32 0.0, %v5694_v6  ;;  %v5687_v59 = vsel %vm5681_vm2, -1.0, %v10175_v12 }
0x1bad   :  { %v5699_v51 = vmul.f32 0.3275911, %v5693_v0  ;;  %v5771_v2 = vsub.f32 0.0, %v5693_v0 }
0x1bae   :  { %v5706_v37 = vadd.f32 1.0, %v5700_v41  ;;  %v5778_v31 = vmul.f32 %v5772_v36, %v5694_v6 }
0x1baf   :  { %v5705_v49 = vadd.f32 1.0, %v5699_v51  ;;  %v5777_v50 = vmul.f32 %v5771_v2, %v5693_v0 }
0x1bb0   :  { %7987 = vrcp.f32 %v5706_v37  ;;  %v5789_v44 = vmul.f32 1.442695, %v5778_v31 }
0x1bb1   :  { %7989 = vrcp.f32 %v5705_v49  ;;  %v5787_v43 = vmul.f32 1.442695, %v5777_v50 }
0x1bb2   :  { %v7986_v18 = vpop.eup %7985  ;;  %7991 = vpow2.f32 %v5789_v44 }
0x1bb3   :  { %v5956_v56 = vmul.f32 %v7986_v18, %v5948_v35  ;;  %7993 = vpow2.f32 %v5787_v43 }
0x1bb5   :  { %v5961_v16 = vmul.f32 %v5960_v25, %v5956_v56 }
0x1bb7   :  { %v5966_v39 = vadd.f32 %v5965_v14, %v5961_v16 }
0x1bb9   :  { %7257 = vmatmul.mubr.msk.f32.vlgmr.msra.gmra.mrb[126].mxu0 %vm206_vm1, %v5966_v39  ;;  %vm5682_vm1 = vcmp.lt.f32.partialorder %v5676_v15, 0.0 }
0x1bba   :  { %v7988_v33 = vpop.eup %7987  ;;  %v5688_v20 = vsel %vm5682_vm1, -1.0, %v10175_v12 }
0x1bbb   :  { %v7990_v34 = vpop.eup %7989  ;;  %v5718_v40 = vmul.f32 1.0614054, %v7988_v33 }
0x1bbc   :  { %v5717_v61 = vmul.f32 1.0614054, %v7990_v34  ;;  %v7992_v11 = vpop.eup %7991 }
0x1bbd   :  { %v5724_v30 = vadd.f32 -1.4531521, %v5718_v40  ;;  %v7994_v29 = vpop.eup %7993 }
0x1bbe   :  { %v5723_v42 = vadd.f32 -1.4531521, %v5717_v61 }
0x1bbf   :  { %v5730_v13 = vmul.f32 %v7988_v33, %v5724_v30 }
0x1bc0   :  { %v5729_v47 = vmul.f32 %v7990_v34, %v5723_v42 }
0x1bc1   :  { %v5736_v46 = vadd.f32 1.4214138, %v5730_v13 }
0x1bc2   :  { %v5735_v27 = vadd.f32 1.4214138, %v5729_v47 }
0x1bc3   :  { %v5742_v48 = vmul.f32 %v7988_v33, %v5736_v46 }
0x1bc4   :  { %v5741_v7 = vmul.f32 %v7990_v34, %v5735_v27 }
0x1bc5   :  { %v5748_v55 = vadd.f32 -0.28449672, %v5742_v48 }
0x1bc6   :  { %v5747_v57 = vadd.f32 -0.28449672, %v5741_v7 }
0x1bc7   :  { %v5754_v38 = vmul.f32 %v7988_v33, %v5748_v55 }
0x1bc8   :  { %v5753_v1 = vmul.f32 %v7990_v34, %v5747_v57 }
0x1bc9   :  { %v5760_v21 = vadd.f32 0.2548296, %v5754_v38 }
0x1bca   :  { %v5759_v10 = vadd.f32 0.2548296, %v5753_v1 }
0x1bcb   :  { %v5766_v28 = vmul.f32 %v7988_v33, %v5760_v21 }
0x1bcc   :  { %v5765_v58 = vmul.f32 %v7990_v34, %v5759_v10 }
0x1bcd   :  { %v5796_v24 = vmul.f32 %v7992_v11, %v5766_v28 }
0x1bce   :  { %v5795_v45 = vmul.f32 %v7994_v29, %v5765_v58 }
0x1bcf   :  { %v5802_v54 = vsub.f32 1.0, %v5796_v24 }
0x1bd0   :  { %v5801_v35 = vsub.f32 1.0, %v5795_v45 }
0x1bd1   :  { %v5808_v22 = vmul.f32 %v5802_v54, %v5688_v20 }
0x1bd2   :  { %v5807_v4 = vmul.f32 %v5801_v35, %v5687_v59 }
0x1bd3   :  { %v5814_v9 = vadd.f32 1.0, %v5808_v22 }
0x1bd4   :  { %v5813_v19 = vadd.f32 1.0, %v5807_v4 }
0x1bd5   :  { %v5820_v62 = vmul.f32 %v5814_v9, %v5670_v53 }
0x1bd6   :  { %v5819_v32 = vmul.f32 %v5813_v19, %v5669_v17 }
0x1bd8   :  { %7245 = vmatprep.mubr.f32.mxu1 %v5819_v32 }
0x1bd9   :  { %7246 = vmatmul.mubr.f32.gmra.mrb[124].mxu1 %v5820_v62 }
0x1c8c   :  { %v6047_v52 = vpop.f32.mrb[126].mxu0 }
0x1c8d   :  { %v6048_v5 = vadd.f32 %v6281_v23, %v6047_v52  ;;  %v7258_v12 = vpop.f32.mrb[127].mxu0 }
0x1c8f   :  { %6051 = vst [vmem:[#allocation2] sm:$0x3] %v6048_v5 }
0x1c90   :  { %8008 = shalt.err (!%p8005_p4)
}
0x1c91   :  { %s8009_s21 = scalar_lea.hbm %s10169_s11, 32 }
0x1c92   :  { %p8010_p5 = scmp.ne.s32.totalorder %s10169_s11, %s8009_s21  ;;  %p8013_p6 = scmp.lt.u32.totalorder %s8009_s21, %s10169_s11 }
0x1c94   :  { %p8015_p7 = pnand %p8013_p6, %p8010_p5 }
0x1c96   :  { %8018 = shalt.err (!%p8015_p7)
}
0x1c97   :  { %6061 = dma.vmem_to_hbm [thread:$0]  %s6059_s4, 32, %s10169_s11, [#allocation3]  }
0x1cac   :  { %v7247_v63 = vpop.f32.mrb[124].mxu1 }
0x1cad   :  { %v5922_v26 = vpop.f32.mrb[125].mxu1 }
0x1cae   :  { %8019 = dma.done.wait [#allocation3], 32  }
0x1caf   :  { %8020 = vsyncadd [#allocation3], 4294967264 }
0x1cb0   :  { %6065 = vsyncpa [#allocation3], 1 }

</bundles_post_ra>
